<compile_context>
chip_gen: v7x
topology: tpu7x:2x2x1
jax: 0.10.0
libtpu: 0.0.40
codegen_flags: <defaults>
</compile_context>

<pallas_src>
import functools

import jax
import jax.numpy as jnp
from jax.experimental import pallas as pl
from jax.experimental.pallas import tpu as pltpu

EPS = 1e-5
F_P = 128  # padded lane width used for every feature dimension


# ----------------------------- shared math (kernel + reference) --------------

def _softplus(x):
    # nn.Softplus(beta=1, threshold=20)
    return jnp.where(x > 20.0, x, jnp.log(1.0 + jnp.exp(jnp.minimum(x, 20.0))))


def _sigmoid(x):
    return 1.0 / (1.0 + jnp.exp(-x))


def _bn_train(x, gamma, beta):
    # BatchNorm1d forward in (default) training mode: batch stats, biased var.
    mean = jnp.mean(x, axis=0, keepdims=True)
    var = jnp.mean((x - mean) ** 2, axis=0, keepdims=True)
    return gamma * (x - mean) * jax.lax.rsqrt(var + EPS) + beta


# ----------------------------- fused Pallas kernel ----------------------------

def _cgcnn_kernel(atom_in_ref, nbr_ref, smat_ref, gmat_ref, seg_ref, pool_ref,
                  emb_w_ref, emb_b_ref,
                  wa_ref, wn_ref, b_ref, g1_ref, be1_ref, g2_ref, be2_ref,
                  fcw_ref, fcb_ref, outw_ref, outb_ref,
                  o_ref, *, n_conv, af, fp):
    def mm(a, b2):
        return jnp.dot(a, b2, preferred_element_type=jnp.float32)

    # Lane mask that re-zeroes the padded feature lanes (>= af) each layer.
    lane = jax.lax.broadcasted_iota(jnp.int32, (1, fp), 1)
    lane_mask = (lane < af).astype(jnp.float32)                    # [1, fp]

    # Loop-invariant operands hoisted into vregs once.
    smat = smat_ref[...]          # [NM, N] one-hot: edge row j -> atom j // M
    gmat = gmat_ref[...]          # [NM, N] one-hot: edge row j -> nbr_idx[j]
    seg = seg_ref[...]            # [N, NM] segment-sum matrix (= smat.T)
    nbr = nbr_ref[...]            # [NM, fp]

    # Embedding: atom features stay live in vregs for the whole forward.
    atom = mm(atom_in_ref[...], emb_w_ref[...]) + emb_b_ref[...]   # [N, fp]

    for l in range(n_conv):
        # fc_full packed as two matmuls:
        #   atom side: [N, fp] @ [fp, 4fp] -> [self_f | self_c | nbr_f | nbr_c]
        #   edge side: [NM, fp] @ [fp, 2fp] -> [edge_f | edge_c]  (+ bias)
        proj = mm(atom, wa_ref[l])                                 # [N, 4fp]
        edge = mm(nbr, wn_ref[l]) + b_ref[l]                       # [NM, 2fp]

        # Self broadcast + neighbour gather as one-hot MXU matmuls (no scalar
        # loops, no masked partial stores, no VMEM round-trip).
        gated = (mm(smat, proj[:, :2 * fp]) +
                 mm(gmat, proj[:, 2 * fp:]) + edge)                # [NM, 2fp]
        gated = _bn_train(gated, g1_ref[l], be1_ref[l])

        filt = _sigmoid(gated[:, :fp])                             # lane-aligned slices
        core = _softplus(gated[:, fp:])
        prod = filt * core * lane_mask                             # [NM, fp]

        # Per-atom neighbour reduction as one [N, NM] @ [NM, fp] matmul.
        summed = _bn_train(mm(seg, prod), g2_ref[l], be2_ref[l])   # [N, fp]
        atom = _softplus(atom + summed) * lane_mask                # pad lanes stay 0

    # Pooling (mean per crystal encoded in the pool matrix) + MLP head.
    crys = mm(pool_ref[...], atom)                                 # [Cp, fp]
    h = _softplus(mm(_softplus(crys), fcw_ref[...]) + fcb_ref[...])
    o_ref[...] = mm(h, outw_ref[...]) + outb_ref[...]              # [Cp, fp]


# ----------------------------- padding / packing helpers ----------------------

def _pad2(x, rows, cols):
    return jnp.pad(x, ((0, rows - x.shape[0]), (0, cols - x.shape[1])))


def _pack_conv(p, af, fp):
    w, b = p["w_full"], p["b_full"]           # [2*af + nf, 2*af], [1, 2*af]
    w1, w2, w3 = w[:af], w[af:2 * af], w[2 * af:]

    def blk(m):                                # zero-pad a weight block to [fp, fp]
        return _pad2(m, fp, fp)

    wa = jnp.concatenate([blk(w1[:, :af]), blk(w1[:, af:]),
                          blk(w2[:, :af]), blk(w2[:, af:])], axis=1)   # [fp, 4fp]
    wn = jnp.concatenate([blk(w3[:, :af]), blk(w3[:, af:])], axis=1)   # [fp, 2fp]

    def pack2(v):                              # [1, 2af] -> [1, 2fp] (filter|core)
        return jnp.concatenate([_pad2(v[:, :af], 1, fp),
                                _pad2(v[:, af:], 1, fp)], axis=1)

    def pack1(v):                              # [1, af] -> [1, fp]
        return _pad2(v, 1, fp)

    return (wa, wn, pack2(b), pack2(p["g1"]), pack2(p["be1"]),
            pack1(p["g2"]), pack1(p["be2"]))


def _vmem_specs(n):
    return [pl.BlockSpec(memory_space=pltpu.MemorySpace.VMEM) for _ in range(n)]


# ----------------------------- forward wrapper --------------------------------

def cgcnn_forward(atom_fea_in, nbr_fea, nbr_idx, pool_mat, params, *, fp=F_P):
    """Fused Pallas forward pass (classification=False, n_h=1)."""
    N, M = nbr_idx.shape
    NM = N * M
    af = params["emb_w"].shape[1]
    n_conv = len(params["convs"])
    n_out = params["out_w"].shape[1]

    # ---- pad inputs (lane dims -> fp; rows NOT padded: BN uses row stats)
    atom_in_p = _pad2(atom_fea_in.astype(jnp.float32), N, fp)
    nbr_p = _pad2(nbr_fea.reshape(NM, -1).astype(jnp.float32), NM, fp)
    idx_flat = nbr_idx.reshape(NM).astype(jnp.int32)

    # Self-broadcast / neighbour-gather / segment-sum one-hot matrices.
    # Fine for small graphs; see TODO at top for the large-graph path.
    self_idx = jnp.arange(NM, dtype=jnp.int32) // M
    smat = jax.nn.one_hot(self_idx, N, dtype=jnp.float32)          # [NM, N]
    gmat = jax.nn.one_hot(idx_flat, N, dtype=jnp.float32)          # [NM, N]
    seg = smat.T                                                   # [N, NM]

    c = pool_mat.shape[0]
    c_pad = ((c + 7) // 8) * 8
    pool_p = _pad2(pool_mat.astype(jnp.float32), c_pad, N)

    # ---- pad / pack parameters (padded weight rows/cols are zero)
    emb_w_p = _pad2(params["emb_w"], fp, fp)
    emb_b_p = _pad2(params["emb_b"], 1, fp)

    packed = [_pack_conv(p, af, fp) for p in params["convs"]]
    wa_all = jnp.stack([p[0] for p in packed])     # [L, fp, 4fp]
    wn_all = jnp.stack([p[1] for p in packed])     # [L, fp, 2fp]
    b_all = jnp.stack([p[2] for p in packed])      # [L, 1, 2fp]
    g1_all = jnp.stack([p[3] for p in packed])
    be1_all = jnp.stack([p[4] for p in packed])
    g2_all = jnp.stack([p[5] for p in packed])     # [L, 1, fp]
    be2_all = jnp.stack([p[6] for p in packed])

    fc_w_p = _pad2(params["fc_w"], fp, fp)
    fc_b_p = _pad2(params["fc_b"], 1, fp)
    out_w_p = _pad2(params["out_w"], fp, fp)
    out_b_p = _pad2(params["out_b"], 1, fp)

    operands = (atom_in_p, nbr_p, smat, gmat, seg, pool_p, emb_w_p, emb_b_p,
                wa_all, wn_all, b_all, g1_all, be1_all, g2_all, be2_all,
                fc_w_p, fc_b_p, out_w_p, out_b_p)

    # ---- explicit VMEM budget + advisory cost estimate
    in_bytes = sum(int(x.size) * 4 for x in operands)
    out_bytes = c_pad * fp * 4
    vmem_limit = int(min(max(4 * (in_bytes + out_bytes), 16 * 2**20), 48 * 2**20))

    flops = 2 * (N * fp * fp
                 + n_conv * (N * fp * 4 * fp + NM * fp * 2 * fp
                             + 2 * NM * N * 2 * fp + N * NM * fp)
                 + c_pad * N * fp + 2 * c_pad * fp * fp)
    transcendentals = n_conv * (3 * NM * fp + N * fp) + 3 * c_pad * fp

    kernel = functools.partial(_cgcnn_kernel, n_conv=n_conv, af=af, fp=fp)

    out_p = pl.pallas_call(
        kernel,
        out_shape=jax.ShapeDtypeStruct((c_pad, fp), jnp.float32),
        in_specs=_vmem_specs(len(operands)),
        out_specs=pl.BlockSpec(memory_space=pltpu.MemorySpace.VMEM),
        compiler_params=pltpu.CompilerParams(vmem_limit_bytes=vmem_limit),
        cost_estimate=pl.CostEstimate(flops=int(flops),
                                      transcendentals=int(transcendentals),
                                      bytes_accessed=int(in_bytes + out_bytes)),
    )(*operands)

    return out_p[:c, :n_out]


# ----------------------------- params & pure-JAX reference --------------------

def _linear_init(key, fan_in, fan_out):
    kw, kb = jax.random.split(key)
    bound = 1.0 / float(fan_in) ** 0.5
    w = jax.random.uniform(kw, (fan_in, fan_out), jnp.float32, -bound, bound)
    b = jax.random.uniform(kb, (1, fan_out), jnp.float32, -bound, bound)
    return w, b


def init_params(key, orig_fea, nbr_fea_len, atom_fea_len, n_conv, h_fea_len):
    keys = jax.random.split(key, 3 + n_conv)
    emb_w, emb_b = _linear_init(keys[0], orig_fea, atom_fea_len)
    convs = []
    for i in range(n_conv):
        w_full, b_full = _linear_init(keys[1 + i],
                                      2 * atom_fea_len + nbr_fea_len,
                                      2 * atom_fea_len)
        convs.append(dict(
            w_full=w_full, b_full=b_full,
            g1=jnp.ones((1, 2 * atom_fea_len), jnp.float32),
            be1=jnp.zeros((1, 2 * atom_fea_len), jnp.float32),
            g2=jnp.ones((1, atom_fea_len), jnp.float32),
            be2=jnp.zeros((1, atom_fea_len), jnp.float32),
        ))
    fc_w, fc_b = _linear_init(keys[1 + n_conv], atom_fea_len, h_fea_len)
    out_w, out_b = _linear_init(keys[2 + n_conv], h_fea_len, 1)
    return dict(emb_w=emb_w, emb_b=emb_b, convs=convs,
                fc_w=fc_w, fc_b=fc_b, out_w=out_w, out_b=out_b)


def reference_forward(atom_fea_in, nbr_fea, nbr_idx, pool_mat, params):
    """Pure-JAX reference mirroring the PyTorch forward (training-mode BN)."""
    x = atom_fea_in @ params["emb_w"] + params["emb_b"]
    N, M = nbr_idx.shape
    for p in params["convs"]:
        atom_nbr = x[nbr_idx]                                           # [N, M, AF]
        self_exp = jnp.broadcast_to(x[:, None, :], (N, M, x.shape[1]))
        total = jnp.concatenate([self_exp, atom_nbr, nbr_fea], axis=2)
        gated = total.reshape(N * M, -1) @ p["w_full"] + p["b_full"]
        gated = _bn_train(gated, p["g1"], p["be1"]).reshape(N, M, -1)
        filt, core = jnp.split(gated, 2, axis=2)
        summed = jnp.sum(_sigmoid(filt) * _softplus(core), axis=1)
        summed = _bn_train(summed, p["g2"], p["be2"])
        x = _softplus(x + summed)
    crys = pool_mat @ x
    crys = _softplus(crys) @ params["fc_w"] + params["fc_b"]
    crys = _softplus(crys)
    return crys @ params["out_w"] + params["out_b"]


# ----------------------------- main -------------------------------------------

if __name__ == "__main__":
    key = jax.random.PRNGKey(0)
    N_ATOMS, M_NBRS = 8, 4
    ORIG_FEA, NBR_FEA_LEN, ATOM_FEA_LEN, H_FEA_LEN = 8, 8, 16, 32
    N_CONV = 3

    k_in, k_nbr, k_idx, k_par = jax.random.split(key, 4)
    atom_fea_in = jax.random.normal(k_in, (N_ATOMS, ORIG_FEA), jnp.float32)
    nbr_fea = jax.random.normal(k_nbr, (N_ATOMS, M_NBRS, NBR_FEA_LEN), jnp.float32)
    nbr_idx = jax.random.randint(k_idx, (N_ATOMS, M_NBRS), 0, N_ATOMS, dtype=jnp.int32)

    # crystal_atom_idx (ragged list in the PyTorch code) -> dense mean-pooling matrix
    crystal_atom_idx = [jnp.arange(0, 5), jnp.arange(5, 8)]
    pool_mat = jnp.zeros((len(crystal_atom_idx), N_ATOMS), jnp.float32)
    for ci, idx_map in enumerate(crystal_atom_idx):
        pool_mat = pool_mat.at[ci, idx_map].set(1.0 / idx_map.shape[0])

    params = init_params(k_par, ORIG_FEA, NBR_FEA_LEN, ATOM_FEA_LEN, N_CONV, H_FEA_LEN)

    out = cgcnn_forward(atom_fea_in, nbr_fea, nbr_idx, pool_mat, params)
    out = jax.block_until_ready(out)

    ref = reference_forward(atom_fea_in, nbr_fea, nbr_idx, pool_mat, params)
    assert out.shape == (len(crystal_atom_idx), 1), out.shape
    assert jnp.allclose(out, ref, atol=2e-4, rtol=2e-4), (out, ref)

    print("KERNEL_OK")
</pallas_src>

<mosaic_0001>
module attributes {stable_mosaic.version = 11 : i64} {
  func.func @_cgcnn_kernel(%arg0: memref<8x128xf32, #tpu.memory_space<vmem>>, %arg1: memref<32x128xf32, #tpu.memory_space<vmem>>, %arg2: memref<32x8xf32, #tpu.memory_space<vmem>>, %arg3: memref<32x8xf32, #tpu.memory_space<vmem>>, %arg4: memref<8x32xf32, #tpu.memory_space<vmem>>, %arg5: memref<8x8xf32, #tpu.memory_space<vmem>>, %arg6: memref<128x128xf32, #tpu.memory_space<vmem>>, %arg7: memref<1x128xf32, #tpu.memory_space<vmem>>, %arg8: memref<3x128x512xf32, #tpu.memory_space<vmem>>, %arg9: memref<3x128x256xf32, #tpu.memory_space<vmem>>, %arg10: memref<3x1x256xf32, #tpu.memory_space<vmem>>, %arg11: memref<3x1x256xf32, #tpu.memory_space<vmem>>, %arg12: memref<3x1x256xf32, #tpu.memory_space<vmem>>, %arg13: memref<3x1x128xf32, #tpu.memory_space<vmem>>, %arg14: memref<3x1x128xf32, #tpu.memory_space<vmem>>, %arg15: memref<128x128xf32, #tpu.memory_space<vmem>>, %arg16: memref<1x128xf32, #tpu.memory_space<vmem>>, %arg17: memref<128x128xf32, #tpu.memory_space<vmem>>, %arg18: memref<1x128xf32, #tpu.memory_space<vmem>>, %arg19: memref<8x128xf32, #tpu.memory_space<vmem>>) attributes {dimension_semantics = [], scalar_prefetch = 0 : i64, scratch_operands = 0 : i64, tpu.core_type = #tpu.core_type<tc>} {
    %0 = tpu.iota {dimensions = array<i32: 1>} : vector<1x128xi32>
    %c16_i32 = arith.constant 16 : i32
    %1 = vector.broadcast %c16_i32 : i32 to vector<1x128xi32>
    %2 = arith.cmpi slt, %0, %1 : vector<1x128xi32>
    %3 = arith.extui %2 : vector<1x128xi1> to vector<1x128xi32>
    %4 = arith.sitofp %3 : vector<1x128xi32> to vector<1x128xf32>
    %c0 = arith.constant 0 : index
    %c0_0 = arith.constant 0 : index
    %5 = vector.load %arg2[%c0, %c0_0] : memref<32x8xf32, #tpu.memory_space<vmem>>, vector<32x8xf32>
    %c0_1 = arith.constant 0 : index
    %c0_2 = arith.constant 0 : index
    %6 = vector.load %arg3[%c0_1, %c0_2] : memref<32x8xf32, #tpu.memory_space<vmem>>, vector<32x8xf32>
    %c0_3 = arith.constant 0 : index
    %c0_4 = arith.constant 0 : index
    %7 = vector.load %arg4[%c0_3, %c0_4] : memref<8x32xf32, #tpu.memory_space<vmem>>, vector<8x32xf32>
    %c0_5 = arith.constant 0 : index
    %c0_6 = arith.constant 0 : index
    %8 = vector.load %arg1[%c0_5, %c0_6] : memref<32x128xf32, #tpu.memory_space<vmem>>, vector<32x128xf32>
    %c0_7 = arith.constant 0 : index
    %c0_8 = arith.constant 0 : index
    %9 = vector.load %arg0[%c0_7, %c0_8] : memref<8x128xf32, #tpu.memory_space<vmem>>, vector<8x128xf32>
    %c0_9 = arith.constant 0 : index
    %c0_10 = arith.constant 0 : index
    %10 = vector.load %arg6[%c0_9, %c0_10] : memref<128x128xf32, #tpu.memory_space<vmem>>, vector<128x128xf32>
    %cst = arith.constant dense<0.000000e+00> : vector<8x128xf32>
    %11 = tpu.matmul %9, %10, %cst {dimension_numbers = #tpu.dot_dimension_numbers<[1], [0], [0], [1], [0, 0, 1, 1], [], []>} : vector<8x128xf32>, vector<128x128xf32>, vector<8x128xf32> -> vector<8x128xf32>
    %c0_11 = arith.constant 0 : index
    %c0_12 = arith.constant 0 : index
    %12 = vector.load %arg7[%c0_11, %c0_12] : memref<1x128xf32, #tpu.memory_space<vmem>>, vector<1x128xf32>
    %13 = vector.broadcast %12 : vector<1x128xf32> to vector<8x128xf32>
    %14 = arith.addf %11, %13 : vector<8x128xf32>
    %c0_13 = arith.constant 0 : index
    %c0_14 = arith.constant 0 : index
    %c0_15 = arith.constant 0 : index
    %15 = vector.load %arg8[%c0_13, %c0_14, %c0_15] : memref<3x128x512xf32, #tpu.memory_space<vmem>>, vector<1x128x512xf32>
    %16 = vector.shape_cast %15 : vector<1x128x512xf32> to vector<128x512xf32>
    %cst_16 = arith.constant dense<0.000000e+00> : vector<8x512xf32>
    %17 = tpu.matmul %14, %16, %cst_16 {dimension_numbers = #tpu.dot_dimension_numbers<[1], [0], [0], [1], [0, 0, 1, 1], [], []>} : vector<8x128xf32>, vector<128x512xf32>, vector<8x512xf32> -> vector<8x512xf32>
    %c0_17 = arith.constant 0 : index
    %c0_18 = arith.constant 0 : index
    %c0_19 = arith.constant 0 : index
    %18 = vector.load %arg9[%c0_17, %c0_18, %c0_19] : memref<3x128x256xf32, #tpu.memory_space<vmem>>, vector<1x128x256xf32>
    %19 = vector.shape_cast %18 : vector<1x128x256xf32> to vector<128x256xf32>
    %cst_20 = arith.constant dense<0.000000e+00> : vector<32x256xf32>
    %20 = tpu.matmul %8, %19, %cst_20 {dimension_numbers = #tpu.dot_dimension_numbers<[1], [0], [0], [1], [0, 0, 1, 1], [], []>} : vector<32x128xf32>, vector<128x256xf32>, vector<32x256xf32> -> vector<32x256xf32>
    %c0_21 = arith.constant 0 : index
    %c0_22 = arith.constant 0 : index
    %c0_23 = arith.constant 0 : index
    %21 = vector.load %arg10[%c0_21, %c0_22, %c0_23] : memref<3x1x256xf32, #tpu.memory_space<vmem>>, vector<1x1x256xf32>
    %22 = vector.shape_cast %21 : vector<1x1x256xf32> to vector<1x256xf32>
    %23 = vector.broadcast %22 : vector<1x256xf32> to vector<32x256xf32>
    %24 = arith.addf %20, %23 : vector<32x256xf32>
    %25 = vector.extract_strided_slice %17 {offsets = [0, 0], sizes = [8, 256], strides = [1, 1]} : vector<8x512xf32> to vector<8x256xf32>
    %cst_24 = arith.constant dense<0.000000e+00> : vector<32x256xf32>
    %26 = tpu.matmul %5, %25, %cst_24 {dimension_numbers = #tpu.dot_dimension_numbers<[1], [0], [0], [1], [0, 0, 1, 1], [], []>} : vector<32x8xf32>, vector<8x256xf32>, vector<32x256xf32> -> vector<32x256xf32>
    %27 = vector.extract_strided_slice %17 {offsets = [0, 256], sizes = [8, 256], strides = [1, 1]} : vector<8x512xf32> to vector<8x256xf32>
    %cst_25 = arith.constant dense<0.000000e+00> : vector<32x256xf32>
    %28 = tpu.matmul %6, %27, %cst_25 {dimension_numbers = #tpu.dot_dimension_numbers<[1], [0], [0], [1], [0, 0, 1, 1], [], []>} : vector<32x8xf32>, vector<8x256xf32>, vector<32x256xf32> -> vector<32x256xf32>
    %29 = arith.addf %26, %28 : vector<32x256xf32>
    %30 = arith.addf %29, %24 : vector<32x256xf32>
    %c0_26 = arith.constant 0 : index
    %c0_27 = arith.constant 0 : index
    %c0_28 = arith.constant 0 : index
    %31 = vector.load %arg11[%c0_26, %c0_27, %c0_28] : memref<3x1x256xf32, #tpu.memory_space<vmem>>, vector<1x1x256xf32>
    %32 = vector.shape_cast %31 : vector<1x1x256xf32> to vector<1x256xf32>
    %c0_29 = arith.constant 0 : index
    %c0_30 = arith.constant 0 : index
    %c0_31 = arith.constant 0 : index
    %33 = vector.load %arg12[%c0_29, %c0_30, %c0_31] : memref<3x1x256xf32, #tpu.memory_space<vmem>>, vector<1x1x256xf32>
    %34 = vector.shape_cast %33 : vector<1x1x256xf32> to vector<1x256xf32>
    %cst_32 = arith.constant dense<0.000000e+00> : vector<256xf32>
    %35 = vector.multi_reduction <add>, %30, %cst_32 [0] : vector<32x256xf32> to vector<256xf32>
    %36 = vector.shape_cast %35 : vector<256xf32> to vector<1x256xf32>
    %cst_33 = arith.constant 3.200000e+01 : f32
    %37 = vector.broadcast %cst_33 : f32 to vector<1x256xf32>
    %38 = arith.divf %36, %37 : vector<1x256xf32>
    %39 = vector.broadcast %38 : vector<1x256xf32> to vector<32x256xf32>
    %40 = arith.subf %30, %39 : vector<32x256xf32>
    %41 = arith.mulf %40, %40 : vector<32x256xf32>
    %cst_34 = arith.constant dense<0.000000e+00> : vector<256xf32>
    %42 = vector.multi_reduction <add>, %41, %cst_34 [0] : vector<32x256xf32> to vector<256xf32>
    %43 = vector.shape_cast %42 : vector<256xf32> to vector<1x256xf32>
    %cst_35 = arith.constant 3.200000e+01 : f32
    %44 = vector.broadcast %cst_35 : f32 to vector<1x256xf32>
    %45 = arith.divf %43, %44 : vector<1x256xf32>
    %46 = vector.broadcast %38 : vector<1x256xf32> to vector<32x256xf32>
    %47 = arith.subf %30, %46 : vector<32x256xf32>
    %48 = vector.broadcast %32 : vector<1x256xf32> to vector<32x256xf32>
    %49 = arith.mulf %48, %47 : vector<32x256xf32>
    %cst_36 = arith.constant 9.99999974E-6 : f32
    %50 = vector.broadcast %cst_36 : f32 to vector<1x256xf32>
    %51 = arith.addf %45, %50 : vector<1x256xf32>
    %52 = math.rsqrt %51 : vector<1x256xf32>
    %53 = vector.broadcast %52 : vector<1x256xf32> to vector<32x256xf32>
    %54 = arith.mulf %49, %53 : vector<32x256xf32>
    %55 = vector.broadcast %34 : vector<1x256xf32> to vector<32x256xf32>
    %56 = arith.addf %54, %55 : vector<32x256xf32>
    %57 = vector.extract_strided_slice %56 {offsets = [0, 0], sizes = [32, 128], strides = [1, 1]} : vector<32x256xf32> to vector<32x128xf32>
    %cst_37 = arith.constant 0.000000e+00 : f32
    %58 = vector.broadcast %cst_37 : f32 to vector<32x128xf32>
    %59 = arith.subf %58, %57 : vector<32x128xf32>
    %60 = math.exp %59 : vector<32x128xf32>
    %cst_38 = arith.constant 1.000000e+00 : f32
    %61 = vector.broadcast %cst_38 : f32 to vector<32x128xf32>
    %62 = arith.addf %61, %60 : vector<32x128xf32>
    %cst_39 = arith.constant 1.000000e+00 : f32
    %63 = vector.broadcast %cst_39 : f32 to vector<32x128xf32>
    %64 = arith.divf %63, %62 : vector<32x128xf32>
    %65 = vector.extract_strided_slice %56 {offsets = [0, 128], sizes = [32, 128], strides = [1, 1]} : vector<32x256xf32> to vector<32x128xf32>
    %cst_40 = arith.constant 2.000000e+01 : f32
    %66 = vector.broadcast %cst_40 : f32 to vector<32x128xf32>
    %67 = arith.cmpf ogt, %65, %66 : vector<32x128xf32>
    %cst_41 = arith.constant 2.000000e+01 : f32
    %68 = vector.broadcast %cst_41 : f32 to vector<32x128xf32>
    %69 = arith.minimumf %65, %68 : vector<32x128xf32>
    %70 = math.exp %69 : vector<32x128xf32>
    %cst_42 = arith.constant 1.000000e+00 : f32
    %71 = vector.broadcast %cst_42 : f32 to vector<32x128xf32>
    %72 = arith.addf %71, %70 : vector<32x128xf32>
    %73 = math.log %72 : vector<32x128xf32>
    %74 = arith.select %67, %65, %73 : vector<32x128xi1>, vector<32x128xf32>
    %75 = arith.mulf %64, %74 : vector<32x128xf32>
    %76 = vector.broadcast %4 : vector<1x128xf32> to vector<32x128xf32>
    %77 = arith.mulf %75, %76 : vector<32x128xf32>
    %cst_43 = arith.constant dense<0.000000e+00> : vector<8x128xf32>
    %78 = tpu.matmul %7, %77, %cst_43 {dimension_numbers = #tpu.dot_dimension_numbers<[1], [0], [0], [1], [0, 0, 1, 1], [], []>} : vector<8x32xf32>, vector<32x128xf32>, vector<8x128xf32> -> vector<8x128xf32>
    %c0_44 = arith.constant 0 : index
    %c0_45 = arith.constant 0 : index
    %c0_46 = arith.constant 0 : index
    %79 = vector.load %arg13[%c0_44, %c0_45, %c0_46] : memref<3x1x128xf32, #tpu.memory_space<vmem>>, vector<1x1x128xf32>
    %80 = vector.shape_cast %79 : vector<1x1x128xf32> to vector<1x128xf32>
    %c0_47 = arith.constant 0 : index
    %c0_48 = arith.constant 0 : index
    %c0_49 = arith.constant 0 : index
    %81 = vector.load %arg14[%c0_47, %c0_48, %c0_49] : memref<3x1x128xf32, #tpu.memory_space<vmem>>, vector<1x1x128xf32>
    %82 = vector.shape_cast %81 : vector<1x1x128xf32> to vector<1x128xf32>
    %cst_50 = arith.constant dense<0.000000e+00> : vector<128xf32>
    %83 = vector.multi_reduction <add>, %78, %cst_50 [0] : vector<8x128xf32> to vector<128xf32>
    %84 = vector.shape_cast %83 : vector<128xf32> to vector<1x128xf32>
    %cst_51 = arith.constant 8.000000e+00 : f32
    %85 = vector.broadcast %cst_51 : f32 to vector<1x128xf32>
    %86 = arith.divf %84, %85 : vector<1x128xf32>
    %87 = vector.broadcast %86 : vector<1x128xf32> to vector<8x128xf32>
    %88 = arith.subf %78, %87 : vector<8x128xf32>
    %89 = arith.mulf %88, %88 : vector<8x128xf32>
    %cst_52 = arith.constant dense<0.000000e+00> : vector<128xf32>
    %90 = vector.multi_reduction <add>, %89, %cst_52 [0] : vector<8x128xf32> to vector<128xf32>
    %91 = vector.shape_cast %90 : vector<128xf32> to vector<1x128xf32>
    %cst_53 = arith.constant 8.000000e+00 : f32
    %92 = vector.broadcast %cst_53 : f32 to vector<1x128xf32>
    %93 = arith.divf %91, %92 : vector<1x128xf32>
    %94 = vector.broadcast %86 : vector<1x128xf32> to vector<8x128xf32>
    %95 = arith.subf %78, %94 : vector<8x128xf32>
    %96 = vector.broadcast %80 : vector<1x128xf32> to vector<8x128xf32>
    %97 = arith.mulf %96, %95 : vector<8x128xf32>
    %cst_54 = arith.constant 9.99999974E-6 : f32
    %98 = vector.broadcast %cst_54 : f32 to vector<1x128xf32>
    %99 = arith.addf %93, %98 : vector<1x128xf32>
    %100 = math.rsqrt %99 : vector<1x128xf32>
    %101 = vector.broadcast %100 : vector<1x128xf32> to vector<8x128xf32>
    %102 = arith.mulf %97, %101 : vector<8x128xf32>
    %103 = vector.broadcast %82 : vector<1x128xf32> to vector<8x128xf32>
    %104 = arith.addf %102, %103 : vector<8x128xf32>
    %105 = arith.addf %14, %104 : vector<8x128xf32>
    %cst_55 = arith.constant 2.000000e+01 : f32
    %106 = vector.broadcast %cst_55 : f32 to vector<8x128xf32>
    %107 = arith.cmpf ogt, %105, %106 : vector<8x128xf32>
    %cst_56 = arith.constant 2.000000e+01 : f32
    %108 = vector.broadcast %cst_56 : f32 to vector<8x128xf32>
    %109 = arith.minimumf %105, %108 : vector<8x128xf32>
    %110 = math.exp %109 : vector<8x128xf32>
    %cst_57 = arith.constant 1.000000e+00 : f32
    %111 = vector.broadcast %cst_57 : f32 to vector<8x128xf32>
    %112 = arith.addf %111, %110 : vector<8x128xf32>
    %113 = math.log %112 : vector<8x128xf32>
    %114 = arith.select %107, %105, %113 : vector<8x128xi1>, vector<8x128xf32>
    %115 = vector.broadcast %4 : vector<1x128xf32> to vector<8x128xf32>
    %116 = arith.mulf %114, %115 : vector<8x128xf32>
    %c1 = arith.constant 1 : index
    %c0_58 = arith.constant 0 : index
    %c0_59 = arith.constant 0 : index
    %117 = vector.load %arg8[%c1, %c0_58, %c0_59] : memref<3x128x512xf32, #tpu.memory_space<vmem>>, vector<1x128x512xf32>
    %118 = vector.shape_cast %117 : vector<1x128x512xf32> to vector<128x512xf32>
    %cst_60 = arith.constant dense<0.000000e+00> : vector<8x512xf32>
    %119 = tpu.matmul %116, %118, %cst_60 {dimension_numbers = #tpu.dot_dimension_numbers<[1], [0], [0], [1], [0, 0, 1, 1], [], []>} : vector<8x128xf32>, vector<128x512xf32>, vector<8x512xf32> -> vector<8x512xf32>
    %c1_61 = arith.constant 1 : index
    %c0_62 = arith.constant 0 : index
    %c0_63 = arith.constant 0 : index
    %120 = vector.load %arg9[%c1_61, %c0_62, %c0_63] : memref<3x128x256xf32, #tpu.memory_space<vmem>>, vector<1x128x256xf32>
    %121 = vector.shape_cast %120 : vector<1x128x256xf32> to vector<128x256xf32>
    %cst_64 = arith.constant dense<0.000000e+00> : vector<32x256xf32>
    %122 = tpu.matmul %8, %121, %cst_64 {dimension_numbers = #tpu.dot_dimension_numbers<[1], [0], [0], [1], [0, 0, 1, 1], [], []>} : vector<32x128xf32>, vector<128x256xf32>, vector<32x256xf32> -> vector<32x256xf32>
    %c1_65 = arith.constant 1 : index
    %c0_66 = arith.constant 0 : index
    %c0_67 = arith.constant 0 : index
    %123 = vector.load %arg10[%c1_65, %c0_66, %c0_67] : memref<3x1x256xf32, #tpu.memory_space<vmem>>, vector<1x1x256xf32>
    %124 = vector.shape_cast %123 : vector<1x1x256xf32> to vector<1x256xf32>
    %125 = vector.broadcast %124 : vector<1x256xf32> to vector<32x256xf32>
    %126 = arith.addf %122, %125 : vector<32x256xf32>
    %127 = vector.extract_strided_slice %119 {offsets = [0, 0], sizes = [8, 256], strides = [1, 1]} : vector<8x512xf32> to vector<8x256xf32>
    %cst_68 = arith.constant dense<0.000000e+00> : vector<32x256xf32>
    %128 = tpu.matmul %5, %127, %cst_68 {dimension_numbers = #tpu.dot_dimension_numbers<[1], [0], [0], [1], [0, 0, 1, 1], [], []>} : vector<32x8xf32>, vector<8x256xf32>, vector<32x256xf32> -> vector<32x256xf32>
    %129 = vector.extract_strided_slice %119 {offsets = [0, 256], sizes = [8, 256], strides = [1, 1]} : vector<8x512xf32> to vector<8x256xf32>
    %cst_69 = arith.constant dense<0.000000e+00> : vector<32x256xf32>
    %130 = tpu.matmul %6, %129, %cst_69 {dimension_numbers = #tpu.dot_dimension_numbers<[1], [0], [0], [1], [0, 0, 1, 1], [], []>} : vector<32x8xf32>, vector<8x256xf32>, vector<32x256xf32> -> vector<32x256xf32>
    %131 = arith.addf %128, %130 : vector<32x256xf32>
    %132 = arith.addf %131, %126 : vector<32x256xf32>
    %c1_70 = arith.constant 1 : index
    %c0_71 = arith.constant 0 : index
    %c0_72 = arith.constant 0 : index
    %133 = vector.load %arg11[%c1_70, %c0_71, %c0_72] : memref<3x1x256xf32, #tpu.memory_space<vmem>>, vector<1x1x256xf32>
    %134 = vector.shape_cast %133 : vector<1x1x256xf32> to vector<1x256xf32>
    %c1_73 = arith.constant 1 : index
    %c0_74 = arith.constant 0 : index
    %c0_75 = arith.constant 0 : index
    %135 = vector.load %arg12[%c1_73, %c0_74, %c0_75] : memref<3x1x256xf32, #tpu.memory_space<vmem>>, vector<1x1x256xf32>
    %136 = vector.shape_cast %135 : vector<1x1x256xf32> to vector<1x256xf32>
    %cst_76 = arith.constant dense<0.000000e+00> : vector<256xf32>
    %137 = vector.multi_reduction <add>, %132, %cst_76 [0] : vector<32x256xf32> to vector<256xf32>
    %138 = vector.shape_cast %137 : vector<256xf32> to vector<1x256xf32>
    %cst_77 = arith.constant 3.200000e+01 : f32
    %139 = vector.broadcast %cst_77 : f32 to vector<1x256xf32>
    %140 = arith.divf %138, %139 : vector<1x256xf32>
    %141 = vector.broadcast %140 : vector<1x256xf32> to vector<32x256xf32>
    %142 = arith.subf %132, %141 : vector<32x256xf32>
    %143 = arith.mulf %142, %142 : vector<32x256xf32>
    %cst_78 = arith.constant dense<0.000000e+00> : vector<256xf32>
    %144 = vector.multi_reduction <add>, %143, %cst_78 [0] : vector<32x256xf32> to vector<256xf32>
    %145 = vector.shape_cast %144 : vector<256xf32> to vector<1x256xf32>
    %cst_79 = arith.constant 3.200000e+01 : f32
    %146 = vector.broadcast %cst_79 : f32 to vector<1x256xf32>
    %147 = arith.divf %145, %146 : vector<1x256xf32>
    %148 = vector.broadcast %140 : vector<1x256xf32> to vector<32x256xf32>
    %149 = arith.subf %132, %148 : vector<32x256xf32>
    %150 = vector.broadcast %134 : vector<1x256xf32> to vector<32x256xf32>
    %151 = arith.mulf %150, %149 : vector<32x256xf32>
    %cst_80 = arith.constant 9.99999974E-6 : f32
    %152 = vector.broadcast %cst_80 : f32 to vector<1x256xf32>
    %153 = arith.addf %147, %152 : vector<1x256xf32>
    %154 = math.rsqrt %153 : vector<1x256xf32>
    %155 = vector.broadcast %154 : vector<1x256xf32> to vector<32x256xf32>
    %156 = arith.mulf %151, %155 : vector<32x256xf32>
    %157 = vector.broadcast %136 : vector<1x256xf32> to vector<32x256xf32>
    %158 = arith.addf %156, %157 : vector<32x256xf32>
    %159 = vector.extract_strided_slice %158 {offsets = [0, 0], sizes = [32, 128], strides = [1, 1]} : vector<32x256xf32> to vector<32x128xf32>
    %cst_81 = arith.constant 0.000000e+00 : f32
    %160 = vector.broadcast %cst_81 : f32 to vector<32x128xf32>
    %161 = arith.subf %160, %159 : vector<32x128xf32>
    %162 = math.exp %161 : vector<32x128xf32>
    %cst_82 = arith.constant 1.000000e+00 : f32
    %163 = vector.broadcast %cst_82 : f32 to vector<32x128xf32>
    %164 = arith.addf %163, %162 : vector<32x128xf32>
    %cst_83 = arith.constant 1.000000e+00 : f32
    %165 = vector.broadcast %cst_83 : f32 to vector<32x128xf32>
    %166 = arith.divf %165, %164 : vector<32x128xf32>
    %167 = vector.extract_strided_slice %158 {offsets = [0, 128], sizes = [32, 128], strides = [1, 1]} : vector<32x256xf32> to vector<32x128xf32>
    %cst_84 = arith.constant 2.000000e+01 : f32
    %168 = vector.broadcast %cst_84 : f32 to vector<32x128xf32>
    %169 = arith.cmpf ogt, %167, %168 : vector<32x128xf32>
    %cst_85 = arith.constant 2.000000e+01 : f32
    %170 = vector.broadcast %cst_85 : f32 to vector<32x128xf32>
    %171 = arith.minimumf %167, %170 : vector<32x128xf32>
    %172 = math.exp %171 : vector<32x128xf32>
    %cst_86 = arith.constant 1.000000e+00 : f32
    %173 = vector.broadcast %cst_86 : f32 to vector<32x128xf32>
    %174 = arith.addf %173, %172 : vector<32x128xf32>
    %175 = math.log %174 : vector<32x128xf32>
    %176 = arith.select %169, %167, %175 : vector<32x128xi1>, vector<32x128xf32>
    %177 = arith.mulf %166, %176 : vector<32x128xf32>
    %178 = vector.broadcast %4 : vector<1x128xf32> to vector<32x128xf32>
    %179 = arith.mulf %177, %178 : vector<32x128xf32>
    %cst_87 = arith.constant dense<0.000000e+00> : vector<8x128xf32>
    %180 = tpu.matmul %7, %179, %cst_87 {dimension_numbers = #tpu.dot_dimension_numbers<[1], [0], [0], [1], [0, 0, 1, 1], [], []>} : vector<8x32xf32>, vector<32x128xf32>, vector<8x128xf32> -> vector<8x128xf32>
    %c1_88 = arith.constant 1 : index
    %c0_89 = arith.constant 0 : index
    %c0_90 = arith.constant 0 : index
    %181 = vector.load %arg13[%c1_88, %c0_89, %c0_90] : memref<3x1x128xf32, #tpu.memory_space<vmem>>, vector<1x1x128xf32>
    %182 = vector.shape_cast %181 : vector<1x1x128xf32> to vector<1x128xf32>
    %c1_91 = arith.constant 1 : index
    %c0_92 = arith.constant 0 : index
    %c0_93 = arith.constant 0 : index
    %183 = vector.load %arg14[%c1_91, %c0_92, %c0_93] : memref<3x1x128xf32, #tpu.memory_space<vmem>>, vector<1x1x128xf32>
    %184 = vector.shape_cast %183 : vector<1x1x128xf32> to vector<1x128xf32>
    %cst_94 = arith.constant dense<0.000000e+00> : vector<128xf32>
    %185 = vector.multi_reduction <add>, %180, %cst_94 [0] : vector<8x128xf32> to vector<128xf32>
    %186 = vector.shape_cast %185 : vector<128xf32> to vector<1x128xf32>
    %cst_95 = arith.constant 8.000000e+00 : f32
    %187 = vector.broadcast %cst_95 : f32 to vector<1x128xf32>
    %188 = arith.divf %186, %187 : vector<1x128xf32>
    %189 = vector.broadcast %188 : vector<1x128xf32> to vector<8x128xf32>
    %190 = arith.subf %180, %189 : vector<8x128xf32>
    %191 = arith.mulf %190, %190 : vector<8x128xf32>
    %cst_96 = arith.constant dense<0.000000e+00> : vector<128xf32>
    %192 = vector.multi_reduction <add>, %191, %cst_96 [0] : vector<8x128xf32> to vector<128xf32>
    %193 = vector.shape_cast %192 : vector<128xf32> to vector<1x128xf32>
    %cst_97 = arith.constant 8.000000e+00 : f32
    %194 = vector.broadcast %cst_97 : f32 to vector<1x128xf32>
    %195 = arith.divf %193, %194 : vector<1x128xf32>
    %196 = vector.broadcast %188 : vector<1x128xf32> to vector<8x128xf32>
    %197 = arith.subf %180, %196 : vector<8x128xf32>
    %198 = vector.broadcast %182 : vector<1x128xf32> to vector<8x128xf32>
    %199 = arith.mulf %198, %197 : vector<8x128xf32>
    %cst_98 = arith.constant 9.99999974E-6 : f32
    %200 = vector.broadcast %cst_98 : f32 to vector<1x128xf32>
    %201 = arith.addf %195, %200 : vector<1x128xf32>
    %202 = math.rsqrt %201 : vector<1x128xf32>
    %203 = vector.broadcast %202 : vector<1x128xf32> to vector<8x128xf32>
    %204 = arith.mulf %199, %203 : vector<8x128xf32>
    %205 = vector.broadcast %184 : vector<1x128xf32> to vector<8x128xf32>
    %206 = arith.addf %204, %205 : vector<8x128xf32>
    %207 = arith.addf %116, %206 : vector<8x128xf32>
    %cst_99 = arith.constant 2.000000e+01 : f32
    %208 = vector.broadcast %cst_99 : f32 to vector<8x128xf32>
    %209 = arith.cmpf ogt, %207, %208 : vector<8x128xf32>
    %cst_100 = arith.constant 2.000000e+01 : f32
    %210 = vector.broadcast %cst_100 : f32 to vector<8x128xf32>
    %211 = arith.minimumf %207, %210 : vector<8x128xf32>
    %212 = math.exp %211 : vector<8x128xf32>
    %cst_101 = arith.constant 1.000000e+00 : f32
    %213 = vector.broadcast %cst_101 : f32 to vector<8x128xf32>
    %214 = arith.addf %213, %212 : vector<8x128xf32>
    %215 = math.log %214 : vector<8x128xf32>
    %216 = arith.select %209, %207, %215 : vector<8x128xi1>, vector<8x128xf32>
    %217 = vector.broadcast %4 : vector<1x128xf32> to vector<8x128xf32>
    %218 = arith.mulf %216, %217 : vector<8x128xf32>
    %c2 = arith.constant 2 : index
    %c0_102 = arith.constant 0 : index
    %c0_103 = arith.constant 0 : index
    %219 = vector.load %arg8[%c2, %c0_102, %c0_103] : memref<3x128x512xf32, #tpu.memory_space<vmem>>, vector<1x128x512xf32>
    %220 = vector.shape_cast %219 : vector<1x128x512xf32> to vector<128x512xf32>
    %cst_104 = arith.constant dense<0.000000e+00> : vector<8x512xf32>
    %221 = tpu.matmul %218, %220, %cst_104 {dimension_numbers = #tpu.dot_dimension_numbers<[1], [0], [0], [1], [0, 0, 1, 1], [], []>} : vector<8x128xf32>, vector<128x512xf32>, vector<8x512xf32> -> vector<8x512xf32>
    %c2_105 = arith.constant 2 : index
    %c0_106 = arith.constant 0 : index
    %c0_107 = arith.constant 0 : index
    %222 = vector.load %arg9[%c2_105, %c0_106, %c0_107] : memref<3x128x256xf32, #tpu.memory_space<vmem>>, vector<1x128x256xf32>
    %223 = vector.shape_cast %222 : vector<1x128x256xf32> to vector<128x256xf32>
    %cst_108 = arith.constant dense<0.000000e+00> : vector<32x256xf32>
    %224 = tpu.matmul %8, %223, %cst_108 {dimension_numbers = #tpu.dot_dimension_numbers<[1], [0], [0], [1], [0, 0, 1, 1], [], []>} : vector<32x128xf32>, vector<128x256xf32>, vector<32x256xf32> -> vector<32x256xf32>
    %c2_109 = arith.constant 2 : index
    %c0_110 = arith.constant 0 : index
    %c0_111 = arith.constant 0 : index
    %225 = vector.load %arg10[%c2_109, %c0_110, %c0_111] : memref<3x1x256xf32, #tpu.memory_space<vmem>>, vector<1x1x256xf32>
    %226 = vector.shape_cast %225 : vector<1x1x256xf32> to vector<1x256xf32>
    %227 = vector.broadcast %226 : vector<1x256xf32> to vector<32x256xf32>
    %228 = arith.addf %224, %227 : vector<32x256xf32>
    %229 = vector.extract_strided_slice %221 {offsets = [0, 0], sizes = [8, 256], strides = [1, 1]} : vector<8x512xf32> to vector<8x256xf32>
    %cst_112 = arith.constant dense<0.000000e+00> : vector<32x256xf32>
    %230 = tpu.matmul %5, %229, %cst_112 {dimension_numbers = #tpu.dot_dimension_numbers<[1], [0], [0], [1], [0, 0, 1, 1], [], []>} : vector<32x8xf32>, vector<8x256xf32>, vector<32x256xf32> -> vector<32x256xf32>
    %231 = vector.extract_strided_slice %221 {offsets = [0, 256], sizes = [8, 256], strides = [1, 1]} : vector<8x512xf32> to vector<8x256xf32>
    %cst_113 = arith.constant dense<0.000000e+00> : vector<32x256xf32>
    %232 = tpu.matmul %6, %231, %cst_113 {dimension_numbers = #tpu.dot_dimension_numbers<[1], [0], [0], [1], [0, 0, 1, 1], [], []>} : vector<32x8xf32>, vector<8x256xf32>, vector<32x256xf32> -> vector<32x256xf32>
    %233 = arith.addf %230, %232 : vector<32x256xf32>
    %234 = arith.addf %233, %228 : vector<32x256xf32>
    %c2_114 = arith.constant 2 : index
    %c0_115 = arith.constant 0 : index
    %c0_116 = arith.constant 0 : index
    %235 = vector.load %arg11[%c2_114, %c0_115, %c0_116] : memref<3x1x256xf32, #tpu.memory_space<vmem>>, vector<1x1x256xf32>
    %236 = vector.shape_cast %235 : vector<1x1x256xf32> to vector<1x256xf32>
    %c2_117 = arith.constant 2 : index
    %c0_118 = arith.constant 0 : index
    %c0_119 = arith.constant 0 : index
    %237 = vector.load %arg12[%c2_117, %c0_118, %c0_119] : memref<3x1x256xf32, #tpu.memory_space<vmem>>, vector<1x1x256xf32>
    %238 = vector.shape_cast %237 : vector<1x1x256xf32> to vector<1x256xf32>
    %cst_120 = arith.constant dense<0.000000e+00> : vector<256xf32>
    %239 = vector.multi_reduction <add>, %234, %cst_120 [0] : vector<32x256xf32> to vector<256xf32>
    %240 = vector.shape_cast %239 : vector<256xf32> to vector<1x256xf32>
    %cst_121 = arith.constant 3.200000e+01 : f32
    %241 = vector.broadcast %cst_121 : f32 to vector<1x256xf32>
    %242 = arith.divf %240, %241 : vector<1x256xf32>
    %243 = vector.broadcast %242 : vector<1x256xf32> to vector<32x256xf32>
    %244 = arith.subf %234, %243 : vector<32x256xf32>
    %245 = arith.mulf %244, %244 : vector<32x256xf32>
    %cst_122 = arith.constant dense<0.000000e+00> : vector<256xf32>
    %246 = vector.multi_reduction <add>, %245, %cst_122 [0] : vector<32x256xf32> to vector<256xf32>
    %247 = vector.shape_cast %246 : vector<256xf32> to vector<1x256xf32>
    %cst_123 = arith.constant 3.200000e+01 : f32
    %248 = vector.broadcast %cst_123 : f32 to vector<1x256xf32>
    %249 = arith.divf %247, %248 : vector<1x256xf32>
    %250 = vector.broadcast %242 : vector<1x256xf32> to vector<32x256xf32>
    %251 = arith.subf %234, %250 : vector<32x256xf32>
    %252 = vector.broadcast %236 : vector<1x256xf32> to vector<32x256xf32>
    %253 = arith.mulf %252, %251 : vector<32x256xf32>
    %cst_124 = arith.constant 9.99999974E-6 : f32
    %254 = vector.broadcast %cst_124 : f32 to vector<1x256xf32>
    %255 = arith.addf %249, %254 : vector<1x256xf32>
    %256 = math.rsqrt %255 : vector<1x256xf32>
    %257 = vector.broadcast %256 : vector<1x256xf32> to vector<32x256xf32>
    %258 = arith.mulf %253, %257 : vector<32x256xf32>
    %259 = vector.broadcast %238 : vector<1x256xf32> to vector<32x256xf32>
    %260 = arith.addf %258, %259 : vector<32x256xf32>
    %261 = vector.extract_strided_slice %260 {offsets = [0, 0], sizes = [32, 128], strides = [1, 1]} : vector<32x256xf32> to vector<32x128xf32>
    %cst_125 = arith.constant 0.000000e+00 : f32
    %262 = vector.broadcast %cst_125 : f32 to vector<32x128xf32>
    %263 = arith.subf %262, %261 : vector<32x128xf32>
    %264 = math.exp %263 : vector<32x128xf32>
    %cst_126 = arith.constant 1.000000e+00 : f32
    %265 = vector.broadcast %cst_126 : f32 to vector<32x128xf32>
    %266 = arith.addf %265, %264 : vector<32x128xf32>
    %cst_127 = arith.constant 1.000000e+00 : f32
    %267 = vector.broadcast %cst_127 : f32 to vector<32x128xf32>
    %268 = arith.divf %267, %266 : vector<32x128xf32>
    %269 = vector.extract_strided_slice %260 {offsets = [0, 128], sizes = [32, 128], strides = [1, 1]} : vector<32x256xf32> to vector<32x128xf32>
    %cst_128 = arith.constant 2.000000e+01 : f32
    %270 = vector.broadcast %cst_128 : f32 to vector<32x128xf32>
    %271 = arith.cmpf ogt, %269, %270 : vector<32x128xf32>
    %cst_129 = arith.constant 2.000000e+01 : f32
    %272 = vector.broadcast %cst_129 : f32 to vector<32x128xf32>
    %273 = arith.minimumf %269, %272 : vector<32x128xf32>
    %274 = math.exp %273 : vector<32x128xf32>
    %cst_130 = arith.constant 1.000000e+00 : f32
    %275 = vector.broadcast %cst_130 : f32 to vector<32x128xf32>
    %276 = arith.addf %275, %274 : vector<32x128xf32>
    %277 = math.log %276 : vector<32x128xf32>
    %278 = arith.select %271, %269, %277 : vector<32x128xi1>, vector<32x128xf32>
    %279 = arith.mulf %268, %278 : vector<32x128xf32>
    %280 = vector.broadcast %4 : vector<1x128xf32> to vector<32x128xf32>
    %281 = arith.mulf %279, %280 : vector<32x128xf32>
    %cst_131 = arith.constant dense<0.000000e+00> : vector<8x128xf32>
    %282 = tpu.matmul %7, %281, %cst_131 {dimension_numbers = #tpu.dot_dimension_numbers<[1], [0], [0], [1], [0, 0, 1, 1], [], []>} : vector<8x32xf32>, vector<32x128xf32>, vector<8x128xf32> -> vector<8x128xf32>
    %c2_132 = arith.constant 2 : index
    %c0_133 = arith.constant 0 : index
    %c0_134 = arith.constant 0 : index
    %283 = vector.load %arg13[%c2_132, %c0_133, %c0_134] : memref<3x1x128xf32, #tpu.memory_space<vmem>>, vector<1x1x128xf32>
    %284 = vector.shape_cast %283 : vector<1x1x128xf32> to vector<1x128xf32>
    %c2_135 = arith.constant 2 : index
    %c0_136 = arith.constant 0 : index
    %c0_137 = arith.constant 0 : index
    %285 = vector.load %arg14[%c2_135, %c0_136, %c0_137] : memref<3x1x128xf32, #tpu.memory_space<vmem>>, vector<1x1x128xf32>
    %286 = vector.shape_cast %285 : vector<1x1x128xf32> to vector<1x128xf32>
    %cst_138 = arith.constant dense<0.000000e+00> : vector<128xf32>
    %287 = vector.multi_reduction <add>, %282, %cst_138 [0] : vector<8x128xf32> to vector<128xf32>
    %288 = vector.shape_cast %287 : vector<128xf32> to vector<1x128xf32>
    %cst_139 = arith.constant 8.000000e+00 : f32
    %289 = vector.broadcast %cst_139 : f32 to vector<1x128xf32>
    %290 = arith.divf %288, %289 : vector<1x128xf32>
    %291 = vector.broadcast %290 : vector<1x128xf32> to vector<8x128xf32>
    %292 = arith.subf %282, %291 : vector<8x128xf32>
    %293 = arith.mulf %292, %292 : vector<8x128xf32>
    %cst_140 = arith.constant dense<0.000000e+00> : vector<128xf32>
    %294 = vector.multi_reduction <add>, %293, %cst_140 [0] : vector<8x128xf32> to vector<128xf32>
    %295 = vector.shape_cast %294 : vector<128xf32> to vector<1x128xf32>
    %cst_141 = arith.constant 8.000000e+00 : f32
    %296 = vector.broadcast %cst_141 : f32 to vector<1x128xf32>
    %297 = arith.divf %295, %296 : vector<1x128xf32>
    %298 = vector.broadcast %290 : vector<1x128xf32> to vector<8x128xf32>
    %299 = arith.subf %282, %298 : vector<8x128xf32>
    %300 = vector.broadcast %284 : vector<1x128xf32> to vector<8x128xf32>
    %301 = arith.mulf %300, %299 : vector<8x128xf32>
    %cst_142 = arith.constant 9.99999974E-6 : f32
    %302 = vector.broadcast %cst_142 : f32 to vector<1x128xf32>
    %303 = arith.addf %297, %302 : vector<1x128xf32>
    %304 = math.rsqrt %303 : vector<1x128xf32>
    %305 = vector.broadcast %304 : vector<1x128xf32> to vector<8x128xf32>
    %306 = arith.mulf %301, %305 : vector<8x128xf32>
    %307 = vector.broadcast %286 : vector<1x128xf32> to vector<8x128xf32>
    %308 = arith.addf %306, %307 : vector<8x128xf32>
    %309 = arith.addf %218, %308 : vector<8x128xf32>
    %cst_143 = arith.constant 2.000000e+01 : f32
    %310 = vector.broadcast %cst_143 : f32 to vector<8x128xf32>
    %311 = arith.cmpf ogt, %309, %310 : vector<8x128xf32>
    %cst_144 = arith.constant 2.000000e+01 : f32
    %312 = vector.broadcast %cst_144 : f32 to vector<8x128xf32>
    %313 = arith.minimumf %309, %312 : vector<8x128xf32>
    %314 = math.exp %313 : vector<8x128xf32>
    %cst_145 = arith.constant 1.000000e+00 : f32
    %315 = vector.broadcast %cst_145 : f32 to vector<8x128xf32>
    %316 = arith.addf %315, %314 : vector<8x128xf32>
    %317 = math.log %316 : vector<8x128xf32>
    %318 = arith.select %311, %309, %317 : vector<8x128xi1>, vector<8x128xf32>
    %319 = vector.broadcast %4 : vector<1x128xf32> to vector<8x128xf32>
    %320 = arith.mulf %318, %319 : vector<8x128xf32>
    %c0_146 = arith.constant 0 : index
    %c0_147 = arith.constant 0 : index
    %321 = vector.load %arg5[%c0_146, %c0_147] : memref<8x8xf32, #tpu.memory_space<vmem>>, vector<8x8xf32>
    %cst_148 = arith.constant dense<0.000000e+00> : vector<8x128xf32>
    %322 = tpu.matmul %321, %320, %cst_148 {dimension_numbers = #tpu.dot_dimension_numbers<[1], [0], [0], [1], [0, 0, 1, 1], [], []>} : vector<8x8xf32>, vector<8x128xf32>, vector<8x128xf32> -> vector<8x128xf32>
    %cst_149 = arith.constant 2.000000e+01 : f32
    %323 = vector.broadcast %cst_149 : f32 to vector<8x128xf32>
    %324 = arith.cmpf ogt, %322, %323 : vector<8x128xf32>
    %cst_150 = arith.constant 2.000000e+01 : f32
    %325 = vector.broadcast %cst_150 : f32 to vector<8x128xf32>
    %326 = arith.minimumf %322, %325 : vector<8x128xf32>
    %327 = math.exp %326 : vector<8x128xf32>
    %cst_151 = arith.constant 1.000000e+00 : f32
    %328 = vector.broadcast %cst_151 : f32 to vector<8x128xf32>
    %329 = arith.addf %328, %327 : vector<8x128xf32>
    %330 = math.log %329 : vector<8x128xf32>
    %331 = arith.select %324, %322, %330 : vector<8x128xi1>, vector<8x128xf32>
    %c0_152 = arith.constant 0 : index
    %c0_153 = arith.constant 0 : index
    %332 = vector.load %arg15[%c0_152, %c0_153] : memref<128x128xf32, #tpu.memory_space<vmem>>, vector<128x128xf32>
    %cst_154 = arith.constant dense<0.000000e+00> : vector<8x128xf32>
    %333 = tpu.matmul %331, %332, %cst_154 {dimension_numbers = #tpu.dot_dimension_numbers<[1], [0], [0], [1], [0, 0, 1, 1], [], []>} : vector<8x128xf32>, vector<128x128xf32>, vector<8x128xf32> -> vector<8x128xf32>
    %c0_155 = arith.constant 0 : index
    %c0_156 = arith.constant 0 : index
    %334 = vector.load %arg16[%c0_155, %c0_156] : memref<1x128xf32, #tpu.memory_space<vmem>>, vector<1x128xf32>
    %335 = vector.broadcast %334 : vector<1x128xf32> to vector<8x128xf32>
    %336 = arith.addf %333, %335 : vector<8x128xf32>
    %cst_157 = arith.constant 2.000000e+01 : f32
    %337 = vector.broadcast %cst_157 : f32 to vector<8x128xf32>
    %338 = arith.cmpf ogt, %336, %337 : vector<8x128xf32>
    %cst_158 = arith.constant 2.000000e+01 : f32
    %339 = vector.broadcast %cst_158 : f32 to vector<8x128xf32>
    %340 = arith.minimumf %336, %339 : vector<8x128xf32>
    %341 = math.exp %340 : vector<8x128xf32>
    %cst_159 = arith.constant 1.000000e+00 : f32
    %342 = vector.broadcast %cst_159 : f32 to vector<8x128xf32>
    %343 = arith.addf %342, %341 : vector<8x128xf32>
    %344 = math.log %343 : vector<8x128xf32>
    %345 = arith.select %338, %336, %344 : vector<8x128xi1>, vector<8x128xf32>
    %c0_160 = arith.constant 0 : index
    %c0_161 = arith.constant 0 : index
    %346 = vector.load %arg17[%c0_160, %c0_161] : memref<128x128xf32, #tpu.memory_space<vmem>>, vector<128x128xf32>
    %cst_162 = arith.constant dense<0.000000e+00> : vector<8x128xf32>
    %347 = tpu.matmul %345, %346, %cst_162 {dimension_numbers = #tpu.dot_dimension_numbers<[1], [0], [0], [1], [0, 0, 1, 1], [], []>} : vector<8x128xf32>, vector<128x128xf32>, vector<8x128xf32> -> vector<8x128xf32>
    %c0_163 = arith.constant 0 : index
    %c0_164 = arith.constant 0 : index
    %348 = vector.load %arg18[%c0_163, %c0_164] : memref<1x128xf32, #tpu.memory_space<vmem>>, vector<1x128xf32>
    %349 = vector.broadcast %348 : vector<1x128xf32> to vector<8x128xf32>
    %350 = arith.addf %347, %349 : vector<8x128xf32>
    %c0_165 = arith.constant 0 : index
    %c0_166 = arith.constant 0 : index
    %351 = vector.load %arg19[%c0_165, %c0_166] : memref<8x128xf32, #tpu.memory_space<vmem>>, vector<8x128xf32>
    tpu.vector_store %arg19[%c0_165, %c0_166], %350 {strides = array<i32>} : memref<8x128xf32, #tpu.memory_space<vmem>>, vector<8x128xf32>,
    return
  }
}

</mosaic_0001>

<bundles_post_ra>
// kernel: tpu_custom_call.1
= control target key start
LH: loop header
LB: loop body
LE: loop exit
PB: predicated region body
PF: predicated region fallthrough
CT: control target
= control target key end

     0   :  { %s5011_s0 = inlined_call_operand.vmem [shape: f32[8,128], index: 0, kind: input, shape index: {}]   ;;  %s5012_s1 = inlined_call_operand.hbm [shape: f32[32,128], index: 1, kind: input, shape index: {}]   ;;  %s5013_s2 = inlined_call_operand.vmem [shape: f32[32,8], index: 2, kind: input, shape index: {}]   ;;  %s5014_s3 = inlined_call_operand.vmem [shape: f32[32,8], index: 3, kind: input, shape index: {}]   ;;  %s5015_s4 = inlined_call_operand.hbm [shape: f32[8,32], index: 4, kind: input, shape index: {}]   ;;  %s5016_s5 = inlined_call_operand.hbm [shape: f32[8,8], index: 5, kind: input, shape index: {}]   ;;  %s5017_s6 = inlined_call_operand.hbm [shape: f32[128,128], index: 6, kind: input, shape index: {}]   ;;  %s5018_s7 = inlined_call_operand.hbm [shape: f32[1,128], index: 7, kind: input, shape index: {}]   ;;  %s5019_s8 = inlined_call_operand.hbm [shape: f32[3,128,512], index: 8, kind: input, shape index: {}]   ;;  %s5020_s9 = inlined_call_operand.hbm [shape: f32[3,128,256], index: 9, kind: input, shape index: {}]   ;;  %s5021_s10 = inlined_call_operand.hbm [shape: f32[3,1,256], index: 10, kind: input, shape index: {}]   ;;  %s5022_s11 = inlined_call_operand.hbm [shape: f32[3,1,256], index: 11, kind: input, shape index: {}]   ;;  %s5023_s12 = inlined_call_operand.hbm [shape: f32[3,1,256], index: 12, kind: input, shape index: {}]   ;;  %s5024_s13 = inlined_call_operand.hbm [shape: f32[3,1,128], index: 13, kind: input, shape index: {}]   ;;  %s5025_s14 = inlined_call_operand.hbm [shape: f32[3,1,128], index: 14, kind: input, shape index: {}]   ;;  %s5026_s15 = inlined_call_operand.vmem [shape: f32[128,128], index: 15, kind: input, shape index: {}]   ;;  %s5027_s16 = inlined_call_operand.vmem [shape: f32[1,128], index: 16, kind: input, shape index: {}]   ;;  %s5028_s17 = inlined_call_operand.hbm [shape: f32[128,128], index: 17, kind: input, shape index: {}]   ;;  %s5029_s18 = inlined_call_operand.vmem [shape: f32[1,128], index: 18, kind: input, shape index: {}]   ;;  %s5030_s19 = inlined_call_operand.hbm [shape: f32[8,128], index: 19, kind: output, shape index: {}]  }
   0x1   :  { %5034 = sst [smem:[#allocation32_spill]] %s5011_s0 }
   0x2   :  { %5035 = sst [smem:[#allocation33_spill]] %s5012_s1 }
   0x3   :  { %5036 = sst [smem:[#allocation34_spill]] %s5013_s2 }
   0x4   :  { %5037 = sst [smem:[#allocation35_spill]] %s5014_s3 }
   0x5   :  { %24 = vsyncpa [#allocation3], 0 }
   0x6   :  { %25 = vsyncpa [#allocation6], 0 }
   0x7   :  { %26 = vsyncpa [#allocation9], 0 }
   0x8   :  { %27 = vsyncpa [#allocation12], 0 }
   0x9   :  { %28 = vsyncpa [#allocation15], 0 }
   0xa   :  { %29 = vsyncpa [#allocation18], 0 }
   0xb   :  { %30 = vsyncpa [#allocation21], 0 }
   0xc   :  { %31 = vsyncpa [#allocation4], 0  ;;  %s4321_s0 = smov [#allocation5]   ;;  %s3997_s1 = scalar_lea.hbm %s5015_s4, 128 }
   0xd   :  { %s56_s30 = sshll.u32 %s4321_s0, 4  ;;  %p3998_p0 = scmp.ne.s32.totalorder %s5015_s4, %s3997_s1  ;;  %s57_s30 = int_to_ptr.vmem [resolvable:$true] %s56_s30 }
   0xe   :  { %p4001_p1 = scmp.lt.u32.totalorder %s3997_s1, %s5015_s4 }
  0x10   :  { %p4003_p2 = pnand %p4001_p1, %p3998_p0 }
  0x12   :  { %4006 = shalt.err (!%p4003_p2)
}
  0x13   :  { %s4007_s25 = scalar_lea.vmem %s57_s30, 128  ;;  %p4012_p4 = scmp.lt.s32.totalorder %s57_s30, %s57_s30 }
  0x14   :  { %p4008_p3 = scmp.ne.s32.totalorder %s57_s30, %s4007_s25  ;;  %p4013_p5 = scmp.lt.s32.totalorder %s4007_s25, %s4007_s25 }
  0x16   :  { %p4014_p6 = por %p4013_p5, %p4012_p4 }
  0x18   :  { %p4015_p7 = pnand %p4014_p6, %p4008_p3 }
  0x1a   :  { %4018 = shalt.err (!%p4015_p7)
}
  0x1b   :  { %59 = dma.hbm_to_vmem [thread:$0]  %s5015_s4, 128, %s57_s30, [#allocation6]  }
  0x1c   :  { %s4322_s27 = smov [#allocation8]   ;;  %s4323_s29 = smov [#allocation11]  }
  0x1d   :  { %s75_s28 = sshll.u32 %s4322_s27, 4  ;;  %s97_s0 = sshll.u32 %s4323_s29, 4  ;;  %s76_s28 = int_to_ptr.vmem [resolvable:$true] %s75_s28  ;;  %s98_s0 = int_to_ptr.vmem [resolvable:$true] %s97_s0 }
  0x1e   :  { %s4019_s1 = scalar_lea.hbm %s5017_s6, 2048 }
  0x1f   :  { %p4020_p8 = scmp.ne.s32.totalorder %s5017_s6, %s4019_s1  ;;  %p4023_p9 = scmp.lt.u32.totalorder %s4019_s1, %s5017_s6 }
  0x21   :  { %p4025_p10 = pnand %p4023_p9, %p4020_p8 }
  0x23   :  { %4028 = shalt.err (!%p4025_p10)
}
  0x24   :  { %s4029_s4 = scalar_lea.vmem %s76_s28, 2048  ;;  %p4034_p12 = scmp.lt.s32.totalorder %s76_s28, %s76_s28 }
  0x25   :  { %p4030_p11 = scmp.ne.s32.totalorder %s76_s28, %s4029_s4  ;;  %p4035_p13 = scmp.lt.s32.totalorder %s4029_s4, %s4029_s4 }
  0x27   :  { %p4036_p0 = por %p4035_p13, %p4034_p12 }
  0x29   :  { %p4037_p1 = pnand %p4036_p0, %p4030_p11 }
  0x2b   :  { %4040 = shalt.err (!%p4037_p1)
}
  0x2c   :  { %s4324_s30 = smov 128   ;;  %s4325_s25 = smov 8  }
  0x2d   :  { %81 = dma.hbm_to_vmem [thread:$0]  %s5017_s6, 2048, %s76_s28, [#allocation9], %s4324_s30, %s4324_s30, %s4325_s25  }
  0x2e   :  { %s4041_s20 = scalar_lea.hbm %s5019_s8, 24576 }
  0x2f   :  { %p4042_p2 = scmp.ne.s32.totalorder %s5019_s8, %s4041_s20  ;;  %p4045_p3 = scmp.lt.u32.totalorder %s4041_s20, %s5019_s8 }
  0x31   :  { %p4047_p4 = pnand %p4045_p3, %p4042_p2 }
  0x33   :  { %4050 = shalt.err (!%p4047_p4)
}
  0x34   :  { %s4051_s23 = scalar_lea.vmem %s98_s0, 24576  ;;  %p4056_p6 = scmp.lt.s32.totalorder %s98_s0, %s98_s0 }
  0x35   :  { %p4052_p5 = scmp.ne.s32.totalorder %s98_s0, %s4051_s23  ;;  %p4057_p7 = scmp.lt.s32.totalorder %s4051_s23, %s4051_s23 }
  0x37   :  { %p4058_p8 = por %p4057_p7, %p4056_p6 }
  0x39   :  { %p4059_p9 = pnand %p4058_p8, %p4052_p5 }
  0x3b   :  { %4062 = shalt.err (!%p4059_p9)
}
  0x3c   :  { %s4326_s6 = smov 512   ;;  %s4327_s28 = smov 32  }
  0x3d   :  { %103 = dma.hbm_to_vmem [thread:$0]  %s5019_s8, 24576, %s98_s0, [#allocation12], %s4326_s6, %s4326_s6, %s4327_s28  }
  0x3e   :  { %s4328_s3 = smov [#allocation14]   ;;  %s4063_s20 = scalar_lea.hbm %s5021_s10, 96 }
  0x3f   :  { %s121_s26 = sshll.u32 %s4328_s3, 4  ;;  %p4064_p10 = scmp.ne.s32.totalorder %s5021_s10, %s4063_s20  ;;  %s122_s26 = int_to_ptr.vmem [resolvable:$true] %s121_s26 }
  0x40   :  { %p4067_p11 = scmp.lt.u32.totalorder %s4063_s20, %s5021_s10 }
  0x42   :  { %p4069_p12 = pnand %p4067_p11, %p4064_p10 }
  0x44   :  { %4072 = shalt.err (!%p4069_p12)
}
  0x45   :  { %s4073_s23 = scalar_lea.vmem %s122_s26, 96  ;;  %p4078_p0 = scmp.lt.s32.totalorder %s122_s26, %s122_s26 }
  0x46   :  { %p4074_p13 = scmp.ne.s32.totalorder %s122_s26, %s4073_s23  ;;  %p4079_p1 = scmp.lt.s32.totalorder %s4073_s23, %s4073_s23 }
  0x48   :  { %p4080_p2 = por %p4079_p1, %p4078_p0 }
  0x4a   :  { %p4081_p3 = pnand %p4080_p2, %p4074_p13 }
  0x4c   :  { %4084 = shalt.err (!%p4081_p3)
}
  0x4d   :  { %s4329_s8 = smov 2   ;;  %s4330_s24 = smov [#allocation17]  }
  0x4e   :  { %127 = dma.hbm_to_vmem [thread:$0]  %s5021_s10, 96, %s122_s26, [#allocation15], %s4327_s28, %s4327_s28, %s4329_s8  }
  0x4f   :  { %s145_s4 = sshll.u32 %s4330_s24, 4  ;;  %s4085_s29 = scalar_lea.hbm %s5023_s12, 96  ;;  %s146_s4 = int_to_ptr.vmem [resolvable:$true] %s145_s4 }
  0x50   :  { %p4086_p4 = scmp.ne.s32.totalorder %s5023_s12, %s4085_s29  ;;  %p4089_p5 = scmp.lt.u32.totalorder %s4085_s29, %s5023_s12 }
  0x52   :  { %p4091_p6 = pnand %p4089_p5, %p4086_p4 }
  0x54   :  { %4094 = shalt.err (!%p4091_p6)
}
  0x55   :  { %s4095_s2 = scalar_lea.vmem %s146_s4, 96  ;;  %p4100_p8 = scmp.lt.s32.totalorder %s146_s4, %s146_s4 }
  0x56   :  { %p4096_p7 = scmp.ne.s32.totalorder %s146_s4, %s4095_s2  ;;  %p4101_p9 = scmp.lt.s32.totalorder %s4095_s2, %s4095_s2 }
  0x58   :  { %p4102_p10 = por %p4101_p9, %p4100_p8 }
  0x5a   :  { %p4103_p11 = pnand %p4102_p10, %p4096_p7 }
  0x5c   :  { %4106 = shalt.err (!%p4103_p11)
}
  0x5d   :  { %151 = dma.hbm_to_vmem [thread:$0]  %s5023_s12, 96, %s146_s4, [#allocation18], %s4327_s28, %s4327_s28, %s4329_s8  }
  0x5e   :  { %s4331_s23 = smov [#allocation20]   ;;  %s4332_s6 = smov [#allocation2]  }
  0x5f   :  { %s169_s0 = sshll.u32 %s4331_s23, 4  ;;  %s39_s24 = sshll.u32 %s4332_s6, 4  ;;  %s170_s0 = int_to_ptr.vmem [resolvable:$true] %s169_s0  ;;  %s4516_s24 = int_to_ptr.vmem [resolvable:$true] %s39_s24 }
  0x60   :  { %s4107_s29 = scalar_lea.hbm %s5025_s14, 48 }
  0x61   :  { %p4108_p12 = scmp.ne.s32.totalorder %s5025_s14, %s4107_s29  ;;  %p4111_p13 = scmp.lt.u32.totalorder %s4107_s29, %s5025_s14 }
  0x63   :  { %p4113_p0 = pnand %p4111_p13, %p4108_p12 }
  0x65   :  { %4116 = shalt.err (!%p4113_p0)
}
  0x66   :  { %s4117_s12 = scalar_lea.vmem %s170_s0, 48  ;;  %s4121_s4 = scalar_lea.vmem %s170_s0, 64 }
  0x67   :  { %p4118_p1 = scmp.ne.s32.totalorder %s170_s0, %s4117_s12  ;;  %p4122_p2 = scmp.lt.s32.totalorder %s170_s0, %s170_s0 }
  0x68   :  { %p4123_p3 = scmp.lt.s32.totalorder %s4121_s4, %s4117_s12 }
  0x6a   :  { %p4124_p4 = por %p4123_p3, %p4122_p2 }
  0x6c   :  { %p4125_p5 = pnand %p4124_p4, %p4118_p1 }
  0x6e   :  { %4128 = shalt.err (!%p4125_p5)
}
  0x6f   :  { %s4333_s2 = smov 16   ;;  %s4334_s10 = smov 1  }
  0x70   :  { %175 = dma.hbm_to_vmem [thread:$0]  %s5025_s14, 48, %s170_s0, [#allocation21], %s4333_s2, %s4333_s2, %s4334_s10  }
  0x71   :  { %s5038_s27 = sld [smem:[#allocation33_spill]] }
  0x77   :  { %s4129_s29 = scalar_lea.hbm %s5038_s27, 512 }
  0x78   :  { %p4130_p6 = scmp.ne.s32.totalorder %s5038_s27, %s4129_s29  ;;  %p4133_p7 = scmp.lt.u32.totalorder %s4129_s29, %s5038_s27 }
  0x7a   :  { %p4135_p8 = pnand %p4133_p7, %p4130_p6 }
  0x7c   :  { %4138 = shalt.err (!%p4135_p8)
}
  0x7d   :  { %s4139_s12 = scalar_lea.vmem %s4516_s24, 512  ;;  %p4144_p10 = scmp.lt.s32.totalorder %s4516_s24, %s4516_s24 }
  0x7e   :  { %p4140_p9 = scmp.ne.s32.totalorder %s4516_s24, %s4139_s12  ;;  %p4145_p11 = scmp.lt.s32.totalorder %s4139_s12, %s4139_s12 }
  0x80   :  { %p4146_p12 = por %p4145_p11, %p4144_p10 }
  0x82   :  { %p4147_p13 = pnand %p4146_p12, %p4140_p9 }
  0x84   :  { %4150 = shalt.err (!%p4147_p13)
}
  0x85   :  { %45 = dma.hbm_to_vmem [thread:$0]  %s5038_s27, 512, %s4516_s24, [#allocation3], %s4324_s30, %s4324_s30, %s4325_s25  }
  0x86   :  { %s4335_s4 = smov [#allocation7]   ;;  %s4336_s23 = smov [#allocation10]  }
  0x87   :  { %s66_s26 = sshll.u32 %s4335_s4, 4  ;;  %s88_s6 = sshll.u32 %s4336_s23, 4  ;;  %s67_s26 = int_to_ptr.vmem [resolvable:$true] %s66_s26  ;;  %s89_s6 = int_to_ptr.vmem [resolvable:$true] %s88_s6 }
  0x88   :  { %s4151_s20 = scalar_lea.hbm %s5016_s5, 128 }
  0x89   :  { %p4152_p0 = scmp.ne.s32.totalorder %s5016_s5, %s4151_s20  ;;  %p4155_p1 = scmp.lt.u32.totalorder %s4151_s20, %s5016_s5 }
  0x8b   :  { %p4157_p2 = pnand %p4155_p1, %p4152_p0 }
  0x8d   :  { %4160 = shalt.err (!%p4157_p2)
}
  0x8e   :  { %s4161_s24 = scalar_lea.vmem %s67_s26, 128  ;;  %p4166_p4 = scmp.lt.s32.totalorder %s67_s26, %s67_s26 }
  0x8f   :  { %p4162_p3 = scmp.ne.s32.totalorder %s67_s26, %s4161_s24  ;;  %p4167_p5 = scmp.lt.s32.totalorder %s4161_s24, %s4161_s24 }
  0x91   :  { %p4168_p6 = por %p4167_p5, %p4166_p4 }
  0x93   :  { %p4169_p7 = pnand %p4168_p6, %p4162_p3 }
  0x95   :  { %4172 = shalt.err (!%p4169_p7)
}
  0x96   :  { %69 = dma.hbm_to_vmem [thread:$0]  %s5016_s5, 128, %s67_s26, [#allocation6]  }
  0x97   :  { %s4173_s23 = scalar_lea.hbm %s5018_s7, 16 }
  0x98   :  { %p4174_p8 = scmp.ne.s32.totalorder %s5018_s7, %s4173_s23  ;;  %p4177_p9 = scmp.lt.u32.totalorder %s4173_s23, %s5018_s7 }
  0x9a   :  { %p4179_p10 = pnand %p4177_p9, %p4174_p8 }
  0x9c   :  { %4182 = shalt.err (!%p4179_p10)
}
  0x9d   :  { %s4183_s1 = scalar_lea.vmem %s89_s6, 16  ;;  %s4187_s22 = scalar_lea.vmem %s89_s6, 32 }
  0x9e   :  { %p4184_p11 = scmp.ne.s32.totalorder %s89_s6, %s4183_s1  ;;  %p4188_p12 = scmp.lt.s32.totalorder %s89_s6, %s89_s6 }
  0x9f   :  { %p4189_p13 = scmp.lt.s32.totalorder %s4187_s22, %s4183_s1 }
  0xa1   :  { %p4190_p0 = por %p4189_p13, %p4188_p12 }
  0xa3   :  { %p4191_p1 = pnand %p4190_p0, %p4184_p11 }
  0xa5   :  { %4194 = shalt.err (!%p4191_p1)
}
  0xa6   :  { %91 = dma.hbm_to_vmem [thread:$0]  %s5018_s7, 16, %s89_s6, [#allocation9]  }
  0xa7   :  { %s4337_s12 = smov [#allocation13]   ;;  %s4338_s27 = smov [#allocation16]  }
  0xa8   :  { %s109_s24 = sshll.u32 %s4337_s12, 4  ;;  %s133_s14 = sshll.u32 %s4338_s27, 4  ;;  %s110_s24 = int_to_ptr.vmem [resolvable:$true] %s109_s24  ;;  %s134_s14 = int_to_ptr.vmem [resolvable:$true] %s133_s14 }
  0xa9   :  { %s4195_s23 = scalar_lea.hbm %s5020_s9, 12288 }
  0xaa   :  { %p4196_p2 = scmp.ne.s32.totalorder %s5020_s9, %s4195_s23  ;;  %p4199_p3 = scmp.lt.u32.totalorder %s4195_s23, %s5020_s9 }
  0xac   :  { %p4201_p4 = pnand %p4199_p3, %p4196_p2 }
  0xae   :  { %4204 = shalt.err (!%p4201_p4)
}
  0xaf   :  { %s4205_s7 = scalar_lea.vmem %s110_s24, 12288  ;;  %p4210_p6 = scmp.lt.s32.totalorder %s110_s24, %s110_s24 }
  0xb0   :  { %p4206_p5 = scmp.ne.s32.totalorder %s110_s24, %s4205_s7  ;;  %p4211_p7 = scmp.lt.s32.totalorder %s4205_s7, %s4205_s7 }
  0xb2   :  { %p4212_p8 = por %p4211_p7, %p4210_p6 }
  0xb4   :  { %p4213_p9 = pnand %p4212_p8, %p4206_p5 }
  0xb6   :  { %4216 = shalt.err (!%p4213_p9)
}
  0xb7   :  { %s4339_s6 = smov 256   ;;  %s4217_s12 = scalar_lea.hbm %s5022_s11, 96 }
  0xb8   :  { %115 = dma.hbm_to_vmem [thread:$0]  %s5020_s9, 12288, %s110_s24, [#allocation12], %s4339_s6, %s4339_s6, %s4333_s2  }
  0xb9   :  { %p4218_p10 = scmp.ne.s32.totalorder %s5022_s11, %s4217_s12  ;;  %p4221_p11 = scmp.lt.u32.totalorder %s4217_s12, %s5022_s11 }
  0xbb   :  { %p4223_p12 = pnand %p4221_p11, %p4218_p10 }
  0xbd   :  { %4226 = shalt.err (!%p4223_p12)
}
  0xbe   :  { %s4227_s3 = scalar_lea.vmem %s134_s14, 96  ;;  %p4232_p0 = scmp.lt.s32.totalorder %s134_s14, %s134_s14 }
  0xbf   :  { %p4228_p13 = scmp.ne.s32.totalorder %s134_s14, %s4227_s3  ;;  %p4233_p1 = scmp.lt.s32.totalorder %s4227_s3, %s4227_s3 }
  0xc1   :  { %p4234_p2 = por %p4233_p1, %p4232_p0 }
  0xc3   :  { %p4235_p3 = pnand %p4234_p2, %p4228_p13 }
  0xc5   :  { %4238 = shalt.err (!%p4235_p3)
}
  0xc6   :  { %139 = dma.hbm_to_vmem [thread:$0]  %s5022_s11, 96, %s134_s14, [#allocation15], %s4327_s28, %s4327_s28, %s4329_s8  }
  0xc7   :  { %s4340_s29 = smov [#allocation19]   ;;  %s4341_s21 = smov [#allocation22]  }
  0xc8   :  { %s157_s20 = sshll.u32 %s4340_s29, 4  ;;  %s185_s7 = sshll.u32 %s4341_s21, 4  ;;  %s158_s20 = int_to_ptr.vmem [resolvable:$true] %s157_s20  ;;  %s186_s7 = int_to_ptr.vmem [resolvable:$true] %s185_s7 }
  0xc9   :  { %s4239_s22 = scalar_lea.hbm %s5024_s13, 48 }
  0xca   :  { %p4240_p4 = scmp.ne.s32.totalorder %s5024_s13, %s4239_s22  ;;  %p4243_p5 = scmp.lt.u32.totalorder %s4239_s22, %s5024_s13 }
  0xcc   :  { %p4245_p6 = pnand %p4243_p5, %p4240_p4 }
  0xce   :  { %4248 = shalt.err (!%p4245_p6)
}
  0xcf   :  { %s4249_s11 = scalar_lea.vmem %s158_s20, 48  ;;  %s4253_s28 = scalar_lea.vmem %s158_s20, 64 }
  0xd0   :  { %p4250_p7 = scmp.ne.s32.totalorder %s158_s20, %s4249_s11  ;;  %p4254_p8 = scmp.lt.s32.totalorder %s158_s20, %s158_s20 }
  0xd1   :  { %p4255_p9 = scmp.lt.s32.totalorder %s4253_s28, %s4249_s11 }
  0xd3   :  { %p4256_p10 = por %p4255_p9, %p4254_p8 }
  0xd5   :  { %p4257_p11 = pnand %p4256_p10, %p4250_p7 }
  0xd7   :  { %4260 = shalt.err (!%p4257_p11)
}
  0xd8   :  { %163 = dma.hbm_to_vmem [thread:$0]  %s5024_s13, 48, %s158_s20, [#allocation18], %s4333_s2, %s4333_s2, %s4334_s10  }
  0xd9   :  { %s4261_s23 = scalar_lea.hbm %s5028_s17, 2048 }
  0xda   :  { %p4262_p12 = scmp.ne.s32.totalorder %s5028_s17, %s4261_s23  ;;  %p4265_p13 = scmp.lt.u32.totalorder %s4261_s23, %s5028_s17 }
  0xdc   :  { %p4267_p0 = pnand %p4265_p13, %p4262_p12 }
  0xde   :  { %4270 = shalt.err (!%p4267_p0)
}
  0xdf   :  { %s4271_s21 = scalar_lea.vmem %s186_s7, 2048  ;;  %p4276_p2 = scmp.lt.s32.totalorder %s186_s7, %s186_s7 }
  0xe0   :  { %p4272_p1 = scmp.ne.s32.totalorder %s186_s7, %s4271_s21  ;;  %p4277_p3 = scmp.lt.s32.totalorder %s4271_s21, %s4271_s21 }
  0xe2   :  { %p4278_p4 = por %p4277_p3, %p4276_p2 }
  0xe4   :  { %p4279_p5 = pnand %p4278_p4, %p4272_p1 }
  0xe6   :  { %4282 = shalt.err (!%p4279_p5)
}
  0xe7   :  { %191 = dma.hbm_to_vmem [thread:$0]  %s5028_s17, 2048, %s186_s7, [#allocation21], %s4324_s30, %s4324_s30, %s4325_s25  }
  0xe8   :  { %4305 = dma.done.wait [#allocation3], 512  }
  0xe9   :  { %4306 = vsyncadd [#allocation3], 4294966784 }
  0xea   :  { %4307 = dma.done.wait [#allocation6], 256  }
  0xeb   :  { %4308 = vsyncadd [#allocation6], 4294967040 }
  0xec   :  { %4309 = dma.done.wait [#allocation9], 2064  }
  0xed   :  { %4310 = vsyncadd [#allocation9], 4294965232 }
  0xee   :  { %4311 = dma.done.wait [#allocation12], 36864  }
  0xef   :  { %4312 = vsyncadd [#allocation12], 4294930432 }
  0xf0   :  { %4313 = dma.done.wait [#allocation15], 192  }
  0xf1   :  { %4314 = vsyncadd [#allocation15], 4294967104 }
  0xf2   :  { %4315 = dma.done.wait [#allocation18], 144  }
  0xf3   :  { %4316 = vsyncadd [#allocation18], 4294967152 }
  0xf4   :  { %4317 = dma.done.wait [#allocation21], 2096  }
  0xf5   :  { %4318 = vsyncadd [#allocation21], 4294965200  ;;  %v4342_v0 = vmov 0.0|0.0   ;;  %vm4343_vm0 = vmmov 0   ;;  %v4344_v1 = vmov 0.0   ;;  %v252_v2 = vld [vmem:[#allocation8] sm:$0xff] }
  0xf6   :  { %3373 = vmatprep.subr.bf16.mxu0 %v4342_v0  ;;  %3262 = vmatprep.mubr.msk.f32.mxu0 %vm4343_vm0, %v4344_v1  ;;  %v253_v3 = vld [vmem:[#allocation8 + $0x8] sm:$0xff]  ;;  %v254_v4 = vld [vmem:[#allocation8 + $0x10] sm:$0xff]  ;;  %v255_v6 = vld [vmem:[#allocation8 + $0x18] sm:$0xff]  ;;  %s5039_s25 = sld [smem:[#allocation32_spill]]  ;;  %s5040_s7 = sld [smem:[#allocation35_spill]]  ;;  %vm684_vm1 = vcmask 64512  }
  0xf7   :  { %473 = vmatprep.mubr.f32.mxu1 %v4344_v1  ;;  %v3374_v5 = vpack.c.bf16 %v253_v3, %v252_v2  ;;  %v3377_v7 = vpack.c.bf16 %v255_v6, %v254_v4  ;;  %v256_v8 = vld [vmem:[#allocation8 + $0x20] sm:$0xff]  ;;  %v257_v9 = vld [vmem:[#allocation8 + $0x28] sm:$0xff]  ;;  %v258_v13 = vld [vmem:[#allocation8 + $0x30] sm:$0xff]  ;;  %s5041_s27 = sld [smem:[#allocation34_spill]]  ;;  %vm1068_vm7 = vcmask 261120   ;;  %s4345_s4 = smov [#allocation23]  }
  0xf8   :  { %v346_v10 = vld [vmem:[#allocation11 + $0x8] sm:$0xff]  ;;  %v3380_v12 = vpack.c.bf16 %v257_v9, %v256_v8  ;;  %v345_v15 = vld [vmem:[#allocation11] sm:$0xff]  ;;  %v259_v17 = vld [vmem:[#allocation8 + $0x38] sm:$0xff] }
  0xf9   :  { %3375 = vmatpush3.bf16.msra.mxu0 %v3374_v5  ;;  %v350_v11 = vld [vmem:[#allocation11 + $0x28] sm:$0xff]  ;;  %v349_v16 = vld [vmem:[#allocation11 + $0x20] sm:$0xff]  ;;  %v3383_v24 = vpack.c.bf16 %v259_v17, %v258_v13  ;;  %v263_v41 = vld [vmem:[#allocation8 + $0x58] sm:$0xff] }
  0xfa   :  { %3376 = vmatprep.subr.bf16.mxu0 %v4342_v0  ;;  %v3397_v14 = vpack.c.bf16 %v350_v11, %v346_v10  ;;  %v3399_v18 = vpack.c.bf16 %v349_v16, %v345_v15  ;;  %v354_v19 = vld [vmem:[#allocation11 + $0x48] sm:$0xff]  ;;  %v353_v22 = vld [vmem:[#allocation11 + $0x40] sm:$0xff]  ;;  %v267_v59 = vld [vmem:[#allocation8 + $0x78] sm:$0xff] }
  0xfb   :  { %v358_v20 = vld [vmem:[#allocation11 + $0x68] sm:$0xff]  ;;  %v357_v23 = vld [vmem:[#allocation11 + $0x60] sm:$0xff]  ;;  %v348_v62 = vld [vmem:[#allocation11 + $0x18] sm:$0xff] }
  0xfc   :  { %3398 = vmatprep.subr.bf16.mxu1 %v3397_v14  ;;  %v3401_v21 = vpack.c.bf16 %v358_v20, %v354_v19  ;;  %v260_v25 = vld [vmem:[#allocation8 + $0x40] sm:$0xff]  ;;  %v3403_v26 = vpack.c.bf16 %v357_v23, %v353_v22  ;;  %v362_v27 = vld [vmem:[#allocation11 + $0x88] sm:$0xff]  ;;  %v347_v4 = vld [vmem:[#allocation11 + $0x10] sm:$0xff] }
  0xfd   :  { %3378 = vmatpush3.bf16.msra.mxu0 %v3377_v7  ;;  %3400 = vmatpush1.bf16.msra.mxu1 %v3399_v18  ;;  %v366_v28 = vld [vmem:[#allocation11 + $0xa8] sm:$0xff]  ;;  %v361_v31 = vld [vmem:[#allocation11 + $0x80] sm:$0xff]  ;;  %v352_v63 = vld [vmem:[#allocation11 + $0x38] sm:$0xff] }
  0xfe   :  { %3379 = vmatprep.subr.bf16.mxu0 %v4342_v0  ;;  %3402 = vmatprep.subr.bf16.mxu1 %v3401_v21  ;;  %v261_v29 = vld [vmem:[#allocation8 + $0x48] sm:$0xff]  ;;  %v3405_v30 = vpack.c.bf16 %v366_v28, %v362_v27  ;;  %v262_v37 = vld [vmem:[#allocation8 + $0x50] sm:$0xff]  ;;  %v264_v46 = vld [vmem:[#allocation8 + $0x60] sm:$0xff]  ;;  %v3429_v8 = vpack.c.bf16 %v352_v63, %v348_v62 }
  0xff   :  { %v365_v32 = vld [vmem:[#allocation11 + $0xa0] sm:$0xff]  ;;  %v370_v33 = vld [vmem:[#allocation11 + $0xc8] sm:$0xff]  ;;  %v3386_v36 = vpack.c.bf16 %v261_v29, %v260_v25  ;;  %v3389_v45 = vpack.c.bf16 %v263_v41, %v262_v37  ;;  %v351_v9 = vld [vmem:[#allocation11 + $0x30] sm:$0xff] }
 0x100   :  { %v3407_v34 = vpack.c.bf16 %v365_v32, %v361_v31  ;;  %v374_v35 = vld [vmem:[#allocation11 + $0xe8] sm:$0xff]  ;;  %v369_v39 = vld [vmem:[#allocation11 + $0xc0] sm:$0xff]  ;;  %v360_v13 = vld [vmem:[#allocation11 + $0x78] sm:$0xff]  ;;  %v3431_v16 = vpack.c.bf16 %v351_v9, %v347_v4 }
 0x101   :  { %3381 = vmatpush3.bf16.msra.mxu0 %v3380_v12  ;;  %3404 = vmatpush1.bf16.msra.mxu1 %v3403_v26  ;;  %v3409_v38 = vpack.c.bf16 %v374_v35, %v370_v33  ;;  %v373_v40 = vld [vmem:[#allocation11 + $0xe0] sm:$0xff]  ;;  %v378_v42 = vld [vmem:[#allocation11 + $0x108] sm:$0xff]  ;;  %v356_v12 = vld [vmem:[#allocation11 + $0x58] sm:$0xff] }
 0x102   :  { %3382 = vmatprep.subr.bf16.mxu0 %v4342_v0  ;;  %3406 = vmatprep.subr.bf16.mxu1 %v3405_v30  ;;  %v382_v43 = vld [vmem:[#allocation11 + $0x128] sm:$0xff]  ;;  %v3411_v44 = vpack.c.bf16 %v373_v40, %v369_v39  ;;  %v377_v48 = vld [vmem:[#allocation11 + $0x100] sm:$0xff]  ;;  %v3433_v18 = vpack.c.bf16 %v360_v13, %v356_v12  ;;  %v355_v19 = vld [vmem:[#allocation11 + $0x50] sm:$0xff] }
 0x103   :  { %v3413_v47 = vpack.c.bf16 %v382_v43, %v378_v42  ;;  %v381_v49 = vld [vmem:[#allocation11 + $0x120] sm:$0xff]  ;;  %v386_v51 = vld [vmem:[#allocation11 + $0x148] sm:$0xff]  ;;  %v359_v20 = vld [vmem:[#allocation11 + $0x70] sm:$0xff] }
 0x104   :  { %v265_v50 = vld [vmem:[#allocation8 + $0x68] sm:$0xff]  ;;  %v3415_v53 = vpack.c.bf16 %v381_v49, %v377_v48  ;;  %v266_v55 = vld [vmem:[#allocation8 + $0x70] sm:$0xff]  ;;  %v364_v21 = vld [vmem:[#allocation11 + $0x98] sm:$0xff]  ;;  %v3435_v23 = vpack.c.bf16 %v359_v20, %v355_v19 }
 0x105   :  { %3384 = vmatpush3.bf16.msra.mxu0 %v3383_v24  ;;  %3408 = vmatpush1.bf16.msra.mxu1 %v3407_v34  ;;  %v390_v52 = vld [vmem:[#allocation11 + $0x168] sm:$0xff]  ;;  %v3392_v54 = vpack.c.bf16 %v265_v50, %v264_v46  ;;  %v385_v57 = vld [vmem:[#allocation11 + $0x140] sm:$0xff]  ;;  %v3395_v3 = vpack.c.bf16 %v267_v59, %v266_v55  ;;  %v368_v22 = vld [vmem:[#allocation11 + $0xb8] sm:$0xff] }
 0x106   :  { %3385 = vmatprep.subr.bf16.mxu0 %v4342_v0  ;;  %3410 = vmatprep.subr.bf16.mxu1 %v3409_v38  ;;  %v3417_v56 = vpack.c.bf16 %v390_v52, %v386_v51  ;;  %v389_v58 = vld [vmem:[#allocation11 + $0x160] sm:$0xff]  ;;  %v394_v60 = vld [vmem:[#allocation11 + $0x188] sm:$0xff]  ;;  %v3437_v24 = vpack.c.bf16 %v368_v22, %v364_v21  ;;  %v363_v25 = vld [vmem:[#allocation11 + $0x90] sm:$0xff] }
 0x107   :  { %v398_v61 = vld [vmem:[#allocation11 + $0x1a8] sm:$0xff]  ;;  %v3419_v2 = vpack.c.bf16 %v389_v58, %v385_v57  ;;  %v393_v6 = vld [vmem:[#allocation11 + $0x180] sm:$0xff]  ;;  %v367_v26 = vld [vmem:[#allocation11 + $0xb0] sm:$0xff] }
 0x108   :  { %v3421_v5 = vpack.c.bf16 %v398_v61, %v394_v60  ;;  %v397_v7 = vld [vmem:[#allocation11 + $0x1a0] sm:$0xff]  ;;  %v402_v10 = vld [vmem:[#allocation11 + $0x1c8] sm:$0xff]  ;;  %v372_v27 = vld [vmem:[#allocation11 + $0xd8] sm:$0xff]  ;;  %v3439_v29 = vpack.c.bf16 %v367_v26, %v363_v25 }
 0x109   :  { %3387 = vmatpush3.bf16.msra.mxu0 %v3386_v36  ;;  %3412 = vmatpush1.bf16.msra.mxu1 %v3411_v44  ;;  %v406_v11 = vld [vmem:[#allocation11 + $0x1e8] sm:$0xff]  ;;  %v3423_v14 = vpack.c.bf16 %v397_v7, %v393_v6  ;;  %v376_v28 = vld [vmem:[#allocation11 + $0xf8] sm:$0xff]  ;;  %v371_v31 = vld [vmem:[#allocation11 + $0xd0] sm:$0xff] }
 0x10a   :  { %3388 = vmatprep.subr.bf16.mxu0 %v4342_v0  ;;  %3414 = vmatprep.subr.bf16.mxu1 %v3413_v47  ;;  %v251_v15 = vld [vmem:[%s5039_s25] sm:$0xff]  ;;  %v3425_v17 = vpack.c.bf16 %v406_v11, %v402_v10  ;;  %v3441_v30 = vpack.c.bf16 %v376_v28, %v372_v27  ;;  %v380_v33 = vld [vmem:[#allocation11 + $0x118] sm:$0xff]  ;;  %v401_v55 = vld [vmem:[#allocation11 + $0x1c0] sm:$0xff] }
 0x10b   :  { %v375_v32 = vld [vmem:[#allocation11 + $0xf0] sm:$0xff]  ;;  %v384_v34 = vld [vmem:[#allocation11 + $0x138] sm:$0xff]  ;;  %v552_v61 = vld [vmem:[#allocation13 + $0x8] sm:$0xff] }
 0x10c   :  { %v3443_v35 = vpack.c.bf16 %v375_v32, %v371_v31  ;;  %v3445_v36 = vpack.c.bf16 %v384_v34, %v380_v33  ;;  %v379_v37 = vld [vmem:[#allocation11 + $0x110] sm:$0xff]  ;;  %v388_v39 = vld [vmem:[#allocation11 + $0x158] sm:$0xff]  ;;  %v555_v12 = vld [vmem:[#allocation13 + $0x20] sm:$0xff] }
 0x10d   :  { %3390 = vmatpush3.bf16.msra.mxu0 %v3389_v45  ;;  %3416 = vmatpush1.bf16.msra.mxu1 %v3415_v53  ;;  %v383_v38 = vld [vmem:[#allocation11 + $0x130] sm:$0xff]  ;;  %v392_v40 = vld [vmem:[#allocation11 + $0x178] sm:$0xff]  ;;  %v564_v20 = vld [vmem:[#allocation13 + $0x68] sm:$0xff] }
 0x10e   :  { %3391 = vmatprep.subr.bf16.mxu0 %v4342_v0  ;;  %3418 = vmatprep.subr.bf16.mxu1 %v3417_v56  ;;  %v3447_v41 = vpack.c.bf16 %v383_v38, %v379_v37  ;;  %v3449_v42 = vpack.c.bf16 %v392_v40, %v388_v39  ;;  %v387_v43 = vld [vmem:[#allocation11 + $0x150] sm:$0xff]  ;;  %v396_v45 = vld [vmem:[#allocation11 + $0x198] sm:$0xff]  ;;  %v405_v56 = vld [vmem:[#allocation11 + $0x1e0] sm:$0xff] }
 0x10f   :  { %v391_v44 = vld [vmem:[#allocation11 + $0x170] sm:$0xff]  ;;  %v400_v46 = vld [vmem:[#allocation11 + $0x1b8] sm:$0xff]  ;;  %v3427_v58 = vpack.c.bf16 %v405_v56, %v401_v55  ;;  %v568_v26 = vld [vmem:[#allocation13 + $0x88] sm:$0xff] }
 0x110   :  { %v3451_v47 = vpack.c.bf16 %v391_v44, %v387_v43  ;;  %v3453_v48 = vpack.c.bf16 %v400_v46, %v396_v45  ;;  %v395_v49 = vld [vmem:[#allocation11 + $0x190] sm:$0xff]  ;;  %v404_v51 = vld [vmem:[#allocation11 + $0x1d8] sm:$0xff]  ;;  %v572_v32 = vld [vmem:[#allocation13 + $0xa8] sm:$0xff] }
 0x111   :  { %3393 = vmatpush3.bf16.msra.mxu0 %v3392_v54  ;;  %3420 = vmatpush1.bf16.msra.mxu1 %v3419_v2  ;;  %v399_v50 = vld [vmem:[#allocation11 + $0x1b0] sm:$0xff]  ;;  %v408_v52 = vld [vmem:[#allocation11 + $0x1f8] sm:$0xff]  ;;  %v551_v2 = vld [vmem:[#allocation13] sm:$0xff] }
 0x112   :  { %3394 = vmatprep.subr.bf16.mxu0 %v4342_v0  ;;  %3422 = vmatprep.subr.bf16.mxu1 %v3421_v5  ;;  %v3455_v53 = vpack.c.bf16 %v399_v50, %v395_v49  ;;  %v3457_v54 = vpack.c.bf16 %v408_v52, %v404_v51  ;;  %v403_v57 = vld [vmem:[#allocation11 + $0x1d0] sm:$0xff]  ;;  %v554_v62 = vld [vmem:[#allocation13 + $0x18] sm:$0xff]  ;;  %v556_v5 = vld [vmem:[#allocation13 + $0x28] sm:$0xff] }
 0x113   :  { %v407_v59 = vld [vmem:[#allocation11 + $0x1f0] sm:$0xff]  ;;  %v3461_v63 = vpack.c.bf16 %v554_v62, %v552_v61  ;;  %v3125_v4 = vld [vmem:[#allocation10] ss:$0 sm:$0xff]  ;;  %v576_v38 = vld [vmem:[#allocation13 + $0xc8] sm:$0xff] }
 0x114   :  { %v3459_v60 = vpack.c.bf16 %v407_v59, %v403_v57  ;;  %v558_v6 = vld [vmem:[#allocation13 + $0x38] sm:$0xff]  ;;  %v557_v13 = vld [vmem:[#allocation13 + $0x30] sm:$0xff]  ;;  %v580_v44 = vld [vmem:[#allocation13 + $0xe8] sm:$0xff] }
 0x115   :  { %3396 = vmatpush3.bf16.msra.mxu0 %v3395_v3  ;;  %3424 = vmatpush1.bf16.msra.mxu1 %v3423_v14  ;;  %v553_v3 = vld [vmem:[#allocation13 + $0x10] sm:$0xff]  ;;  %v3465_v11 = vpack.c.bf16 %v558_v6, %v556_v5  ;;  %v560_v14 = vld [vmem:[#allocation13 + $0x48] sm:$0xff]  ;;  %v566_v21 = vld [vmem:[#allocation13 + $0x78] sm:$0xff] }
 0x116   :  { %3430 = vmatprep.subr.bf16.mxu0 %v3429_v8  ;;  %3426 = vmatprep.subr.bf16.mxu1 %v3425_v17  ;;  %v3463_v8 = vpack.c.bf16 %v553_v3, %v551_v2  ;;  %v561_v19 = vld [vmem:[#allocation13 + $0x50] sm:$0xff]  ;;  %v570_v27 = vld [vmem:[#allocation13 + $0x98] sm:$0xff] }
 0x117   :  { %v565_v25 = vld [vmem:[#allocation13 + $0x70] sm:$0xff]  ;;  %v574_v33 = vld [vmem:[#allocation13 + $0xb8] sm:$0xff] }
 0x118   :  { %3263 = vmatmul.mubr.f32.vlgmr.msra.gmra.mrb[0].mxu0 %v251_v15  ;;  %v562_v15 = vld [vmem:[#allocation13 + $0x58] sm:$0xff]  ;;  %v569_v31 = vld [vmem:[#allocation13 + $0x90] sm:$0xff] }
 0x119   :  { %3432 = vmatpush1.bf16.msra.mxu0 %v3431_v16  ;;  %544 = vmatprep.mubr.f32.mxu0 %v4344_v1  ;;  %v3467_v16 = vpack.c.bf16 %v557_v13, %v555_v12  ;;  %v3469_v17 = vpack.c.bf16 %v562_v15, %v560_v14  ;;  %v573_v37 = vld [vmem:[#allocation13 + $0xb0] sm:$0xff]  ;;  %v578_v39 = vld [vmem:[#allocation13 + $0xd8] sm:$0xff]  ;;  %v233_v12 = vlaneseq  ;;  %v583_v15 = vld [vmem:[#allocation14] sm:$0x3] }
 0x11a   :  { %3434 = vmatprep.subr.bf16.mxu0 %v3433_v18  ;;  %3428 = vmatpush1.bf16.msra.mxu1 %v3427_v58  ;;  %v559_v18 = vld [vmem:[#allocation13 + $0x40] sm:$0xff]  ;;  %v577_v43 = vld [vmem:[#allocation13 + $0xd0] sm:$0xff]  ;;  %v582_v45 = vld [vmem:[#allocation13 + $0xf8] sm:$0xff] }
 0x11b   :  { %3462 = vmatprep.subr.bf16.mxu1 %v3461_v63  ;;  %v3471_v22 = vpack.c.bf16 %v561_v19, %v559_v18  ;;  %v581_v49 = vld [vmem:[#allocation13 + $0xf0] sm:$0xff]  ;;  %v4705_v63 = vld [vmem:[%s5040_s7 + $0x10] sm:$0xff]  ;;  %v586_v13 = vshrl.u32 %v233_v12, 7 }
 0x11c   :  { %v4656_v51 = vld [vmem:[#allocation2] sm:$0xff]  ;;  %v4660_v52 = vld [vmem:[#allocation2 + $0x8] sm:$0xff]  ;;  %v4720_v3 = vld [vmem:[%s5041_s27 + $0x10] sm:$0xff] }
 0x11d   :  { %3436 = vmatpush1.bf16.msra.mxu0 %v3435_v23  ;;  %v3473_v23 = vpack.c.bf16 %v566_v21, %v564_v20  ;;  %v4675_v59 = vld [vmem:[%s5040_s7] sm:$0xff]  ;;  %v4687_v61 = vld [vmem:[%s5040_s7 + $0x8] sm:$0xff]  ;;  %v4736_v14 = vsub.s32 0, %v586_v13 }
 0x11e   :  { %3438 = vmatprep.subr.bf16.mxu0 %v3437_v24  ;;  %v563_v24 = vld [vmem:[#allocation13 + $0x60] sm:$0xff]  ;;  %v4692_v62 = vld [vmem:[%s5041_s27] sm:$0xff]  ;;  %v4710_v2 = vld [vmem:[%s5041_s27 + $0x8] sm:$0xff] }
 0x11f   :  { %v3475_v28 = vpack.c.bf16 %v565_v25, %v563_v24 }
 0x121   :  { %3440 = vmatpush1.bf16.msra.mxu0 %v3439_v29  ;;  %v3477_v29 = vpack.c.bf16 %v570_v27, %v568_v26 }
 0x122   :  { %3442 = vmatprep.subr.bf16.mxu0 %v3441_v30  ;;  %v567_v30 = vld [vmem:[#allocation13 + $0x80] sm:$0xff] }
 0x123   :  { %v3479_v34 = vpack.c.bf16 %v569_v31, %v567_v30 }
 0x125   :  { %3444 = vmatpush1.bf16.msra.mxu0 %v3443_v35  ;;  %v3481_v35 = vpack.c.bf16 %v574_v33, %v572_v32 }
 0x126   :  { %3446 = vmatprep.subr.bf16.mxu0 %v3445_v36  ;;  %v571_v36 = vld [vmem:[#allocation13 + $0xa0] sm:$0xff] }
 0x127   :  { %v3483_v40 = vpack.c.bf16 %v573_v37, %v571_v36 }
 0x129   :  { %3448 = vmatpush1.bf16.msra.mxu0 %v3447_v41  ;;  %v3485_v41 = vpack.c.bf16 %v578_v39, %v576_v38 }
 0x12a   :  { %3450 = vmatprep.subr.bf16.mxu0 %v3449_v42  ;;  %v575_v42 = vld [vmem:[#allocation13 + $0xc0] sm:$0xff] }
 0x12b   :  { %v3487_v46 = vpack.c.bf16 %v577_v43, %v575_v42 }
 0x12d   :  { %3452 = vmatpush1.bf16.msra.mxu0 %v3451_v47  ;;  %v3489_v47 = vpack.c.bf16 %v582_v45, %v580_v44 }
 0x12e   :  { %3454 = vmatprep.subr.bf16.mxu0 %v3453_v48  ;;  %v579_v48 = vld [vmem:[#allocation13 + $0xe0] sm:$0xff] }
 0x12f   :  { %v3491_v50 = vpack.c.bf16 %v581_v49, %v579_v48 }
 0x131   :  { %3456 = vmatpush1.bf16.msra.mxu0 %v3455_v53  ;;  %v4664_v53 = vld [vmem:[#allocation2 + $0x10] sm:$0xff] }
 0x132   :  { %3458 = vmatprep.subr.bf16.mxu0 %v3457_v54  ;;  %v4668_v54 = vld [vmem:[#allocation2 + $0x18] sm:$0xff] }
 0x135   :  { %3460 = vmatpush1.bf16.msra.mxu0 %v3459_v60  ;;  %v245_v60 = vld [vmem:[%s5040_s7 + $0x18] sm:$0xff] }
 0x1eb   :  { %v341_v7 = vpop.f32.mrb[0].mxu0 }
 0x1ec   :  { %v4650_v9 = vadd.f32 %v3125_v4, %v341_v7  ;;  %v3264_v10 = vpop.f32.mrb[1].mxu0  ;;  %v4730_v4 = vld [vmem:[%s5041_s27 + $0x18] sm:$0xff] }
 0x1ee   :  { %474 = vmatmul.mubr.f32.vlgmr.msra.gmra.mrb[0].mxu1 %v4650_v9  ;;  %545 = vmatmul.mubr.f32.vlgmr.msra.gmra.mrb[2].mxu0 %v4650_v9 }
 0x1ef   :  { %3464 = vmatpush1.bf16.msra.mxu1 %v3463_v8  ;;  %659 = vmatprep.mubr.f32.mxu1 %v4344_v1 }
 0x1f0   :  { %3466 = vmatprep.subr.bf16.mxu1 %v3465_v11  ;;  %761 = vmatprep.mubr.f32.mxu0 %v4344_v1 }
 0x1f3   :  { %3468 = vmatpush1.bf16.msra.mxu1 %v3467_v16  ;;  %v4738_v16 = vsub.s32 1, %v586_v13 }
 0x1f4   :  { %3470 = vmatprep.subr.bf16.mxu1 %v3469_v17  ;;  %v588_v17 = vrot.slane %v583_v15, %v4736_v14 }
 0x1f5   :  { %v592_v18 = vrot.slane %v583_v15, %v4738_v16 }
 0x1f7   :  { %3472 = vmatpush1.bf16.msra.mxu1 %v3471_v22 }
 0x1f8   :  { %3474 = vmatprep.subr.bf16.mxu1 %v3473_v23 }
 0x1fb   :  { %3476 = vmatpush1.bf16.msra.mxu1 %v3475_v28 }
 0x1fc   :  { %3478 = vmatprep.subr.bf16.mxu1 %v3477_v29 }
 0x1ff   :  { %3480 = vmatpush1.bf16.msra.mxu1 %v3479_v34 }
 0x200   :  { %3482 = vmatprep.subr.bf16.mxu1 %v3481_v35 }
 0x203   :  { %3484 = vmatpush1.bf16.msra.mxu1 %v3483_v40 }
 0x204   :  { %3486 = vmatprep.subr.bf16.mxu1 %v3485_v41 }
 0x207   :  { %3488 = vmatpush1.bf16.msra.mxu1 %v3487_v46 }
 0x208   :  { %3490 = vmatprep.subr.bf16.mxu1 %v3489_v47 }
 0x20b   :  { %3492 = vmatpush1.bf16.msra.mxu1 %v3491_v50 }
 0x20e   :  { %660 = vmatmul.mubr.f32.vlgmr.msra.gmra.mrb[2].mxu1 %v4656_v51 }
 0x20f   :  { %665 = vmatprep.mubr.f32.mxu1 %v4344_v1 }
 0x212   :  { %666 = vmatmul.mubr.f32.gmra.mrb[4].mxu1 %v4660_v52 }
 0x213   :  { %671 = vmatprep.mubr.f32.mxu1 %v4344_v1 }
 0x216   :  { %672 = vmatmul.mubr.f32.gmra.mrb[6].mxu1 %v4664_v53 }
 0x217   :  { %677 = vmatprep.mubr.f32.mxu1 %v4344_v1 }
 0x21a   :  { %678 = vmatmul.mubr.f32.gmra.mrb[8].mxu1 %v4668_v54 }
 0x21b   :  { %779 = vmatprep.mubr.f32.mxu1 %v4344_v1 }
 0x2c1   :  { %v475_v55 = vpop.f32.mrb[0].mxu1  ;;  %v546_v56 = vpop.f32.mrb[2].mxu0 }
 0x2c2   :  { %v477_v57 = vpop.f32.mrb[1].mxu1  ;;  %v548_v58 = vpop.f32.mrb[3].mxu0 }
 0x2c3   :  { %697 = vmatprep.subr.mxu0 %v548_v58  ;;  %3751 = vmatprep.subr.mxu1 %v548_v58 }
 0x2c4   :  { %698 = vmatpush1.msra.mxu0 %v546_v56  ;;  %3752 = vmatpush1.msra.mxu1 %v546_v56 }
 0x2c5   :  { %3126 = vmatmul.mubr.msk.f32.vlgmr.msra.gmra.mrb[4].mxu0 %vm684_vm1, %v4675_v59  ;;  %3129 = vmatmul.mubr.msk.f32.vlgmr.msra.gmra.mrb[8].mxu1 %vm684_vm1, %v245_v60 }
 0x2c6   :  { %798 = vmatprep.subr.mxu1 %v477_v57  ;;  %767 = vmatprep.mubr.f32.mxu0 %v4344_v1 }
 0x2c7   :  { %799 = vmatpush1.msra.mxu1 %v475_v55  ;;  %862 = vmatprep.mubr.f32.mxu1 %v4344_v1 }
 0x2c8   :  { %3493 = vmatprep.subr.bf16.mxu0 %v4342_v0 }
 0x2c9   :  { %3127 = vmatmul.mubr.msk.f32.gmra.mrb[6].mxu0 %vm684_vm1, %v4687_v61  ;;  %3130 = vmatmul.mubr.msk.f32.vlgmr.msra.gmra.mrb[10].mxu1 %vm684_vm1, %v4692_v62 }
 0x2ca   :  { %773 = vmatprep.mubr.f32.mxu0 %v4344_v1  ;;  %868 = vmatprep.mubr.f32.mxu1 %v4344_v1 }
 0x2cd   :  { %3128 = vmatmul.mubr.msk.f32.gmra.mrb[8].mxu0 %vm684_vm1, %v4705_v63  ;;  %3131 = vmatmul.mubr.msk.f32.gmra.mrb[12].mxu1 %vm684_vm1, %v4710_v2 }
 0x2ce   :  { %874 = vmatprep.mubr.f32.mxu1 %v4344_v1  ;;  %3273 = vmatprep.mubr.msk.f32.mxu0 %vm4343_vm0, %v4344_v1 }
 0x2d1   :  { %3132 = vmatmul.mubr.msk.f32.gmra.mrb[14].mxu1 %vm684_vm1, %v4720_v3 }
 0x2d2   :  { %880 = vmatprep.mubr.f32.mxu1 %v4344_v1 }
 0x2d5   :  { %3133 = vmatmul.mubr.msk.f32.gmra.mrb[8].mxu1 %vm684_vm1, %v4730_v4 }
 0x2d6   :  { %1388 = vmatprep.mubr.f32.mxu1 %v4344_v1 }
 0x2e1   :  { %v661_v5 = vpop.f32.mrb[2].mxu1 }
 0x2e2   :  { %v663_v6 = vpop.f32.mrb[3].mxu1  ;;  %v662_v19 = vadd.f32 %v661_v5, %v588_v17 }
 0x2e3   :  { %v664_v20 = vadd.f32 %v663_v6, %v592_v18 }
 0x2e5   :  { %v667_v7 = vpop.f32.mrb[4].mxu1 }
 0x2e6   :  { %v669_v8 = vpop.f32.mrb[5].mxu1  ;;  %v668_v25 = vadd.f32 %v667_v7, %v588_v17 }
 0x2e7   :  { %v670_v26 = vadd.f32 %v669_v8, %v592_v18 }
 0x2e9   :  { %v673_v10 = vpop.f32.mrb[6].mxu1 }
 0x2ea   :  { %v675_v11 = vpop.f32.mrb[7].mxu1  ;;  %v674_v35 = vadd.f32 %v673_v10, %v588_v17 }
 0x2eb   :  { %v676_v36 = vadd.f32 %v675_v11, %v592_v18 }
 0x398   :  { %v763_v21 = vpop.f32.mrb[4].mxu0 }
 0x399   :  { %v3754_v22 = vadd.f32 %v763_v21, %v662_v19  ;;  %v765_v23 = vpop.f32.mrb[5].mxu0 }
 0x39a   :  { %v3757_v24 = vadd.f32 %v765_v23, %v664_v20 }
 0x39c   :  { %v769_v27 = vpop.f32.mrb[6].mxu0  ;;  %v864_v28 = vpop.f32.mrb[10].mxu1 }
 0x39d   :  { %v3760_v29 = vadd.f32 %v769_v27, %v668_v25  ;;  %v3755_v30 = vadd.f32 %v3754_v22, %v864_v28  ;;  %v771_v31 = vpop.f32.mrb[7].mxu0  ;;  %v866_v32 = vpop.f32.mrb[11].mxu1 }
 0x39e   :  { %v3763_v33 = vadd.f32 %v771_v31, %v670_v26  ;;  %v3758_v34 = vadd.f32 %v3757_v24, %v866_v32 }
 0x3a0   :  { %v775_v37 = vpop.f32.mrb[8].mxu0  ;;  %v870_v38 = vpop.f32.mrb[12].mxu1 }
 0x3a1   :  { %v3766_v39 = vadd.f32 %v775_v37, %v674_v35  ;;  %v3761_v40 = vadd.f32 %v3760_v29, %v870_v38  ;;  %v777_v41 = vpop.f32.mrb[9].mxu0  ;;  %v872_v42 = vpop.f32.mrb[13].mxu1 }
 0x3a2   :  { %v3769_v43 = vadd.f32 %v777_v41, %v676_v36  ;;  %v3764_v44 = vadd.f32 %v3763_v33, %v872_v42 }
 0x3a3   :  { %v897_v45 = vadd.f32 %v3761_v40, %v3755_v30 }
 0x3a4   :  { %v906_v46 = vadd.f32 %v3764_v44, %v3758_v34  ;;  %v876_v47 = vpop.f32.mrb[14].mxu1 }
 0x3a5   :  { %v3767_v48 = vadd.f32 %v3766_v39, %v876_v47  ;;  %v878_v49 = vpop.f32.mrb[15].mxu1 }
 0x3a6   :  { %v3770_v50 = vadd.f32 %v3769_v43, %v878_v49 }
 0x3a7   :  { %v898_v55 = vadd.f32 %v3767_v48, %v897_v45 }
 0x3a8   :  { %v907_v56 = vadd.f32 %v3770_v50, %v906_v46  ;;  %v882_v57 = vpop.f32.mrb[8].mxu1 }
 0x3a9   :  { %v3771_v58 = vadd.f32 %v882_v57, %v588_v17  ;;  %v884_v60 = vpop.f32.mrb[9].mxu1 }
 0x3aa   :  { %v3772_v5 = vadd.f32 %v884_v60, %v592_v18 }
 0x3ab   :  { %v899_v6 = vadd.f32 %v3771_v58, %v898_v55 }
 0x3ac   :  { %v908_v7 = vadd.f32 %v3772_v5, %v907_v56 }
 0x3ad   :  { %v900_v8 = vrot.slane %v899_v6, 4 }
 0x3ae   :  { %v909_v10 = vrot.slane %v908_v7, 4 }
 0x3af   :  { %v901_v11 = vadd.f32 %v900_v8, %v899_v6 }
 0x3b0   :  { %v910_v13 = vadd.f32 %v909_v10, %v908_v7 }
 0x3b1   :  { %v902_v15 = vrot.slane %v901_v11, 2 }
 0x3b2   :  { %v911_v19 = vrot.slane %v910_v13, 2 }
 0x3b3   :  { %v903_v20 = vadd.f32 %v902_v15, %v901_v11 }
 0x3b4   :  { %v912_v21 = vadd.f32 %v911_v19, %v910_v13  ;;  %v895_v19 = vld [vmem:[#allocation16] sm:$0x3] }
 0x3b5   :  { %v904_v22 = vrot.slane %v903_v20, 1 }
 0x3b6   :  { %v913_v23 = vrot.slane %v912_v21, 1 }
 0x3b7   :  { %v905_v24 = vadd.f32 %v904_v22, %v903_v20  ;;  %v896_v20 = vld [vmem:[#allocation17] sm:$0x3] }
 0x3b8   :  { %v914_v25 = vadd.f32 %v913_v23, %v912_v21  ;;  %v958_v21 = vrot.slane %v895_v19, %v4736_v14  ;;  %v989_v22 = vrot.slane %v896_v20, %v4736_v14  ;;  %v962_v23 = vrot.slane %v895_v19, %v4738_v16 }
 0x3b9   :  { %v916_v26 = vmul.f32 0.03125, %v905_v24 }
 0x3ba   :  { %v917_v27 = vmul.f32 0.03125, %v914_v25 }
 0x3bb   :  { %v918_v28 = vsub.f32 %v3755_v30, %v916_v26  ;;  %v920_v17 = vsub.f32 %v3761_v40, %v916_v26  ;;  %v922_v29 = vsub.f32 %v3767_v48, %v916_v26  ;;  %v924_v18 = vsub.f32 %v3771_v58, %v916_v26 }
 0x3bc   :  { %v919_v31 = vsub.f32 %v3758_v34, %v917_v27  ;;  %v921_v32 = vsub.f32 %v3764_v44, %v917_v27  ;;  %v923_v33 = vsub.f32 %v3770_v50, %v917_v27  ;;  %v925_v35 = vsub.f32 %v3772_v5, %v917_v27 }
 0x3bd   :  { %v926_v36 = vmul.f32 %v918_v28, %v918_v28  ;;  %v928_v37 = vmul.f32 %v920_v17, %v920_v17  ;;  %v930_v38 = vmul.f32 %v922_v29, %v922_v29  ;;  %v932_v43 = vmul.f32 %v924_v18, %v924_v18 }
 0x3be   :  { %v927_v41 = vmul.f32 %v919_v31, %v919_v31  ;;  %v929_v42 = vmul.f32 %v921_v32, %v921_v32  ;;  %v931_v46 = vmul.f32 %v923_v33, %v923_v33  ;;  %v933_v55 = vmul.f32 %v925_v35, %v925_v35 }
 0x3bf   :  { %v934_v39 = vadd.f32 %v928_v37, %v926_v36  ;;  %v965_v24 = vmul.f32 %v958_v21, %v918_v28  ;;  %v967_v25 = vmul.f32 %v958_v21, %v920_v17  ;;  %v969_v26 = vmul.f32 %v958_v21, %v922_v29 }
 0x3c0   :  { %v943_v47 = vadd.f32 %v929_v42, %v927_v41  ;;  %v971_v27 = vmul.f32 %v958_v21, %v924_v18  ;;  %v993_v37 = vrot.slane %v896_v20, %v4738_v16 }
 0x3c1   :  { %v935_v45 = vadd.f32 %v934_v39, %v930_v38 }
 0x3c2   :  { %v944_v30 = vadd.f32 %v943_v47, %v931_v46  ;;  %v968_v46 = vmul.f32 %v962_v23, %v921_v32  ;;  %v970_v47 = vmul.f32 %v962_v23, %v923_v33 }
 0x3c3   :  { %v936_v49 = vadd.f32 %v935_v45, %v932_v43  ;;  %v966_v45 = vmul.f32 %v962_v23, %v919_v31 }
 0x3c4   :  { %v945_v48 = vadd.f32 %v944_v30, %v933_v55 }
 0x3c5   :  { %v937_v40 = vrot.slane %v936_v49, 4 }
 0x3c6   :  { %v946_v34 = vrot.slane %v945_v48, 4 }
 0x3c7   :  { %v938_v56 = vadd.f32 %v937_v40, %v936_v49  ;;  %v972_v49 = vmul.f32 %v962_v23, %v925_v35 }
 0x3c8   :  { %v947_v50 = vadd.f32 %v946_v34, %v945_v48 }
 0x3c9   :  { %v939_v44 = vrot.slane %v938_v56, 2 }
 0x3ca   :  { %v948_v58 = vrot.slane %v947_v50, 2 }
 0x3cb   :  { %v940_v57 = vadd.f32 %v939_v44, %v938_v56 }
 0x3cc   :  { %v949_v5 = vadd.f32 %v948_v58, %v947_v50 }
 0x3cd   :  { %v941_v60 = vrot.slane %v940_v57, 1 }
 0x3ce   :  { %v950_v7 = vrot.slane %v949_v5, 1 }
 0x3cf   :  { %v942_v6 = vadd.f32 %v941_v60, %v940_v57 }
 0x3d0   :  { %v951_v10 = vadd.f32 %v950_v7, %v949_v5 }
 0x3d1   :  { %v952_v8 = vmul.f32 0.03125, %v942_v6 }
 0x3d2   :  { %v953_v13 = vmul.f32 0.03125, %v951_v10 }
 0x3d3   :  { %v973_v11 = vadd.f32 1e-05, %v952_v8 }
 0x3d4   :  { %v974_v15 = vadd.f32 1e-05, %v953_v13 }
 0x3d5   :  { %3850 = vrsqrt.f32 %v973_v11 }
 0x3d6   :  { %3852 = vrsqrt.f32 %v974_v15 }
 0x3df   :  { %v3851_v36 = vpop.eup %3850 }
 0x3e0   :  { %v977_v38 = vmul.f32 %v3851_v36, %v965_v24  ;;  %v979_v39 = vmul.f32 %v3851_v36, %v967_v25  ;;  %v981_v41 = vmul.f32 %v3851_v36, %v969_v26  ;;  %v983_v42 = vmul.f32 %v3851_v36, %v971_v27  ;;  %v3853_v43 = vpop.eup %3852 }
 0x3e1   :  { %v978_v28 = vmul.f32 %v3853_v43, %v966_v45  ;;  %v980_v17 = vmul.f32 %v3853_v43, %v968_v46  ;;  %v982_v29 = vmul.f32 %v3853_v43, %v970_v47  ;;  %v984_v18 = vmul.f32 %v3853_v43, %v972_v49 }
 0x3e2   :  { %v996_v55 = vadd.f32 %v989_v22, %v977_v38  ;;  %v998_v30 = vadd.f32 %v989_v22, %v979_v39  ;;  %v1000_v40 = vadd.f32 %v989_v22, %v981_v41  ;;  %v1002_v48 = vadd.f32 %v989_v22, %v983_v42 }
 0x3e3   :  { %v1003_v57 = vadd.f32 %v993_v37, %v984_v18  ;;  %v4746_v58 = vadd.f32 %v993_v37, %v978_v28  ;;  %v4748_v60 = vadd.f32 %v993_v37, %v980_v17  ;;  %v4750_v31 = vadd.f32 %v993_v37, %v982_v29 }
 0x3e4   :  { %v1004_v56 = vsub.f32 0.0, %v996_v55  ;;  %v1005_v34 = vsub.f32 0.0, %v998_v30  ;;  %v1006_v44 = vsub.f32 0.0, %v1000_v40  ;;  %v1007_v50 = vsub.f32 0.0, %v1002_v48 }
 0x3e5   :  { %v1035_v6 = vmin.f32 %v1003_v57, 20.0  ;;  %v1032_v7 = vmin.f32 %v4746_v58, 20.0  ;;  %v1033_v8 = vmin.f32 %v4748_v60, 20.0  ;;  %v1034_v11 = vmin.f32 %v4750_v31, 20.0 }
 0x3e6   :  { %v1008_v32 = vmul.f32 1.442695, %v1004_v56  ;;  %v1010_v33 = vmul.f32 1.442695, %v1005_v34  ;;  %v1012_v35 = vmul.f32 1.442695, %v1006_v44 }
 0x3e7   :  { %v1014_v5 = vmul.f32 1.442695, %v1007_v50  ;;  %v1042_v10 = vmul.f32 1.442695, %v1035_v6  ;;  %v1036_v13 = vmul.f32 1.442695, %v1032_v7 }
 0x3e8   :  { %3854 = vpow2.f32 %v1008_v32  ;;  %v1038_v15 = vmul.f32 1.442695, %v1033_v8  ;;  %v1040_v19 = vmul.f32 1.442695, %v1034_v11  ;;  %v234_v46 = vand.u32 127, %v233_v12 }
 0x3e9   :  { %3856 = vpow2.f32 %v1010_v33  ;;  %vm1031_vm3 = vcmp.gt.f32.partialorder %v1003_v57, 20.0  ;;  %vm1028_vm4 = vcmp.gt.f32.partialorder %v4746_v58, 20.0  ;;  %vm1029_vm5 = vcmp.gt.f32.partialorder %v4748_v60, 20.0 }
 0x3ea   :  { %3858 = vpow2.f32 %v1012_v35  ;;  %vm235_vm2 = vcmp.lt.s32.totalorder %v234_v46, 16  ;;  %vm1030_vm6 = vcmp.gt.f32.partialorder %v4750_v31, 20.0 }
 0x3eb   :  { %3860 = vpow2.f32 %v1014_v5  ;;  %v4757_v17 = vsel %vm235_vm2, 1.0, %v4344_v1 }
 0x3ec   :  { %3862 = vpow2.f32 %v1042_v10 }
 0x3ed   :  { %3864 = vpow2.f32 %v1036_v13 }
 0x3ee   :  { %3866 = vpow2.f32 %v1038_v15  ;;  %v1194_v15 = vld [vmem:[#allocation11 + $0x228] sm:$0xff] }
 0x3ef   :  { %3868 = vpow2.f32 %v1040_v19  ;;  %v1192_v19 = vld [vmem:[#allocation11 + $0x218] sm:$0xff] }
 0x3f2   :  { %v3855_v20 = vpop.eup %3854 }
 0x3f3   :  { %v3857_v21 = vpop.eup %3856  ;;  %v1016_v39 = vadd.f32 1.0, %v3855_v20 }
 0x3f4   :  { %v3859_v22 = vpop.eup %3858  ;;  %v1017_v42 = vadd.f32 1.0, %v3857_v21  ;;  %v1196_v21 = vld [vmem:[#allocation11 + $0x238] sm:$0xff] }
 0x3f5   :  { %v3861_v23 = vpop.eup %3860  ;;  %v1018_v45 = vadd.f32 1.0, %v3859_v22  ;;  %v1189_v22 = vld [vmem:[#allocation11 + $0x200] sm:$0xff] }
 0x3f6   :  { %v3863_v24 = vpop.eup %3862  ;;  %v1019_v25 = vadd.f32 1.0, %v3861_v23  ;;  %v1193_v23 = vld [vmem:[#allocation11 + $0x220] sm:$0xff] }
 0x3f7   :  { %v3865_v26 = vpop.eup %3864  ;;  %v1047_v27 = vadd.f32 1.0, %v3863_v24  ;;  %v3531_v24 = vpack.c.bf16 %v1196_v21, %v1192_v19  ;;  %v1226_v19 = vld [vmem:[#allocation11 + $0x328] sm:$0xff] }
 0x3f8   :  { %v3867_v36 = vpop.eup %3866  ;;  %3870 = vrcp.f32 %v1019_v25  ;;  %v1044_v37 = vadd.f32 1.0, %v3865_v26  ;;  %v3501_v25 = vpack.c.bf16 %v1193_v23, %v1189_v22  ;;  %v1191_v26 = vld [vmem:[#allocation11 + $0x210] sm:$0xff]  ;;  %v1228_v23 = vld [vmem:[#allocation11 + $0x338] sm:$0xff] }
 0x3f9   :  { %v3869_v38 = vpop.eup %3868  ;;  %3872 = vlog2.f32 %v1047_v27  ;;  %v1045_v41 = vadd.f32 1.0, %v3867_v36  ;;  %v1195_v27 = vld [vmem:[#allocation11 + $0x230] sm:$0xff]  ;;  %3532 = vmatprep.subr.bf16.mxu1 %v3531_v24  ;;  %v1221_v24 = vld [vmem:[#allocation11 + $0x300] sm:$0xff] }
 0x3fa   :  { %3874 = vlog2.f32 %v1044_v37  ;;  %v1046_v43 = vadd.f32 1.0, %v3869_v38  ;;  %v3533_v36 = vpack.c.bf16 %v1195_v27, %v1191_v26  ;;  %v1198_v37 = vld [vmem:[#allocation11 + $0x248] sm:$0xff]  ;;  %v1223_v27 = vld [vmem:[#allocation11 + $0x310] sm:$0xff] }
 0x3fb   :  { %3876 = vlog2.f32 %v1045_v41  ;;  %v1202_v38 = vld [vmem:[#allocation11 + $0x268] sm:$0xff] }
 0x3fc   :  { %3878 = vlog2.f32 %v1046_v43  ;;  %3534 = vmatpush1.bf16.msra.mxu1 %v3533_v36  ;;  %v3503_v41 = vpack.c.bf16 %v1202_v38, %v1198_v37  ;;  %v1197_v43 = vld [vmem:[#allocation11 + $0x240] sm:$0xff]  ;;  %v1227_v36 = vld [vmem:[#allocation11 + $0x330] sm:$0xff]  ;;  %v1230_v37 = vld [vmem:[#allocation11 + $0x348] sm:$0xff] }
 0x3fd   :  { %3880 = vrcp.f32 %v1016_v39  ;;  %v1200_v39 = vld [vmem:[#allocation11 + $0x258] sm:$0xff]  ;;  %v1234_v38 = vld [vmem:[#allocation11 + $0x368] sm:$0xff] }
 0x3fe   :  { %3882 = vrcp.f32 %v1017_v42  ;;  %v1204_v42 = vld [vmem:[#allocation11 + $0x278] sm:$0xff] }
 0x3ff   :  { %3884 = vrcp.f32 %v1018_v45  ;;  %v1201_v45 = vld [vmem:[#allocation11 + $0x260] sm:$0xff]  ;;  %v3535_v46 = vpack.c.bf16 %v1204_v42, %v1200_v39  ;;  %v1232_v39 = vld [vmem:[#allocation11 + $0x358] sm:$0xff] }
 0x401   :  { %3536 = vmatprep.subr.bf16.mxu1 %v3535_v46  ;;  %v1229_v46 = vld [vmem:[#allocation11 + $0x340] sm:$0xff] }
 0x402   :  { %v3871_v47 = vpop.eup %3870 }
 0x403   :  { %v3873_v49 = vpop.eup %3872 }
 0x404   :  { %v3875_v55 = vpop.eup %3874  ;;  %v1055_v30 = vmul.f32 0.6931472, %v3873_v49  ;;  %v1199_v49 = vld [vmem:[#allocation11 + $0x250] sm:$0xff] }
 0x405   :  { %v3877_v40 = vpop.eup %3876  ;;  %v1049_v48 = vmul.f32 0.6931472, %v3875_v55  ;;  %v1203_v55 = vld [vmem:[#allocation11 + $0x270] sm:$0xff] }
 0x406   :  { %v3879_v28 = vpop.eup %3878  ;;  %v1051_v29 = vmul.f32 0.6931472, %v3877_v40  ;;  %v1059_v18 = vsel %vm1031_vm3, %v1003_v57, %v1055_v30  ;;  %v1206_v30 = vld [vmem:[#allocation11 + $0x288] sm:$0xff]  ;;  %v3537_v40 = vpack.c.bf16 %v1203_v55, %v1199_v49  ;;  %v1231_v49 = vld [vmem:[#allocation11 + $0x350] sm:$0xff] }
 0x407   :  { %v3881_v56 = vpop.eup %3880  ;;  %v1056_v12 = vsel %vm1028_vm4, %v4746_v58, %v1049_v48  ;;  %v1053_v34 = vmul.f32 0.6931472, %v3879_v28  ;;  %v1063_v44 = vmul.f32 %v3871_v47, %v1059_v18  ;;  %v3505_v47 = vpack.c.bf16 %v1201_v45, %v1197_v43  ;;  %v1210_v48 = vld [vmem:[#allocation11 + $0x2a8] sm:$0xff]  ;;  %v1208_v28 = vld [vmem:[#allocation11 + $0x298] sm:$0xff] }
 0x408   :  { %v3883_v50 = vpop.eup %3882  ;;  %v1057_v32 = vsel %vm1029_vm5, %v4748_v60, %v1051_v29  ;;  %v1060_v33 = vmul.f32 %v3881_v56, %v1056_v12  ;;  %v4770_v60 = vld [vmem:[#allocation5] sm:$0xff]  ;;  %v1212_v29 = vld [vmem:[#allocation11 + $0x2b8] sm:$0xff]  ;;  %v3507_v18 = vpack.c.bf16 %v1210_v48, %v1206_v30  ;;  %v1205_v12 = vld [vmem:[#allocation11 + $0x280] sm:$0xff]  ;;  %3538 = vmatpush1.bf16.msra.mxu1 %v3537_v40  ;;  %v3549_v43 = vpack.c.bf16 %v1227_v36, %v1223_v27 }
 0x409   :  { %v3885_v35 = vpop.eup %3884  ;;  %v1061_v5 = vmul.f32 %v3883_v50, %v1057_v32  ;;  %v1058_v6 = vsel %vm1030_vm6, %v4750_v31, %v1053_v34  ;;  %v1067_v8 = vmul.f32 %v4757_v17, %v1063_v44  ;;  %v1190_v31 = vld [vmem:[#allocation11 + $0x208] sm:$0xff]  ;;  %v3539_v56 = vpack.c.bf16 %v1212_v29, %v1208_v28  ;;  %v1209_v34 = vld [vmem:[#allocation11 + $0x2a0] sm:$0xff]  ;;  %v1207_v44 = vld [vmem:[#allocation11 + $0x290] sm:$0xff] }
 0x40a   :  { %v1064_v7 = vmul.f32 %v4757_v17, %v1060_v33  ;;  %v1062_v57 = vmul.f32 %v3885_v35, %v1058_v6  ;;  %v3499_v20 = vpack.c.bf16 %v1194_v15, %v1190_v31  ;;  %v3509_v50 = vpack.c.bf16 %v1209_v34, %v1205_v12  ;;  %v1211_v32 = vld [vmem:[#allocation11 + $0x2b0] sm:$0xff]  ;;  %v1214_v33 = vld [vmem:[#allocation11 + $0x2c8] sm:$0xff]  ;;  %v1240_v28 = vld [vmem:[#allocation11 + $0x398] sm:$0xff] }
 0x40b   :  { %v1065_v10 = vmul.f32 %v4757_v17, %v1061_v5  ;;  %v1218_v35 = vld [vmem:[#allocation11 + $0x2e8] sm:$0xff]  ;;  %3540 = vmatprep.subr.bf16.mxu1 %v3539_v56  ;;  %v3541_v5 = vpack.c.bf16 %v1211_v32, %v1207_v44  ;;  %v3519_v45 = vpack.c.bf16 %v1234_v38, %v1230_v37  ;;  %v1235_v30 = vld [vmem:[#allocation11 + $0x370] sm:$0xff]  ;;  %v1244_v29 = vld [vmem:[#allocation11 + $0x3b8] sm:$0xff] }
 0x40c   :  { %v1066_v58 = vmul.f32 %v4757_v17, %v1062_v57  ;;  %v3511_v6 = vpack.c.bf16 %v1218_v35, %v1214_v33  ;;  %v1220_v57 = vld [vmem:[#allocation11 + $0x2f8] sm:$0xff]  ;;  %v1222_v15 = vld [vmem:[#allocation11 + $0x308] sm:$0xff]  ;;  %v3553_v56 = vpack.c.bf16 %v1235_v30, %v1231_v49  ;;  %v1237_v34 = vld [vmem:[#allocation11 + $0x380] sm:$0xff]  ;;  %v3555_v32 = vpack.c.bf16 %v1244_v29, %v1240_v28 }
 0x40d   :  { %v3494_v11 = vpack.c.bf16 %v1065_v10, %v1064_v7  ;;  %v1216_v7 = vld [vmem:[#allocation11 + $0x2d8] sm:$0xff]  ;;  %3542 = vmatpush1.bf16.msra.mxu1 %v3541_v5  ;;  %v3515_v22 = vpack.c.bf16 %v1226_v19, %v1222_v15  ;;  %v1238_v40 = vld [vmem:[#allocation11 + $0x388] sm:$0xff]  ;;  %v1241_v44 = vld [vmem:[#allocation11 + $0x3a0] sm:$0xff] }
 0x40e   :  { %v3497_v13 = vpack.c.bf16 %v1067_v8, %v1066_v58  ;;  %v1213_v8 = vld [vmem:[#allocation11 + $0x2c0] sm:$0xff]  ;;  %v3543_v10 = vpack.c.bf16 %v1220_v57, %v1216_v7  ;;  %v1242_v48 = vld [vmem:[#allocation11 + $0x3a8] sm:$0xff]  ;;  %v1243_v33 = vld [vmem:[#allocation11 + $0x3b0] sm:$0xff]  ;;  %v3525_v57 = vpack.c.bf16 %v1241_v44, %v1237_v34 }
 0x40f   :  { %3495 = vmatpush3.bf16.msra.mxu0 %v3494_v11  ;;  %v1217_v58 = vld [vmem:[#allocation11 + $0x2e0] sm:$0xff]  ;;  %v1215_v11 = vld [vmem:[#allocation11 + $0x2d0] sm:$0xff]  ;;  %v3523_v12 = vpack.c.bf16 %v1242_v48, %v1238_v40  ;;  %v1246_v35 = vld [vmem:[#allocation11 + $0x3c8] sm:$0xff] }
 0x410   :  { %3496 = vmatprep.subr.bf16.mxu0 %v4342_v0  ;;  %v3513_v31 = vpack.c.bf16 %v1217_v58, %v1213_v8  ;;  %3544 = vmatprep.subr.bf16.mxu1 %v3543_v10  ;;  %v1250_v5 = vld [vmem:[#allocation11 + $0x3e8] sm:$0xff]  ;;  %v1252_v7 = vld [vmem:[#allocation11 + $0x3f8] sm:$0xff]  ;;  %v1245_v58 = vld [vmem:[#allocation11 + $0x3c0] sm:$0xff] }
 0x411   :  { %v3527_v10 = vpack.c.bf16 %v1250_v5, %v1246_v35  ;;  %v1251_v15 = vld [vmem:[#allocation11 + $0x3f0] sm:$0xff] }
 0x412   :  { %v3135_v28 = vld [vmem:[#allocation19] ss:$0 sm:$0xff] }
 0x413   :  { %3498 = vmatpush3.bf16.msra.mxu0 %v3497_v13  ;;  %v1219_v13 = vld [vmem:[#allocation11 + $0x2f0] sm:$0xff] }
 0x414   :  { %3500 = vmatprep.subr.bf16.mxu0 %v3499_v20  ;;  %v1224_v20 = vld [vmem:[#allocation11 + $0x318] sm:$0xff]  ;;  %v3545_v21 = vpack.c.bf16 %v1219_v13, %v1215_v11  ;;  %v1249_v11 = vld [vmem:[#allocation11 + $0x3e0] sm:$0xff] }
 0x415   :  { %v3547_v26 = vpack.c.bf16 %v1228_v23, %v1224_v20  ;;  %v3529_v19 = vpack.c.bf16 %v1249_v11, %v1245_v58 }
 0x416   :  { %3274 = vmatmul.mubr.msk.f32.vlgmr.msra.gmra.mrb[10].mxu0 %vm1068_vm7, %v4770_v60  ;;  %3546 = vmatpush1.bf16.msra.mxu1 %v3545_v21  ;;  %v1397_v21 = vld [vmem:[#allocation13 + $0x108] sm:$0xff] }
 0x417   :  { %1317 = vmatprep.mubr.f32.mxu0 %v4344_v1  ;;  %3502 = vmatpush1.bf16.msra.mxu0 %v3501_v25  ;;  %v1225_v25 = vld [vmem:[#allocation11 + $0x320] sm:$0xff] }
 0x418   :  { %3504 = vmatprep.subr.bf16.mxu0 %v3503_v41  ;;  %v1236_v41 = vld [vmem:[#allocation11 + $0x378] sm:$0xff]  ;;  %v3517_v42 = vpack.c.bf16 %v1225_v25, %v1221_v24  ;;  %3548 = vmatprep.subr.bf16.mxu1 %v3547_v26 }
 0x419   :  { %v3551_v55 = vpack.c.bf16 %v1236_v41, %v1232_v39 }
 0x41a   :  { %3550 = vmatpush1.bf16.msra.mxu1 %v3549_v43 }
 0x41b   :  { %3506 = vmatpush1.bf16.msra.mxu0 %v3505_v47  ;;  %v1233_v47 = vld [vmem:[#allocation11 + $0x360] sm:$0xff]  ;;  %3552 = vmatprep.subr.bf16.mxu1 %v3551_v55 }
 0x41c   :  { %3508 = vmatprep.subr.bf16.mxu0 %v3507_v18  ;;  %v3521_v18 = vpack.c.bf16 %v1233_v47, %v1229_v46 }
 0x41e   :  { %3554 = vmatpush1.bf16.msra.mxu1 %v3553_v56  ;;  %v3136_v56 = vld [vmem:[#allocation20] ss:$0 sm:$0xff] }
 0x41f   :  { %3510 = vmatpush1.bf16.msra.mxu0 %v3509_v50  ;;  %v1239_v50 = vld [vmem:[#allocation11 + $0x390] sm:$0xff]  ;;  %3556 = vmatprep.subr.bf16.mxu1 %v3555_v32 }
 0x420   :  { %3512 = vmatprep.subr.bf16.mxu0 %v3511_v6  ;;  %v1248_v6 = vld [vmem:[#allocation11 + $0x3d8] sm:$0xff]  ;;  %v3557_v8 = vpack.c.bf16 %v1243_v33, %v1239_v50 }
 0x421   :  { %v3559_v13 = vpack.c.bf16 %v1252_v7, %v1248_v6  ;;  %v1396_v6 = vld [vmem:[#allocation13 + $0x100] sm:$0xff]  ;;  %v1398_v7 = vld [vmem:[#allocation13 + $0x110] sm:$0xff] }
 0x422   :  { %3558 = vmatpush1.bf16.msra.mxu1 %v3557_v8  ;;  %v1401_v8 = vld [vmem:[#allocation13 + $0x128] sm:$0xff]  ;;  %v3565_v11 = vpack.c.bf16 %v1398_v7, %v1396_v6 }
 0x423   :  { %3514 = vmatpush1.bf16.msra.mxu0 %v3513_v31  ;;  %v1247_v31 = vld [vmem:[#allocation11 + $0x3d0] sm:$0xff]  ;;  %3560 = vmatprep.subr.bf16.mxu1 %v3559_v13 }
 0x424   :  { %3516 = vmatprep.subr.bf16.mxu0 %v3515_v22  ;;  %v3561_v20 = vpack.c.bf16 %v1251_v15, %v1247_v31  ;;  %v1399_v22 = vld [vmem:[#allocation13 + $0x118] sm:$0xff]  ;;  %v1402_v15 = vld [vmem:[#allocation13 + $0x130] sm:$0xff] }
 0x425   :  { %v3563_v23 = vpack.c.bf16 %v1399_v22, %v1397_v21 }
 0x426   :  { %3562 = vmatpush1.bf16.msra.mxu1 %v3561_v20  ;;  %v1407_v20 = vld [vmem:[#allocation13 + $0x158] sm:$0xff] }
 0x427   :  { %3518 = vmatpush1.bf16.msra.mxu0 %v3517_v42  ;;  %3595 = vmatprep.subr.bf16.mxu1 %v4342_v0 }
 0x428   :  { %3520 = vmatprep.subr.bf16.mxu0 %v3519_v45 }
 0x42b   :  { %3522 = vmatpush1.bf16.msra.mxu0 %v3521_v18 }
 0x42c   :  { %3524 = vmatprep.subr.bf16.mxu0 %v3523_v12 }
 0x42f   :  { %3526 = vmatpush1.bf16.msra.mxu0 %v3525_v57 }
 0x430   :  { %3528 = vmatprep.subr.bf16.mxu0 %v3527_v10  ;;  %v1403_v10 = vld [vmem:[#allocation13 + $0x138] sm:$0xff] }
 0x431   :  { %v3567_v31 = vpack.c.bf16 %v1403_v10, %v1401_v8 }
 0x433   :  { %3530 = vmatpush1.bf16.msra.mxu0 %v3529_v19  ;;  %v1405_v19 = vld [vmem:[#allocation13 + $0x148] sm:$0xff] }
 0x434   :  { %3564 = vmatprep.subr.bf16.mxu0 %v3563_v23  ;;  %v3571_v22 = vpack.c.bf16 %v1407_v20, %v1405_v19  ;;  %v1404_v23 = vld [vmem:[#allocation13 + $0x140] sm:$0xff] }
 0x4e9   :  { %v1138_v24 = vpop.f32.mrb[10].mxu0 }
 0x4ea   :  { %v1144_v25 = vrot.slane %v1138_v24, 4  ;;  %v3275_v26 = vpop.f32.mrb[11].mxu0 }
 0x4eb   :  { %v1411_v26 = vld [vmem:[#allocation13 + $0x178] sm:$0xff] }
 0x4ec   :  { %v1145_v27 = vadd.f32 %v1144_v25, %v1138_v24  ;;  %v1409_v25 = vld [vmem:[#allocation13 + $0x168] sm:$0xff] }
 0x4ee   :  { %v1146_v36 = vrot.slane %v1145_v27, 2 }
 0x4f0   :  { %v1147_v37 = vadd.f32 %v1146_v36, %v1145_v27  ;;  %v3575_v36 = vpack.c.bf16 %v1411_v26, %v1409_v25 }
 0x4f2   :  { %v1148_v38 = vrot.slane %v1147_v37, 1 }
 0x4f4   :  { %v1149_v39 = vadd.f32 %v1148_v38, %v1147_v37  ;;  %v1408_v37 = vld [vmem:[#allocation13 + $0x160] sm:$0xff]  ;;  %v1410_v38 = vld [vmem:[#allocation13 + $0x170] sm:$0xff] }
 0x4f6   :  { %v1151_v41 = vmul.f32 0.125, %v1149_v39  ;;  %v1413_v39 = vld [vmem:[#allocation13 + $0x188] sm:$0xff] }
 0x4f8   :  { %v1152_v42 = vsub.f32 %v1138_v24, %v1151_v41  ;;  %v1406_v24 = vld [vmem:[#allocation13 + $0x150] sm:$0xff]  ;;  %v1415_v41 = vld [vmem:[#allocation13 + $0x198] sm:$0xff] }
 0x4f9   :  { %v3573_v27 = vpack.c.bf16 %v1406_v24, %v1404_v23 }
 0x4fa   :  { %v1153_v43 = vmul.f32 %v1152_v42, %v1152_v42  ;;  %v1167_v29 = vmul.f32 %v3135_v28, %v1152_v42  ;;  %v3577_v42 = vpack.c.bf16 %v1410_v38, %v1408_v37  ;;  %v1421_v28 = vld [vmem:[#allocation13 + $0x1c8] sm:$0xff] }
 0x4fc   :  { %v1154_v45 = vrot.slane %v1153_v43, 4 }
 0x4fe   :  { %v1155_v46 = vadd.f32 %v1154_v45, %v1153_v43  ;;  %v3579_v43 = vpack.c.bf16 %v1415_v41, %v1413_v39  ;;  %v1412_v45 = vld [vmem:[#allocation13 + $0x180] sm:$0xff] }
 0x500   :  { %v1156_v47 = vrot.slane %v1155_v46, 2 }
 0x502   :  { %v1157_v49 = vadd.f32 %v1156_v47, %v1155_v46  ;;  %v1414_v46 = vld [vmem:[#allocation13 + $0x190] sm:$0xff]  ;;  %v1417_v47 = vld [vmem:[#allocation13 + $0x1a8] sm:$0xff] }
 0x504   :  { %v1158_v55 = vrot.slane %v1157_v49, 1 }
 0x506   :  { %v1159_v30 = vadd.f32 %v1158_v55, %v1157_v49  ;;  %v1419_v49 = vld [vmem:[#allocation13 + $0x1b8] sm:$0xff]  ;;  %v3581_v55 = vpack.c.bf16 %v1414_v46, %v1412_v45 }
 0x508   :  { %v1160_v40 = vmul.f32 0.125, %v1159_v30  ;;  %v3583_v30 = vpack.c.bf16 %v1419_v49, %v1417_v47 }
 0x50a   :  { %v1168_v48 = vadd.f32 1e-05, %v1160_v40  ;;  %v1416_v40 = vld [vmem:[#allocation13 + $0x1a0] sm:$0xff] }
 0x50c   :  { %3886 = vrsqrt.f32 %v1168_v48  ;;  %v1418_v48 = vld [vmem:[#allocation13 + $0x1b0] sm:$0xff] }
 0x516   :  { %v3887_v18 = vpop.eup %3886 }
 0x517   :  { %v1170_v12 = vmul.f32 %v3887_v18, %v1167_v29  ;;  %v1423_v29 = vld [vmem:[#allocation13 + $0x1d8] sm:$0xff]  ;;  %v3585_v18 = vpack.c.bf16 %v1418_v48, %v1416_v40 }
 0x519   :  { %v1177_v34 = vadd.f32 %v3136_v56, %v1170_v12  ;;  %v3587_v56 = vpack.c.bf16 %v1423_v29, %v1421_v28  ;;  %v1420_v12 = vld [vmem:[#allocation13 + $0x1c0] sm:$0xff] }
 0x51b   :  { %v1178_v44 = vadd.f32 %v1177_v34, %v4650_v9  ;;  %v1400_v9 = vld [vmem:[#allocation13 + $0x120] sm:$0xff]  ;;  %v1422_v34 = vld [vmem:[#allocation13 + $0x1d0] sm:$0xff] }
 0x51c   :  { %v3569_v21 = vpack.c.bf16 %v1402_v15, %v1400_v9 }
 0x51d   :  { %v1180_v50 = vmin.f32 %v1178_v44, 20.0  ;;  %vm1179_vm8 = vcmp.gt.f32.partialorder %v1178_v44, 20.0 }
 0x51f   :  { %v1181_v32 = vmul.f32 1.442695, %v1180_v50  ;;  %v1427_v50 = vld [vmem:[#allocation13 + $0x1f8] sm:$0xff] }
 0x521   :  { %3888 = vpow2.f32 %v1181_v32  ;;  %v3589_v32 = vpack.c.bf16 %v1422_v34, %v1420_v12 }
 0x52b   :  { %v3889_v33 = vpop.eup %3888 }
 0x52c   :  { %v1183_v35 = vadd.f32 1.0, %v3889_v33 }
 0x52e   :  { %3890 = vlog2.f32 %v1183_v35  ;;  %v1424_v35 = vld [vmem:[#allocation13 + $0x1e0] sm:$0xff] }
 0x538   :  { %v3891_v5 = vpop.eup %3890 }
 0x539   :  { %v1185_v57 = vmul.f32 0.6931472, %v3891_v5  ;;  %v1426_v5 = vld [vmem:[#allocation13 + $0x1f0] sm:$0xff] }
 0x53a   :  { %v3593_v6 = vpack.c.bf16 %v1426_v5, %v1424_v35 }
 0x53b   :  { %v1186_v58 = vsel %vm1179_vm8, %v1178_v44, %v1185_v57  ;;  %v1425_v44 = vld [vmem:[#allocation13 + $0x1e8] sm:$0xff] }
 0x53c   :  { %v4778_v13 = vmul.f32 %v4757_v17, %v1186_v58  ;;  %v3591_v33 = vpack.c.bf16 %v1427_v50, %v1425_v44 }
 0x53e   :  { %1318 = vmatmul.mubr.f32.vlgmr.msra.gmra.mrb[12].mxu0 %v4778_v13  ;;  %1389 = vmatmul.mubr.f32.vlgmr.msra.gmra.mrb[16].mxu1 %v4778_v13 }
 0x53f   :  { %3566 = vmatpush1.bf16.msra.mxu0 %v3565_v11  ;;  %1505 = vmatprep.mubr.f32.mxu0 %v4344_v1 }
 0x540   :  { %3568 = vmatprep.subr.bf16.mxu0 %v3567_v31  ;;  %3284 = vmatprep.mubr.msk.f32.mxu1 %vm4343_vm0, %v4344_v1 }
 0x543   :  { %3570 = vmatpush1.bf16.msra.mxu0 %v3569_v21 }
 0x544   :  { %3572 = vmatprep.subr.bf16.mxu0 %v3571_v22 }
 0x547   :  { %3574 = vmatpush1.bf16.msra.mxu0 %v3573_v27 }
 0x548   :  { %3576 = vmatprep.subr.bf16.mxu0 %v3575_v36 }
 0x54b   :  { %3578 = vmatpush1.bf16.msra.mxu0 %v3577_v42 }
 0x54c   :  { %3580 = vmatprep.subr.bf16.mxu0 %v3579_v43 }
 0x54f   :  { %3582 = vmatpush1.bf16.msra.mxu0 %v3581_v55 }
 0x550   :  { %3584 = vmatprep.subr.bf16.mxu0 %v3583_v30 }
 0x553   :  { %3586 = vmatpush1.bf16.msra.mxu0 %v3585_v18 }
 0x554   :  { %3588 = vmatprep.subr.bf16.mxu0 %v3587_v56 }
 0x557   :  { %3590 = vmatpush1.bf16.msra.mxu0 %v3589_v32 }
 0x558   :  { %3592 = vmatprep.subr.bf16.mxu0 %v3591_v33 }
 0x55b   :  { %3594 = vmatpush1.bf16.msra.mxu0 %v3593_v6 }
 0x55e   :  { %1506 = vmatmul.mubr.f32.vlgmr.msra.gmra.mrb[14].mxu0 %v4656_v51  ;;  %v4805_v51 = vld [vmem:[%s5040_s7 + $0x18] sm:$0xff] }
 0x55f   :  { %1511 = vmatprep.mubr.f32.mxu0 %v4344_v1 }
 0x562   :  { %1512 = vmatmul.mubr.f32.gmra.mrb[16].mxu0 %v4660_v52  ;;  %v1429_v52 = vld [vmem:[#allocation14 + $0x2] sm:$0x3] }
 0x563   :  { %1517 = vmatprep.mubr.f32.mxu0 %v4344_v1 }
 0x566   :  { %1518 = vmatmul.mubr.f32.gmra.mrb[18].mxu0 %v4664_v53 }
 0x567   :  { %1523 = vmatprep.mubr.f32.mxu0 %v4344_v1 }
 0x56a   :  { %1524 = vmatmul.mubr.f32.gmra.mrb[20].mxu0 %v4668_v54  ;;  %v1434_v54 = vrot.slane %v1429_v52, %v4736_v14 }
 0x56b   :  { %1594 = vmatprep.mubr.f32.mxu0 %v4344_v1 }
 0x611   :  { %v1319_v7 = vpop.f32.mrb[12].mxu0  ;;  %v1390_v57 = vpop.f32.mrb[16].mxu1 }
 0x612   :  { %v1321_v8 = vpop.f32.mrb[13].mxu0  ;;  %v1392_v10 = vpop.f32.mrb[17].mxu1 }
 0x613   :  { %1530 = vmatprep.subr.mxu0 %v1392_v10 }
 0x614   :  { %1531 = vmatpush1.msra.mxu0 %v1390_v57 }
 0x615   :  { %3137 = vmatmul.mubr.msk.f32.vlgmr.msra.gmra.mrb[14].mxu0 %vm684_vm1, %v4675_v59  ;;  %1619 = vmatprep.subr.mxu0 %v1321_v8 }
 0x616   :  { %1620 = vmatpush1.msra.mxu0 %v1319_v7  ;;  %1600 = vmatprep.mubr.f32.mxu0 %v4344_v1 }
 0x619   :  { %3138 = vmatmul.mubr.msk.f32.gmra.mrb[16].mxu0 %vm684_vm1, %v4687_v61  ;;  %v1438_v61 = vrot.slane %v1429_v52, %v4738_v16 }
 0x61a   :  { %1606 = vmatprep.mubr.f32.mxu0 %v4344_v1 }
 0x61d   :  { %3139 = vmatmul.mubr.msk.f32.gmra.mrb[18].mxu0 %vm684_vm1, %v4705_v63 }
 0x61e   :  { %1612 = vmatprep.mubr.f32.mxu0 %v4344_v1 }
 0x621   :  { %3140 = vmatmul.mubr.msk.f32.gmra.mrb[20].mxu0 %vm684_vm1, %v4805_v51 }
 0x622   :  { %1683 = vmatprep.mubr.f32.mxu0 %v4344_v1 }
 0x625   :  { %3141 = vmatmul.mubr.msk.f32.vlgmr.msra.gmra.mrb[14].mxu0 %vm684_vm1, %v4692_v62 }
 0x626   :  { %1689 = vmatprep.mubr.f32.mxu0 %v4344_v1 }
 0x629   :  { %3142 = vmatmul.mubr.msk.f32.gmra.mrb[16].mxu0 %vm684_vm1, %v4710_v2 }
 0x62a   :  { %1695 = vmatprep.mubr.f32.mxu0 %v4344_v1 }
 0x62d   :  { %3143 = vmatmul.mubr.msk.f32.gmra.mrb[18].mxu0 %vm684_vm1, %v4720_v3 }
 0x62e   :  { %1701 = vmatprep.mubr.f32.mxu0 %v4344_v1 }
 0x631   :  { %3144 = vmatmul.mubr.msk.f32.gmra.mrb[20].mxu0 %vm684_vm1, %v4730_v4 }
 0x632   :  { %2207 = vmatprep.mubr.f32.mxu0 %v4344_v1 }
 0x6f8   :  { %v1685_v53 = vpop.f32.mrb[14].mxu0 }
 0x6f9   :  { %v1687_v59 = vpop.f32.mrb[15].mxu0  ;;  %v3773_v63 = vadd.f32 %v1685_v53, %v1434_v54 }
 0x6fa   :  { %v3774_v11 = vadd.f32 %v1687_v59, %v1438_v61 }
 0x6fc   :  { %v1691_v62 = vpop.f32.mrb[16].mxu0 }
 0x6fd   :  { %v3775_v2 = vadd.f32 %v1691_v62, %v1434_v54  ;;  %v1693_v58 = vpop.f32.mrb[17].mxu0 }
 0x6fe   :  { %v3776_v3 = vadd.f32 %v1693_v58, %v1438_v61 }
 0x6ff   :  { %v1720_v31 = vadd.f32 %v3775_v2, %v3773_v63 }
 0x700   :  { %v1729_v9 = vadd.f32 %v3776_v3, %v3774_v11  ;;  %v1697_v15 = vpop.f32.mrb[18].mxu0 }
 0x701   :  { %v3777_v19 = vadd.f32 %v1697_v15, %v1434_v54  ;;  %v1699_v4 = vpop.f32.mrb[19].mxu0 }
 0x702   :  { %v3778_v20 = vadd.f32 %v1699_v4, %v1438_v61 }
 0x703   :  { %v1721_v21 = vadd.f32 %v3777_v19, %v1720_v31 }
 0x704   :  { %v1730_v22 = vadd.f32 %v3778_v20, %v1729_v9  ;;  %v1703_v23 = vpop.f32.mrb[20].mxu0 }
 0x705   :  { %v3779_v24 = vadd.f32 %v1703_v23, %v1434_v54  ;;  %v1705_v25 = vpop.f32.mrb[21].mxu0 }
 0x706   :  { %v3780_v26 = vadd.f32 %v1705_v25, %v1438_v61  ;;  %v1717_v25 = vld [vmem:[#allocation16 + $0x2] sm:$0x3] }
 0x707   :  { %v1722_v27 = vadd.f32 %v3779_v24, %v1721_v21 }
 0x708   :  { %v1731_v36 = vadd.f32 %v3780_v26, %v1730_v22 }
 0x709   :  { %v1723_v37 = vrot.slane %v1722_v27, 4 }
 0x70a   :  { %v1732_v38 = vrot.slane %v1731_v36, 4 }
 0x70b   :  { %v1724_v39 = vadd.f32 %v1723_v37, %v1722_v27  ;;  %v1780_v27 = vrot.slane %v1717_v25, %v4736_v14  ;;  %v1784_v37 = vrot.slane %v1717_v25, %v4738_v16 }
 0x70c   :  { %v1733_v41 = vadd.f32 %v1732_v38, %v1731_v36 }
 0x70d   :  { %v1725_v42 = vrot.slane %v1724_v39, 2 }
 0x70e   :  { %v1734_v43 = vrot.slane %v1733_v41, 2 }
 0x70f   :  { %v1726_v45 = vadd.f32 %v1725_v42, %v1724_v39 }
 0x710   :  { %v1735_v46 = vadd.f32 %v1734_v43, %v1733_v41 }
 0x711   :  { %v1727_v47 = vrot.slane %v1726_v45, 1 }
 0x712   :  { %v1736_v49 = vrot.slane %v1735_v46, 1 }
 0x713   :  { %v1728_v55 = vadd.f32 %v1727_v47, %v1726_v45 }
 0x714   :  { %v1737_v30 = vadd.f32 %v1736_v49, %v1735_v46 }
 0x715   :  { %v1738_v40 = vmul.f32 0.03125, %v1728_v55 }
 0x716   :  { %v1739_v48 = vmul.f32 0.03125, %v1737_v30 }
 0x717   :  { %v1740_v28 = vsub.f32 %v3773_v63, %v1738_v40  ;;  %v1742_v29 = vsub.f32 %v3775_v2, %v1738_v40  ;;  %v1744_v18 = vsub.f32 %v3777_v19, %v1738_v40  ;;  %v1746_v56 = vsub.f32 %v3779_v24, %v1738_v40 }
 0x718   :  { %v1741_v12 = vsub.f32 %v3774_v11, %v1739_v48  ;;  %v1743_v34 = vsub.f32 %v3776_v3, %v1739_v48  ;;  %v1745_v44 = vsub.f32 %v3778_v20, %v1739_v48  ;;  %v1747_v50 = vsub.f32 %v3780_v26, %v1739_v48  ;;  %v1719_v26 = vld [vmem:[#allocation17 + $0x2] sm:$0x3] }
 0x719   :  { %v1748_v32 = vmul.f32 %v1740_v28, %v1740_v28  ;;  %v1750_v33 = vmul.f32 %v1742_v29, %v1742_v29  ;;  %v1752_v35 = vmul.f32 %v1744_v18, %v1744_v18  ;;  %v1754_v57 = vmul.f32 %v1746_v56, %v1746_v56 }
 0x71a   :  { %v1749_v6 = vmul.f32 %v1741_v12, %v1741_v12  ;;  %v1751_v7 = vmul.f32 %v1743_v34, %v1743_v34  ;;  %v1753_v10 = vmul.f32 %v1745_v44, %v1745_v44  ;;  %v1755_v54 = vmul.f32 %v1747_v50, %v1747_v50 }
 0x71b   :  { %v1756_v5 = vadd.f32 %v1750_v33, %v1748_v32  ;;  %v1811_v36 = vrot.slane %v1719_v26, %v4736_v14  ;;  %v1787_v38 = vmul.f32 %v1780_v27, %v1740_v28  ;;  %v1789_v39 = vmul.f32 %v1780_v27, %v1742_v29 }
 0x71c   :  { %v1765_v52 = vadd.f32 %v1751_v7, %v1749_v6  ;;  %v1791_v41 = vmul.f32 %v1780_v27, %v1744_v18  ;;  %v1793_v42 = vmul.f32 %v1780_v27, %v1746_v56  ;;  %v1815_v45 = vrot.slane %v1719_v26, %v4738_v16 }
 0x71d   :  { %v1757_v8 = vadd.f32 %v1756_v5, %v1752_v35  ;;  %v1788_v40 = vmul.f32 %v1784_v37, %v1741_v12  ;;  %v1790_v48 = vmul.f32 %v1784_v37, %v1743_v34  ;;  %v1792_v32 = vmul.f32 %v1784_v37, %v1745_v44 }
 0x71e   :  { %v1766_v59 = vadd.f32 %v1765_v52, %v1753_v10  ;;  %v1794_v33 = vmul.f32 %v1784_v37, %v1747_v50 }
 0x71f   :  { %v1758_v53 = vadd.f32 %v1757_v8, %v1754_v57 }
 0x720   :  { %v1767_v62 = vadd.f32 %v1766_v59, %v1755_v54 }
 0x721   :  { %v1759_v61 = vrot.slane %v1758_v53, 4 }
 0x722   :  { %v1768_v2 = vrot.slane %v1767_v62, 4 }
 0x723   :  { %v1760_v63 = vadd.f32 %v1759_v61, %v1758_v53 }
 0x724   :  { %v1769_v11 = vadd.f32 %v1768_v2, %v1767_v62 }
 0x725   :  { %v1761_v58 = vrot.slane %v1760_v63, 2 }
 0x726   :  { %v1770_v31 = vrot.slane %v1769_v11, 2 }
 0x727   :  { %v1762_v3 = vadd.f32 %v1761_v58, %v1760_v63 }
 0x728   :  { %v1771_v15 = vadd.f32 %v1770_v31, %v1769_v11 }
 0x729   :  { %v1763_v9 = vrot.slane %v1762_v3, 1 }
 0x72a   :  { %v1772_v4 = vrot.slane %v1771_v15, 1 }
 0x72b   :  { %v1764_v19 = vadd.f32 %v1763_v9, %v1762_v3 }
 0x72c   :  { %v1773_v21 = vadd.f32 %v1772_v4, %v1771_v15 }
 0x72d   :  { %v1774_v20 = vmul.f32 0.03125, %v1764_v19 }
 0x72e   :  { %v1775_v23 = vmul.f32 0.03125, %v1773_v21 }
 0x72f   :  { %v1795_v22 = vadd.f32 1e-05, %v1774_v20 }
 0x730   :  { %v1796_v24 = vadd.f32 1e-05, %v1775_v23 }
 0x731   :  { %3892 = vrsqrt.f32 %v1795_v22 }
 0x732   :  { %3894 = vrsqrt.f32 %v1796_v24 }
 0x73b   :  { %v3893_v43 = vpop.eup %3892 }
 0x73c   :  { %v1799_v46 = vmul.f32 %v3893_v43, %v1787_v38  ;;  %v1801_v47 = vmul.f32 %v3893_v43, %v1789_v39  ;;  %v1803_v49 = vmul.f32 %v3893_v43, %v1791_v41  ;;  %v1805_v55 = vmul.f32 %v3893_v43, %v1793_v42  ;;  %v3895_v30 = vpop.eup %3894 }
 0x73d   :  { %v1800_v28 = vmul.f32 %v3895_v30, %v1788_v40  ;;  %v1802_v29 = vmul.f32 %v3895_v30, %v1790_v48  ;;  %v1804_v18 = vmul.f32 %v3895_v30, %v1792_v32  ;;  %v1806_v56 = vmul.f32 %v3895_v30, %v1794_v33 }
 0x73e   :  { %v1818_v35 = vadd.f32 %v1811_v36, %v1799_v46  ;;  %v1820_v5 = vadd.f32 %v1811_v36, %v1801_v47  ;;  %v1822_v6 = vadd.f32 %v1811_v36, %v1803_v49  ;;  %v1824_v7 = vadd.f32 %v1811_v36, %v1805_v55 }
 0x73f   :  { %v1825_v53 = vadd.f32 %v1815_v45, %v1806_v56  ;;  %v1819_v54 = vadd.f32 %v1815_v45, %v1800_v28  ;;  %v4828_v59 = vadd.f32 %v1815_v45, %v1802_v29  ;;  %v4830_v12 = vadd.f32 %v1815_v45, %v1804_v18 }
 0x740   :  { %v1826_v57 = vsub.f32 0.0, %v1818_v35  ;;  %v1827_v8 = vsub.f32 0.0, %v1820_v5  ;;  %v1828_v10 = vsub.f32 0.0, %v1822_v6  ;;  %v1829_v52 = vsub.f32 0.0, %v1824_v7 }
 0x741   :  { %v1857_v62 = vmin.f32 %v1825_v53, 20.0  ;;  %v1854_v63 = vmin.f32 %v1819_v54, 20.0  ;;  %v1855_v2 = vmin.f32 %v4828_v59, 20.0  ;;  %v1856_v11 = vmin.f32 %v4830_v12, 20.0 }
 0x742   :  { %v1830_v34 = vmul.f32 1.442695, %v1826_v57  ;;  %v1832_v44 = vmul.f32 1.442695, %v1827_v8  ;;  %v1834_v50 = vmul.f32 1.442695, %v1828_v10 }
 0x743   :  { %v1836_v61 = vmul.f32 1.442695, %v1829_v52  ;;  %v1864_v58 = vmul.f32 1.442695, %v1857_v62  ;;  %v1858_v3 = vmul.f32 1.442695, %v1854_v63 }
 0x744   :  { %3896 = vpow2.f32 %v1830_v34  ;;  %v1860_v31 = vmul.f32 1.442695, %v1855_v2  ;;  %v1862_v9 = vmul.f32 1.442695, %v1856_v11  ;;  %vm1853_vm9 = vcmp.gt.f32.partialorder %v1825_v53, 20.0  ;;  %v2011_v34 = vld [vmem:[#allocation11 + $0x418] sm:$0xff] }
 0x745   :  { %3898 = vpow2.f32 %v1832_v44  ;;  %vm1850_vm10 = vcmp.gt.f32.partialorder %v1819_v54, 20.0  ;;  %vm1851_vm11 = vcmp.gt.f32.partialorder %v4828_v59, 20.0  ;;  %vm1852_vm12 = vcmp.gt.f32.partialorder %v4830_v12, 20.0  ;;  %v2012_v62 = vld [vmem:[#allocation11 + $0x420] sm:$0xff]  ;;  %v2014_v11 = vld [vmem:[#allocation11 + $0x430] sm:$0xff] }
 0x746   :  { %3900 = vpow2.f32 %v1834_v50  ;;  %v2015_v50 = vld [vmem:[#allocation11 + $0x438] sm:$0xff] }
 0x747   :  { %3902 = vpow2.f32 %v1836_v61  ;;  %v2008_v61 = vld [vmem:[#allocation11 + $0x400] sm:$0xff]  ;;  %v3633_v63 = vpack.c.bf16 %v2015_v50, %v2011_v34  ;;  %v2053_v34 = vld [vmem:[#allocation11 + $0x568] sm:$0xff]  ;;  %v2055_v50 = vld [vmem:[#allocation11 + $0x578] sm:$0xff] }
 0x748   :  { %3904 = vpow2.f32 %v1864_v58  ;;  %v3603_v2 = vpack.c.bf16 %v2012_v62, %v2008_v61  ;;  %v2010_v58 = vld [vmem:[#allocation11 + $0x410] sm:$0xff] }
 0x749   :  { %3906 = vpow2.f32 %v1858_v3  ;;  %v3635_v3 = vpack.c.bf16 %v2014_v11, %v2010_v58  ;;  %3634 = vmatprep.subr.bf16.mxu0 %v3633_v63  ;;  %v2052_v58 = vld [vmem:[#allocation11 + $0x560] sm:$0xff]  ;;  %v2050_v11 = vld [vmem:[#allocation11 + $0x550] sm:$0xff] }
 0x74a   :  { %3908 = vpow2.f32 %v1860_v31  ;;  %v2017_v31 = vld [vmem:[#allocation11 + $0x448] sm:$0xff] }
 0x74b   :  { %3910 = vpow2.f32 %v1862_v9  ;;  %v2021_v9 = vld [vmem:[#allocation11 + $0x468] sm:$0xff]  ;;  %3636 = vmatpush1.bf16.msra.mxu0 %v3635_v3 }
 0x74e   :  { %v3897_v15 = vpop.eup %3896 }
 0x74f   :  { %v3899_v19 = vpop.eup %3898  ;;  %v1838_v36 = vadd.f32 1.0, %v3897_v15  ;;  %v3605_v15 = vpack.c.bf16 %v2021_v9, %v2017_v31  ;;  %v2054_v31 = vld [vmem:[#allocation11 + $0x570] sm:$0xff]  ;;  %v2057_v9 = vld [vmem:[#allocation11 + $0x588] sm:$0xff] }
 0x750   :  { %v3901_v4 = vpop.eup %3900  ;;  %v1839_v38 = vadd.f32 1.0, %v3899_v19  ;;  %v2023_v19 = vld [vmem:[#allocation11 + $0x478] sm:$0xff] }
 0x751   :  { %v3903_v20 = vpop.eup %3902  ;;  %v1840_v41 = vadd.f32 1.0, %v3901_v4  ;;  %v2016_v4 = vld [vmem:[#allocation11 + $0x440] sm:$0xff] }
 0x752   :  { %v3905_v21 = vpop.eup %3904  ;;  %v1841_v22 = vadd.f32 1.0, %v3903_v20  ;;  %v2020_v20 = vld [vmem:[#allocation11 + $0x460] sm:$0xff] }
 0x753   :  { %v3907_v23 = vpop.eup %3906  ;;  %v1869_v24 = vadd.f32 1.0, %v3905_v21 }
 0x754   :  { %v3909_v25 = vpop.eup %3908  ;;  %3912 = vrcp.f32 %v1841_v22  ;;  %v1866_v26 = vadd.f32 1.0, %v3907_v23  ;;  %v3607_v22 = vpack.c.bf16 %v2020_v20, %v2016_v4  ;;  %v2018_v23 = vld [vmem:[#allocation11 + $0x450] sm:$0xff]  ;;  %v3655_v20 = vpack.c.bf16 %v2054_v31, %v2050_v11 }
 0x755   :  { %v3911_v27 = vpop.eup %3910  ;;  %3914 = vlog2.f32 %v1869_v24  ;;  %v1867_v37 = vadd.f32 1.0, %v3909_v25  ;;  %v2022_v24 = vld [vmem:[#allocation11 + $0x470] sm:$0xff]  ;;  %v2025_v25 = vld [vmem:[#allocation11 + $0x488] sm:$0xff] }
 0x756   :  { %3916 = vlog2.f32 %v1866_v26  ;;  %v1868_v39 = vadd.f32 1.0, %v3911_v27  ;;  %v3639_v26 = vpack.c.bf16 %v2022_v24, %v2018_v23  ;;  %v2029_v27 = vld [vmem:[#allocation11 + $0x4a8] sm:$0xff]  ;;  %v2060_v23 = vld [vmem:[#allocation11 + $0x5a0] sm:$0xff]  ;;  %v2058_v24 = vld [vmem:[#allocation11 + $0x590] sm:$0xff] }
 0x757   :  { %3918 = vlog2.f32 %v1867_v37  ;;  %v2031_v37 = vld [vmem:[#allocation11 + $0x4b8] sm:$0xff] }
 0x758   :  { %3920 = vlog2.f32 %v1868_v39 }
 0x759   :  { %3922 = vrcp.f32 %v1838_v36  ;;  %v2027_v36 = vld [vmem:[#allocation11 + $0x498] sm:$0xff] }
 0x75a   :  { %3924 = vrcp.f32 %v1839_v38  ;;  %v3609_v38 = vpack.c.bf16 %v2029_v27, %v2025_v25  ;;  %v3641_v39 = vpack.c.bf16 %v2031_v37, %v2027_v36  ;;  %v2065_v27 = vld [vmem:[#allocation11 + $0x5c8] sm:$0xff]  ;;  %v2067_v37 = vld [vmem:[#allocation11 + $0x5d8] sm:$0xff] }
 0x75b   :  { %3926 = vrcp.f32 %v1840_v41  ;;  %v2024_v41 = vld [vmem:[#allocation11 + $0x480] sm:$0xff]  ;;  %v2069_v36 = vld [vmem:[#allocation11 + $0x5e8] sm:$0xff] }
 0x75e   :  { %v3913_v42 = vpop.eup %3912 }
 0x75f   :  { %v3915_v43 = vpop.eup %3914 }
 0x760   :  { %v3917_v45 = vpop.eup %3916  ;;  %v1877_v46 = vmul.f32 0.6931472, %v3915_v43  ;;  %v2026_v43 = vld [vmem:[#allocation11 + $0x490] sm:$0xff] }
 0x761   :  { %v3919_v47 = vpop.eup %3918  ;;  %v1871_v49 = vmul.f32 0.6931472, %v3917_v45 }
 0x762   :  { %v3921_v55 = vpop.eup %3920  ;;  %v1873_v30 = vmul.f32 0.6931472, %v3919_v47  ;;  %v1881_v40 = vsel %vm1853_vm9, %v1825_v53, %v1877_v46  ;;  %v2030_v46 = vld [vmem:[#allocation11 + $0x4b0] sm:$0xff]  ;;  %v2033_v47 = vld [vmem:[#allocation11 + $0x4c8] sm:$0xff] }
 0x763   :  { %v3923_v48 = vpop.eup %3922  ;;  %v1878_v32 = vsel %vm1850_vm10, %v1819_v54, %v1871_v49  ;;  %v1875_v33 = vmul.f32 0.6931472, %v3921_v55  ;;  %v1885_v35 = vmul.f32 %v3913_v42, %v1881_v40  ;;  %v2028_v42 = vld [vmem:[#allocation11 + $0x4a0] sm:$0xff]  ;;  %v2037_v49 = vld [vmem:[#allocation11 + $0x4e8] sm:$0xff]  ;;  %v3643_v55 = vpack.c.bf16 %v2030_v46, %v2026_v43  ;;  %v2035_v40 = vld [vmem:[#allocation11 + $0x4d8] sm:$0xff] }
 0x764   :  { %v3925_v5 = vpop.eup %3924  ;;  %v1879_v6 = vsel %vm1851_vm11, %v4828_v59, %v1873_v30  ;;  %v1882_v7 = vmul.f32 %v3923_v48, %v1878_v32  ;;  %v2009_v59 = vld [vmem:[#allocation11 + $0x408] sm:$0xff]  ;;  %v3611_v45 = vpack.c.bf16 %v2028_v42, %v2024_v41  ;;  %v3613_v30 = vpack.c.bf16 %v2037_v49, %v2033_v47  ;;  %v2039_v48 = vld [vmem:[#allocation11 + $0x4f8] sm:$0xff]  ;;  %v2032_v32 = vld [vmem:[#allocation11 + $0x4c0] sm:$0xff] }
 0x765   :  { %v3927_v28 = vpop.eup %3926  ;;  %v1883_v29 = vmul.f32 %v3925_v5, %v1879_v6  ;;  %v1880_v18 = vsel %vm1852_vm12, %v4830_v12, %v1875_v33  ;;  %v1889_v8 = vmul.f32 %v4757_v17, %v1885_v35  ;;  %v2013_v12 = vld [vmem:[#allocation11 + $0x428] sm:$0xff]  ;;  %v3645_v33 = vpack.c.bf16 %v2039_v48, %v2035_v40  ;;  %v2036_v35 = vld [vmem:[#allocation11 + $0x4e0] sm:$0xff]  ;;  %v2034_v5 = vld [vmem:[#allocation11 + $0x4d0] sm:$0xff] }
 0x766   :  { %v1886_v56 = vmul.f32 %v4757_v17, %v1882_v7  ;;  %v1884_v57 = vmul.f32 %v3927_v28, %v1880_v18  ;;  %v3601_v44 = vpack.c.bf16 %v2013_v12, %v2009_v59  ;;  %v2038_v6 = vld [vmem:[#allocation11 + $0x4f0] sm:$0xff]  ;;  %v3615_v7 = vpack.c.bf16 %v2036_v35, %v2032_v32  ;;  %v2041_v28 = vld [vmem:[#allocation11 + $0x508] sm:$0xff]  ;;  %v2043_v18 = vld [vmem:[#allocation11 + $0x518] sm:$0xff] }
 0x767   :  { %v1887_v10 = vmul.f32 %v4757_v17, %v1883_v29  ;;  %v2045_v29 = vld [vmem:[#allocation11 + $0x528] sm:$0xff]  ;;  %v2046_v59 = vld [vmem:[#allocation11 + $0x530] sm:$0xff]  ;;  %v3629_v42 = vpack.c.bf16 %v2069_v36, %v2065_v27  ;;  %v2064_v43 = vld [vmem:[#allocation11 + $0x5c0] sm:$0xff] }
 0x768   :  { %v1888_v52 = vmul.f32 %v4757_v17, %v1884_v57  ;;  %v3617_v57 = vpack.c.bf16 %v2045_v29, %v2041_v28  ;;  %v2049_v12 = vld [vmem:[#allocation11 + $0x548] sm:$0xff]  ;;  %v2066_v47 = vld [vmem:[#allocation11 + $0x5d0] sm:$0xff]  ;;  %v2218_v48 = vld [vmem:[#allocation13 + $0x218] sm:$0xff] }
 0x769   :  { %v3596_v53 = vpack.c.bf16 %v1887_v10, %v1886_v56  ;;  %v3647_v56 = vpack.c.bf16 %v2038_v6, %v2034_v5  ;;  %v2040_v10 = vld [vmem:[#allocation11 + $0x500] sm:$0xff]  ;;  %v3621_v63 = vpack.c.bf16 %v2053_v34, %v2049_v12  ;;  %v2070_v49 = vld [vmem:[#allocation11 + $0x5f0] sm:$0xff]  ;;  %v2216_v40 = vld [vmem:[#allocation13 + $0x208] sm:$0xff] }
 0x76a   :  { %v3599_v54 = vpack.c.bf16 %v1889_v8, %v1888_v52  ;;  %v2047_v8 = vld [vmem:[#allocation11 + $0x538] sm:$0xff]  ;;  %v2044_v52 = vld [vmem:[#allocation11 + $0x520] sm:$0xff]  ;;  %v3665_v32 = vpack.c.bf16 %v2218_v48, %v2216_v40  ;;  %v2221_v27 = vld [vmem:[#allocation13 + $0x230] sm:$0xff] }
 0x76b   :  { %3597 = vmatpush3.bf16.msra.mxu1 %v3596_v53  ;;  %v3649_v53 = vpack.c.bf16 %v2047_v8, %v2043_v18  ;;  %v3619_v61 = vpack.c.bf16 %v2044_v52, %v2040_v10  ;;  %v2224_v36 = vld [vmem:[#allocation13 + $0x248] sm:$0xff]  ;;  %v2234_v40 = vld [vmem:[#allocation13 + $0x298] sm:$0xff] }
 0x76c   :  { %3598 = vmatprep.subr.bf16.mxu1 %v4342_v0 }
 0x76f   :  { %3600 = vmatpush3.bf16.msra.mxu1 %v3599_v54  ;;  %v2042_v54 = vld [vmem:[#allocation11 + $0x510] sm:$0xff] }
 0x770   :  { %3602 = vmatprep.subr.bf16.mxu1 %v3601_v44  ;;  %v2051_v44 = vld [vmem:[#allocation11 + $0x558] sm:$0xff]  ;;  %v3651_v62 = vpack.c.bf16 %v2046_v59, %v2042_v54 }
 0x771   :  { %v3653_v3 = vpack.c.bf16 %v2055_v50, %v2051_v44  ;;  %v3146_v50 = vld [vmem:[#allocation19 + $0x1] ss:$0 sm:$0xff] }
 0x772   :  { %3285 = vmatmul.mubr.msk.f32.vlgmr.msra.gmra.mrb[18].mxu1 %vm1068_vm7, %v4770_v60  ;;  %v2019_v60 = vld [vmem:[#allocation11 + $0x458] sm:$0xff] }
 0x773   :  { %2136 = vmatprep.mubr.f32.mxu1 %v4344_v1  ;;  %3604 = vmatpush1.bf16.msra.mxu1 %v3603_v2  ;;  %v3637_v21 = vpack.c.bf16 %v2023_v19, %v2019_v60  ;;  %v2048_v2 = vld [vmem:[#allocation11 + $0x540] sm:$0xff]  ;;  %v2061_v60 = vld [vmem:[#allocation11 + $0x5a8] sm:$0xff]  ;;  %v2063_v19 = vld [vmem:[#allocation11 + $0x5b8] sm:$0xff] }
 0x774   :  { %3606 = vmatprep.subr.bf16.mxu1 %v3605_v15  ;;  %v2059_v15 = vld [vmem:[#allocation11 + $0x598] sm:$0xff]  ;;  %v3623_v4 = vpack.c.bf16 %v2052_v58, %v2048_v2 }
 0x775   :  { %3638 = vmatprep.subr.bf16.mxu0 %v3637_v21  ;;  %v3625_v21 = vpack.c.bf16 %v2061_v60, %v2057_v9  ;;  %v3657_v25 = vpack.c.bf16 %v2063_v19, %v2059_v15  ;;  %v2215_v19 = vld [vmem:[#allocation13 + $0x200] sm:$0xff] }
 0x776   :  { %3640 = vmatpush1.bf16.msra.mxu0 %v3639_v26  ;;  %v2062_v26 = vld [vmem:[#allocation11 + $0x5b0] sm:$0xff] }
 0x777   :  { %3608 = vmatpush1.bf16.msra.mxu1 %v3607_v22  ;;  %3642 = vmatprep.subr.bf16.mxu0 %v3641_v39  ;;  %v2056_v22 = vld [vmem:[#allocation11 + $0x580] sm:$0xff]  ;;  %v3659_v41 = vpack.c.bf16 %v2062_v26, %v2058_v24 }
 0x778   :  { %3610 = vmatprep.subr.bf16.mxu1 %v3609_v38  ;;  %v2071_v38 = vld [vmem:[#allocation11 + $0x5f8] sm:$0xff]  ;;  %v3627_v39 = vpack.c.bf16 %v2060_v23, %v2056_v22 }
 0x779   :  { %v3661_v46 = vpack.c.bf16 %v2071_v38, %v2067_v37  ;;  %v2222_v22 = vld [vmem:[#allocation13 + $0x238] sm:$0xff] }
 0x77a   :  { %3644 = vmatpush1.bf16.msra.mxu0 %v3643_v55  ;;  %v2226_v37 = vld [vmem:[#allocation13 + $0x258] sm:$0xff] }
 0x77b   :  { %3612 = vmatpush1.bf16.msra.mxu1 %v3611_v45  ;;  %3646 = vmatprep.subr.bf16.mxu0 %v3645_v33  ;;  %v2068_v45 = vld [vmem:[#allocation11 + $0x5e0] sm:$0xff] }
 0x77c   :  { %3614 = vmatprep.subr.bf16.mxu1 %v3613_v30  ;;  %v3631_v55 = vpack.c.bf16 %v2068_v45, %v2064_v43  ;;  %v3663_v30 = vpack.c.bf16 %v2070_v49, %v2066_v47  ;;  %v2228_v43 = vld [vmem:[#allocation13 + $0x268] sm:$0xff]  ;;  %v2230_v45 = vld [vmem:[#allocation13 + $0x278] sm:$0xff]  ;;  %v2227_v49 = vld [vmem:[#allocation13 + $0x260] sm:$0xff] }
 0x77d   :  { %v3677_v47 = vpack.c.bf16 %v2230_v45, %v2228_v43 }
 0x77e   :  { %3648 = vmatpush1.bf16.msra.mxu0 %v3647_v56 }
 0x77f   :  { %3616 = vmatpush1.bf16.msra.mxu1 %v3615_v7  ;;  %3650 = vmatprep.subr.bf16.mxu0 %v3649_v53 }
 0x780   :  { %3618 = vmatprep.subr.bf16.mxu1 %v3617_v57 }
 0x782   :  { %3652 = vmatpush1.bf16.msra.mxu0 %v3651_v62 }
 0x783   :  { %3620 = vmatpush1.bf16.msra.mxu1 %v3619_v61  ;;  %3654 = vmatprep.subr.bf16.mxu0 %v3653_v3 }
 0x784   :  { %3622 = vmatprep.subr.bf16.mxu1 %v3621_v63  ;;  %v3147_v63 = vld [vmem:[#allocation20 + $0x1] ss:$0 sm:$0xff] }
 0x786   :  { %3656 = vmatpush1.bf16.msra.mxu0 %v3655_v20 }
 0x787   :  { %3624 = vmatpush1.bf16.msra.mxu1 %v3623_v4  ;;  %3658 = vmatprep.subr.bf16.mxu0 %v3657_v25  ;;  %v2217_v4 = vld [vmem:[#allocation13 + $0x210] sm:$0xff] }
 0x788   :  { %3626 = vmatprep.subr.bf16.mxu1 %v3625_v21  ;;  %v2220_v21 = vld [vmem:[#allocation13 + $0x228] sm:$0xff]  ;;  %v3667_v24 = vpack.c.bf16 %v2217_v4, %v2215_v19  ;;  %v3991_v19 = vld [vmem:[%s5040_s7 + $0x10] sm:$0xff] }
 0x789   :  { %v3669_v26 = vpack.c.bf16 %v2222_v22, %v2220_v21  ;;  %v3992_v4 = vld [vmem:[%s5041_s27] sm:$0xff]  ;;  %v3995_v21 = vld [vmem:[%s5041_s27 + $0x18] sm:$0xff]  ;;  %v2248_v22 = vld [vmem:[#allocation14 + $0x4] sm:$0x3] }
 0x78a   :  { %3660 = vmatpush1.bf16.msra.mxu0 %v3659_v41  ;;  %v2223_v41 = vld [vmem:[#allocation13 + $0x240] sm:$0xff] }
 0x78b   :  { %3628 = vmatpush1.bf16.msra.mxu1 %v3627_v39  ;;  %3662 = vmatprep.subr.bf16.mxu0 %v3661_v46  ;;  %v3673_v39 = vpack.c.bf16 %v2226_v37, %v2224_v36 }
 0x78c   :  { %3630 = vmatprep.subr.bf16.mxu1 %v3629_v42  ;;  %v2225_v42 = vld [vmem:[#allocation13 + $0x250] sm:$0xff] }
 0x78d   :  { %v3675_v46 = vpack.c.bf16 %v2225_v42, %v2223_v41 }
 0x78e   :  { %3664 = vmatpush1.bf16.msra.mxu0 %v3663_v30  ;;  %v2232_v30 = vld [vmem:[#allocation13 + $0x288] sm:$0xff] }
 0x78f   :  { %3632 = vmatpush1.bf16.msra.mxu1 %v3631_v55  ;;  %3697 = vmatprep.subr.bf16.mxu0 %v4342_v0  ;;  %v2229_v55 = vld [vmem:[#allocation13 + $0x270] sm:$0xff] }
 0x790   :  { %3666 = vmatprep.subr.bf16.mxu1 %v3665_v32  ;;  %v3679_v48 = vpack.c.bf16 %v2229_v55, %v2227_v49  ;;  %v3681_v32 = vpack.c.bf16 %v2234_v40, %v2232_v30 }
 0x845   :  { %v1956_v33 = vpop.f32.mrb[18].mxu1 }
 0x846   :  { %v1964_v35 = vrot.slane %v1956_v33, 4  ;;  %v3286_v5 = vpop.f32.mrb[19].mxu1 }
 0x847   :  { %v2236_v5 = vld [vmem:[#allocation13 + $0x2a8] sm:$0xff] }
 0x848   :  { %v1965_v6 = vadd.f32 %v1964_v35, %v1956_v33  ;;  %v2233_v35 = vld [vmem:[#allocation13 + $0x290] sm:$0xff] }
 0x84a   :  { %v1966_v7 = vrot.slane %v1965_v6, 2 }
 0x84c   :  { %v1967_v28 = vadd.f32 %v1966_v7, %v1965_v6  ;;  %v2238_v6 = vld [vmem:[#allocation13 + $0x2b8] sm:$0xff] }
 0x84e   :  { %v1968_v29 = vrot.slane %v1967_v28, 1 }
 0x850   :  { %v1969_v18 = vadd.f32 %v1968_v29, %v1967_v28  ;;  %v3685_v28 = vpack.c.bf16 %v2238_v6, %v2236_v5  ;;  %v2235_v29 = vld [vmem:[#allocation13 + $0x2a0] sm:$0xff] }
 0x852   :  { %v1970_v56 = vmul.f32 0.125, %v1969_v18  ;;  %v2237_v18 = vld [vmem:[#allocation13 + $0x2b0] sm:$0xff] }
 0x854   :  { %v1971_v57 = vsub.f32 %v1956_v33, %v1970_v56  ;;  %v2231_v33 = vld [vmem:[#allocation13 + $0x280] sm:$0xff]  ;;  %v2240_v56 = vld [vmem:[#allocation13 + $0x2c8] sm:$0xff] }
 0x855   :  { %v3683_v7 = vpack.c.bf16 %v2233_v35, %v2231_v33 }
 0x856   :  { %v1972_v8 = vmul.f32 %v1971_v57, %v1971_v57  ;;  %v1986_v61 = vmul.f32 %v3146_v50, %v1971_v57  ;;  %v2242_v57 = vld [vmem:[#allocation13 + $0x2d8] sm:$0xff]  ;;  %v2245_v50 = vld [vmem:[#allocation13 + $0x2f0] sm:$0xff] }
 0x858   :  { %v1973_v10 = vrot.slane %v1972_v8, 4 }
 0x85a   :  { %v1974_v52 = vadd.f32 %v1973_v10, %v1972_v8  ;;  %v3687_v8 = vpack.c.bf16 %v2237_v18, %v2235_v29  ;;  %v3689_v10 = vpack.c.bf16 %v2242_v57, %v2240_v56 }
 0x85c   :  { %v1975_v53 = vrot.slane %v1974_v52, 2 }
 0x85e   :  { %v1976_v54 = vadd.f32 %v1975_v53, %v1974_v52  ;;  %v2239_v52 = vld [vmem:[#allocation13 + $0x2c0] sm:$0xff]  ;;  %v2241_v53 = vld [vmem:[#allocation13 + $0x2d0] sm:$0xff] }
 0x860   :  { %v1977_v59 = vrot.slane %v1976_v54, 1 }
 0x862   :  { %v1978_v12 = vadd.f32 %v1977_v59, %v1976_v54  ;;  %v2244_v54 = vld [vmem:[#allocation13 + $0x2e8] sm:$0xff]  ;;  %v2246_v59 = vld [vmem:[#allocation13 + $0x2f8] sm:$0xff] }
 0x864   :  { %v1979_v34 = vmul.f32 0.125, %v1978_v12  ;;  %v3691_v12 = vpack.c.bf16 %v2241_v53, %v2239_v52 }
 0x866   :  { %v1987_v44 = vadd.f32 1e-05, %v1979_v34  ;;  %v3693_v34 = vpack.c.bf16 %v2246_v59, %v2244_v54 }
 0x868   :  { %3928 = vrsqrt.f32 %v1987_v44  ;;  %v2243_v44 = vld [vmem:[#allocation13 + $0x2e0] sm:$0xff] }
 0x872   :  { %v3929_v62 = vpop.eup %3928 }
 0x873   :  { %v1989_v2 = vmul.f32 %v3929_v62, %v1986_v61  ;;  %v3695_v61 = vpack.c.bf16 %v2245_v50, %v2243_v44  ;;  %v3985_v62 = vld [vmem:[#allocation2] sm:$0xff] }
 0x875   :  { %v1996_v58 = vadd.f32 %v3147_v63, %v1989_v2  ;;  %v3986_v63 = vld [vmem:[#allocation2 + $0x8] sm:$0xff]  ;;  %v3987_v2 = vld [vmem:[#allocation2 + $0x10] sm:$0xff] }
 0x877   :  { %v1997_v11 = vadd.f32 %v1996_v58, %v4778_v13  ;;  %v2219_v13 = vld [vmem:[#allocation13 + $0x220] sm:$0xff] }
 0x878   :  { %v3671_v38 = vpack.c.bf16 %v2221_v27, %v2219_v13  ;;  %v3988_v58 = vld [vmem:[#allocation2 + $0x18] sm:$0xff]  ;;  %v2257_v13 = vrot.slane %v2248_v22, %v4738_v16 }
 0x879   :  { %v1999_v3 = vmin.f32 %v1997_v11, 20.0  ;;  %vm1998_vm13 = vcmp.gt.f32.partialorder %v1997_v11, 20.0 }
 0x87b   :  { %v2000_v31 = vmul.f32 1.442695, %v1999_v3 }
 0x87d   :  { %3930 = vpow2.f32 %v2000_v31 }
 0x887   :  { %v3931_v9 = vpop.eup %3930 }
 0x888   :  { %v2002_v60 = vadd.f32 1.0, %v3931_v9 }
 0x88a   :  { %3932 = vlog2.f32 %v2002_v60  ;;  %v3989_v60 = vld [vmem:[%s5040_s7] sm:$0xff] }
 0x894   :  { %v3933_v15 = vpop.eup %3932 }
 0x895   :  { %v2004_v20 = vmul.f32 0.6931472, %v3933_v15  ;;  %v3990_v15 = vld [vmem:[%s5040_s7 + $0x8] sm:$0xff] }
 0x897   :  { %v2005_v23 = vsel %vm1998_vm13, %v1997_v11, %v2004_v20  ;;  %v3993_v20 = vld [vmem:[%s5041_s27 + $0x8] sm:$0xff] }
 0x898   :  { %v4849_v25 = vmul.f32 %v4757_v17, %v2005_v23 }
 0x89a   :  { %2137 = vmatmul.mubr.f32.vlgmr.msra.gmra.mrb[20].mxu1 %v4849_v25  ;;  %2208 = vmatmul.mubr.f32.vlgmr.msra.gmra.mrb[22].mxu0 %v4849_v25 }
 0x89b   :  { %3668 = vmatpush1.bf16.msra.mxu1 %v3667_v24  ;;  %2324 = vmatprep.mubr.f32.mxu1 %v4344_v1  ;;  %v2253_v24 = vrot.slane %v2248_v22, %v4736_v14 }
 0x89c   :  { %3670 = vmatprep.subr.bf16.mxu1 %v3669_v26  ;;  %3295 = vmatprep.mubr.msk.f32.mxu0 %vm4343_vm0, %v4344_v1 }
 0x89f   :  { %3672 = vmatpush1.bf16.msra.mxu1 %v3671_v38 }
 0x8a0   :  { %3674 = vmatprep.subr.bf16.mxu1 %v3673_v39 }
 0x8a3   :  { %3676 = vmatpush1.bf16.msra.mxu1 %v3675_v46 }
 0x8a4   :  { %3678 = vmatprep.subr.bf16.mxu1 %v3677_v47 }
 0x8a7   :  { %3680 = vmatpush1.bf16.msra.mxu1 %v3679_v48 }
 0x8a8   :  { %3682 = vmatprep.subr.bf16.mxu1 %v3681_v32 }
 0x8ab   :  { %3684 = vmatpush1.bf16.msra.mxu1 %v3683_v7 }
 0x8ac   :  { %3686 = vmatprep.subr.bf16.mxu1 %v3685_v28 }
 0x8af   :  { %3688 = vmatpush1.bf16.msra.mxu1 %v3687_v8 }
 0x8b0   :  { %3690 = vmatprep.subr.bf16.mxu1 %v3689_v10 }
 0x8b3   :  { %3692 = vmatpush1.bf16.msra.mxu1 %v3691_v12 }
 0x8b4   :  { %3694 = vmatprep.subr.bf16.mxu1 %v3693_v34 }
 0x8b7   :  { %3696 = vmatpush1.bf16.msra.mxu1 %v3695_v61 }
 0x8ba   :  { %2325 = vmatmul.mubr.f32.vlgmr.msra.gmra.mrb[22].mxu1 %v3985_v62 }
 0x8bb   :  { %2330 = vmatprep.mubr.f32.mxu1 %v4344_v1 }
 0x8be   :  { %2331 = vmatmul.mubr.f32.gmra.mrb[24].mxu1 %v3986_v63 }
 0x8bf   :  { %2336 = vmatprep.mubr.f32.mxu1 %v4344_v1 }
 0x8c2   :  { %2337 = vmatmul.mubr.f32.gmra.mrb[26].mxu1 %v3987_v2 }
 0x8c3   :  { %2342 = vmatprep.mubr.f32.mxu1 %v4344_v1 }
 0x8c6   :  { %2343 = vmatmul.mubr.f32.gmra.mrb[28].mxu1 %v3988_v58 }
 0x8c7   :  { %2413 = vmatprep.mubr.f32.mxu1 %v4344_v1 }
 0x96d   :  { %v2138_v11 = vpop.f32.mrb[20].mxu1  ;;  %v2209_v3 = vpop.f32.mrb[22].mxu0 }
 0x96e   :  { %v2140_v31 = vpop.f32.mrb[21].mxu1  ;;  %v2211_v9 = vpop.f32.mrb[23].mxu0 }
 0x96f   :  { %2349 = vmatprep.subr.mxu1 %v2211_v9 }
 0x970   :  { %2350 = vmatpush1.msra.mxu1 %v2209_v3 }
 0x971   :  { %3148 = vmatmul.mubr.msk.f32.vlgmr.msra.gmra.mrb[22].mxu1 %vm684_vm1, %v3989_v60  ;;  %2438 = vmatprep.subr.mxu1 %v2140_v31 }
 0x972   :  { %2439 = vmatpush1.msra.mxu1 %v2138_v11  ;;  %2419 = vmatprep.mubr.f32.mxu1 %v4344_v1 }
 0x973   :  { %3727 = vmatprep.subr.bf16.mxu1 %v4342_v0 }
 0x975   :  { %3149 = vmatmul.mubr.msk.f32.gmra.mrb[24].mxu1 %vm684_vm1, %v3990_v15 }
 0x976   :  { %2425 = vmatprep.mubr.f32.mxu1 %v4344_v1 }
 0x979   :  { %3150 = vmatmul.mubr.msk.f32.gmra.mrb[26].mxu1 %vm684_vm1, %v3991_v19 }
 0x97a   :  { %2431 = vmatprep.mubr.f32.mxu1 %v4344_v1 }
 0x97d   :  { %3151 = vmatmul.mubr.msk.f32.gmra.mrb[28].mxu1 %vm684_vm1, %v4805_v51  ;;  %v3994_v51 = vld [vmem:[%s5041_s27 + $0x10] sm:$0xff] }
 0x97e   :  { %2502 = vmatprep.mubr.f32.mxu1 %v4344_v1 }
 0x981   :  { %3152 = vmatmul.mubr.msk.f32.vlgmr.msra.gmra.mrb[22].mxu1 %vm684_vm1, %v3992_v4 }
 0x982   :  { %2508 = vmatprep.mubr.f32.mxu1 %v4344_v1 }
 0x985   :  { %3153 = vmatmul.mubr.msk.f32.gmra.mrb[24].mxu1 %vm684_vm1, %v3993_v20 }
 0x986   :  { %2514 = vmatprep.mubr.f32.mxu1 %v4344_v1 }
 0x989   :  { %3154 = vmatmul.mubr.msk.f32.gmra.mrb[26].mxu1 %vm684_vm1, %v3994_v51 }
 0x98a   :  { %2520 = vmatprep.mubr.f32.mxu1 %v4344_v1 }
 0x98d   :  { %3155 = vmatmul.mubr.msk.f32.gmra.mrb[28].mxu1 %vm684_vm1, %v3995_v21 }
 0x98e   :  { %3370 = vmatprep.mubr.msk.f32.mxu1 %vm4343_vm0, %v4344_v1 }
 0xa54   :  { %v2504_v23 = vpop.f32.mrb[22].mxu1 }
 0xa55   :  { %v2506_v26 = vpop.f32.mrb[23].mxu1  ;;  %v3781_v36 = vadd.f32 %v2504_v23, %v2253_v24 }
 0xa56   :  { %v3782_v39 = vadd.f32 %v2506_v26, %v2257_v13 }
 0xa58   :  { %v2510_v27 = vpop.f32.mrb[24].mxu1 }
 0xa59   :  { %v3783_v37 = vadd.f32 %v2510_v27, %v2253_v24  ;;  %v2512_v38 = vpop.f32.mrb[25].mxu1 }
 0xa5a   :  { %v3784_v41 = vadd.f32 %v2512_v38, %v2257_v13 }
 0xa5b   :  { %v2539_v42 = vadd.f32 %v3783_v37, %v3781_v36 }
 0xa5c   :  { %v2548_v43 = vadd.f32 %v3784_v41, %v3782_v39  ;;  %v2516_v45 = vpop.f32.mrb[26].mxu1 }
 0xa5d   :  { %v3785_v46 = vadd.f32 %v2516_v45, %v2253_v24  ;;  %v2518_v47 = vpop.f32.mrb[27].mxu1 }
 0xa5e   :  { %v3786_v49 = vadd.f32 %v2518_v47, %v2257_v13 }
 0xa5f   :  { %v2540_v55 = vadd.f32 %v3785_v46, %v2539_v42 }
 0xa60   :  { %v2549_v30 = vadd.f32 %v3786_v49, %v2548_v43  ;;  %v2522_v40 = vpop.f32.mrb[28].mxu1 }
 0xa61   :  { %v3787_v48 = vadd.f32 %v2522_v40, %v2253_v24  ;;  %v2524_v32 = vpop.f32.mrb[29].mxu1  ;;  %v2536_v40 = vld [vmem:[#allocation16 + $0x4] sm:$0x3] }
 0xa62   :  { %v3788_v33 = vadd.f32 %v2524_v32, %v2257_v13  ;;  %v2599_v32 = vrot.slane %v2536_v40, %v4736_v14 }
 0xa63   :  { %v2541_v35 = vadd.f32 %v3787_v48, %v2540_v55 }
 0xa64   :  { %v2550_v5 = vadd.f32 %v3788_v33, %v2549_v30 }
 0xa65   :  { %v2542_v6 = vrot.slane %v2541_v35, 4 }
 0xa66   :  { %v2551_v7 = vrot.slane %v2550_v5, 4 }
 0xa67   :  { %v2543_v28 = vadd.f32 %v2542_v6, %v2541_v35  ;;  %v2603_v35 = vrot.slane %v2536_v40, %v4738_v16 }
 0xa68   :  { %v2552_v29 = vadd.f32 %v2551_v7, %v2550_v5 }
 0xa69   :  { %v2544_v18 = vrot.slane %v2543_v28, 2 }
 0xa6a   :  { %v2553_v56 = vrot.slane %v2552_v29, 2 }
 0xa6b   :  { %v2545_v57 = vadd.f32 %v2544_v18, %v2543_v28 }
 0xa6c   :  { %v2554_v8 = vadd.f32 %v2553_v56, %v2552_v29 }
 0xa6d   :  { %v2546_v10 = vrot.slane %v2545_v57, 1 }
 0xa6e   :  { %v2555_v52 = vrot.slane %v2554_v8, 1 }
 0xa6f   :  { %v2547_v53 = vadd.f32 %v2546_v10, %v2545_v57 }
 0xa70   :  { %v2556_v54 = vadd.f32 %v2555_v52, %v2554_v8 }
 0xa71   :  { %v2557_v59 = vmul.f32 0.03125, %v2547_v53 }
 0xa72   :  { %v2558_v12 = vmul.f32 0.03125, %v2556_v54 }
 0xa73   :  { %v2559_v34 = vsub.f32 %v3781_v36, %v2557_v59  ;;  %v2561_v44 = vsub.f32 %v3783_v37, %v2557_v59  ;;  %v2563_v50 = vsub.f32 %v3785_v46, %v2557_v59  ;;  %v2565_v61 = vsub.f32 %v3787_v48, %v2557_v59  ;;  %v2538_v48 = vld [vmem:[#allocation17 + $0x4] sm:$0x3] }
 0xa74   :  { %v2560_v62 = vsub.f32 %v3782_v39, %v2558_v12  ;;  %v2562_v63 = vsub.f32 %v3784_v41, %v2558_v12  ;;  %v2564_v2 = vsub.f32 %v3786_v49, %v2558_v12  ;;  %v2566_v58 = vsub.f32 %v3788_v33, %v2558_v12 }
 0xa75   :  { %v2567_v11 = vmul.f32 %v2559_v34, %v2559_v34  ;;  %v2569_v3 = vmul.f32 %v2561_v44, %v2561_v44  ;;  %v2571_v31 = vmul.f32 %v2563_v50, %v2563_v50  ;;  %v2573_v19 = vmul.f32 %v2565_v61, %v2565_v61 }
 0xa76   :  { %v2568_v60 = vmul.f32 %v2560_v62, %v2560_v62  ;;  %v2570_v15 = vmul.f32 %v2562_v63, %v2562_v63  ;;  %v2572_v20 = vmul.f32 %v2564_v2, %v2564_v2  ;;  %v2574_v22 = vmul.f32 %v2566_v58, %v2566_v58 }
 0xa77   :  { %v2575_v9 = vadd.f32 %v2569_v3, %v2567_v11  ;;  %v2630_v33 = vrot.slane %v2538_v48, %v4736_v14  ;;  %v2606_v5 = vmul.f32 %v2599_v32, %v2559_v34  ;;  %v2608_v6 = vmul.f32 %v2599_v32, %v2561_v44 }
 0xa78   :  { %v2584_v51 = vadd.f32 %v2570_v15, %v2568_v60  ;;  %v2610_v7 = vmul.f32 %v2599_v32, %v2563_v50  ;;  %v2612_v28 = vmul.f32 %v2599_v32, %v2565_v61  ;;  %v2634_v18 = vrot.slane %v2538_v48, %v4738_v16 }
 0xa79   :  { %v2576_v4 = vadd.f32 %v2575_v9, %v2571_v31  ;;  %v2607_v53 = vmul.f32 %v2603_v35, %v2560_v62  ;;  %v2609_v54 = vmul.f32 %v2603_v35, %v2562_v63  ;;  %v2611_v59 = vmul.f32 %v2603_v35, %v2564_v2 }
 0xa7a   :  { %v2585_v23 = vadd.f32 %v2584_v51, %v2572_v20  ;;  %v2613_v12 = vmul.f32 %v2603_v35, %v2566_v58 }
 0xa7b   :  { %v2577_v21 = vadd.f32 %v2576_v4, %v2573_v19 }
 0xa7c   :  { %v2586_v26 = vadd.f32 %v2585_v23, %v2574_v22 }
 0xa7d   :  { %v2578_v24 = vrot.slane %v2577_v21, 4 }
 0xa7e   :  { %v2587_v27 = vrot.slane %v2586_v26, 4 }
 0xa7f   :  { %v2579_v13 = vadd.f32 %v2578_v24, %v2577_v21 }
 0xa80   :  { %v2588_v37 = vadd.f32 %v2587_v27, %v2586_v26 }
 0xa81   :  { %v2580_v36 = vrot.slane %v2579_v13, 2 }
 0xa82   :  { %v2589_v39 = vrot.slane %v2588_v37, 2 }
 0xa83   :  { %v2581_v38 = vadd.f32 %v2580_v36, %v2579_v13 }
 0xa84   :  { %v2590_v42 = vadd.f32 %v2589_v39, %v2588_v37 }
 0xa85   :  { %v2582_v41 = vrot.slane %v2581_v38, 1 }
 0xa86   :  { %v2591_v45 = vrot.slane %v2590_v42, 1 }
 0xa87   :  { %v2583_v43 = vadd.f32 %v2582_v41, %v2581_v38 }
 0xa88   :  { %v2592_v47 = vadd.f32 %v2591_v45, %v2590_v42 }
 0xa89   :  { %v2593_v46 = vmul.f32 0.03125, %v2583_v43 }
 0xa8a   :  { %v2594_v55 = vmul.f32 0.03125, %v2592_v47 }
 0xa8b   :  { %v2614_v49 = vadd.f32 1e-05, %v2593_v46 }
 0xa8c   :  { %v2615_v30 = vadd.f32 1e-05, %v2594_v55 }
 0xa8d   :  { %3934 = vrsqrt.f32 %v2614_v49 }
 0xa8e   :  { %3936 = vrsqrt.f32 %v2615_v30 }
 0xa97   :  { %v3935_v29 = vpop.eup %3934 }
 0xa98   :  { %v2618_v56 = vmul.f32 %v3935_v29, %v2606_v5  ;;  %v2620_v57 = vmul.f32 %v3935_v29, %v2608_v6  ;;  %v2622_v8 = vmul.f32 %v3935_v29, %v2610_v7  ;;  %v2624_v10 = vmul.f32 %v3935_v29, %v2612_v28  ;;  %v3937_v52 = vpop.eup %3936 }
 0xa99   :  { %v2619_v34 = vmul.f32 %v3937_v52, %v2607_v53  ;;  %v2621_v44 = vmul.f32 %v3937_v52, %v2609_v54  ;;  %v2623_v50 = vmul.f32 %v3937_v52, %v2611_v59  ;;  %v2625_v61 = vmul.f32 %v3937_v52, %v2613_v12 }
 0xa9a   :  { %v2637_v11 = vadd.f32 %v2630_v33, %v2618_v56  ;;  %v2639_v14 = vadd.f32 %v2630_v33, %v2620_v57  ;;  %v2641_v3 = vadd.f32 %v2630_v33, %v2622_v8  ;;  %v2643_v31 = vadd.f32 %v2630_v33, %v2624_v10 }
 0xa9b   :  { %v2644_v19 = vadd.f32 %v2634_v18, %v2625_v61  ;;  %v2638_v4 = vadd.f32 %v2634_v18, %v2619_v34  ;;  %v4906_v20 = vadd.f32 %v2634_v18, %v2621_v44  ;;  %v4908_v62 = vadd.f32 %v2634_v18, %v2623_v50 }
 0xa9c   :  { %v2645_v9 = vsub.f32 0.0, %v2637_v11  ;;  %v2646_v60 = vsub.f32 0.0, %v2639_v14  ;;  %v2647_v16 = vsub.f32 0.0, %v2641_v3  ;;  %v2648_v15 = vsub.f32 0.0, %v2643_v31 }
 0xa9d   :  { %v2676_v21 = vmin.f32 %v2644_v19, 20.0  ;;  %v2673_v22 = vmin.f32 %v2638_v4, 20.0  ;;  %v2674_v23 = vmin.f32 %v4906_v20, 20.0  ;;  %v2675_v26 = vmin.f32 %v4908_v62, 20.0 }
 0xa9e   :  { %v2649_v63 = vmul.f32 1.442695, %v2645_v9  ;;  %v2651_v2 = vmul.f32 1.442695, %v2646_v60  ;;  %v2653_v58 = vmul.f32 1.442695, %v2647_v16 }
 0xa9f   :  { %v2655_v51 = vmul.f32 1.442695, %v2648_v15  ;;  %v2683_v24 = vmul.f32 1.442695, %v2676_v21  ;;  %v2677_v13 = vmul.f32 1.442695, %v2673_v22 }
 0xaa0   :  { %3938 = vpow2.f32 %v2649_v63  ;;  %v2679_v27 = vmul.f32 1.442695, %v2674_v23  ;;  %v2681_v36 = vmul.f32 1.442695, %v2675_v26  ;;  %vm2672_vm14 = vcmp.gt.f32.partialorder %v2644_v19, 20.0  ;;  %v3996_v16 = vld [vmem:[#allocation5] sm:$0xff] }
 0xaa1   :  { %3940 = vpow2.f32 %v2651_v2  ;;  %vm2669_vm15 = vcmp.gt.f32.partialorder %v2638_v4, 20.0  ;;  %vm2670_vm2 = vcmp.gt.f32.partialorder %v4906_v20, 20.0  ;;  %vm2671_vm3 = vcmp.gt.f32.partialorder %v4908_v62, 20.0 }
 0xaa2   :  { %3942 = vpow2.f32 %v2653_v58 }
 0xaa3   :  { %3944 = vpow2.f32 %v2655_v51 }
 0xaa4   :  { %3946 = vpow2.f32 %v2683_v24 }
 0xaa5   :  { %3948 = vpow2.f32 %v2677_v13 }
 0xaa6   :  { %3950 = vpow2.f32 %v2679_v27 }
 0xaa7   :  { %3952 = vpow2.f32 %v2681_v36 }
 0xaaa   :  { %v3939_v37 = vpop.eup %3938 }
 0xaab   :  { %v3941_v38 = vpop.eup %3940  ;;  %v2657_v30 = vadd.f32 1.0, %v3939_v37 }
 0xaac   :  { %v3943_v39 = vpop.eup %3942  ;;  %v2658_v48 = vadd.f32 1.0, %v3941_v38 }
 0xaad   :  { %v3945_v41 = vpop.eup %3944  ;;  %v2659_v33 = vadd.f32 1.0, %v3943_v39  ;;  %v3157_v39 = vld [vmem:[#allocation19 + $0x2] ss:$0 sm:$0xff] }
 0xaae   :  { %v3947_v42 = vpop.eup %3946  ;;  %v2660_v43 = vadd.f32 1.0, %v3945_v41 }
 0xaaf   :  { %v3949_v45 = vpop.eup %3948  ;;  %v2688_v46 = vadd.f32 1.0, %v3947_v42 }
 0xab0   :  { %v3951_v47 = vpop.eup %3950  ;;  %3954 = vrcp.f32 %v2660_v43  ;;  %v2685_v49 = vadd.f32 1.0, %v3949_v45  ;;  %v3158_v43 = vld [vmem:[#allocation20 + $0x2] ss:$0 sm:$0xff] }
 0xab1   :  { %v3953_v55 = vpop.eup %3952  ;;  %3956 = vlog2.f32 %v2688_v46  ;;  %v2686_v40 = vadd.f32 1.0, %v3951_v47 }
 0xab2   :  { %3958 = vlog2.f32 %v2685_v49  ;;  %v2687_v32 = vadd.f32 1.0, %v3953_v55 }
 0xab3   :  { %3960 = vlog2.f32 %v2686_v40 }
 0xab4   :  { %3962 = vlog2.f32 %v2687_v32 }
 0xab5   :  { %3964 = vrcp.f32 %v2657_v30 }
 0xab6   :  { %3966 = vrcp.f32 %v2658_v48 }
 0xab7   :  { %3968 = vrcp.f32 %v2659_v33 }
 0xaba   :  { %v3955_v35 = vpop.eup %3954 }
 0xabb   :  { %v3957_v5 = vpop.eup %3956 }
 0xabc   :  { %v3959_v6 = vpop.eup %3958  ;;  %v2696_v7 = vmul.f32 0.6931472, %v3957_v5  ;;  %v2826_v5 = vld [vmem:[#allocation7] sm:$0xff] }
 0xabd   :  { %v3961_v28 = vpop.eup %3960  ;;  %v2690_v29 = vmul.f32 0.6931472, %v3959_v6  ;;  %v2909_v6 = vld [vmem:[%s5026_s15 + $0x8] sm:$0xff] }
 0xabe   :  { %v3963_v18 = vpop.eup %3962  ;;  %v2692_v56 = vmul.f32 0.6931472, %v3961_v28  ;;  %v2700_v57 = vsel %vm2672_vm14, %v2644_v19, %v2696_v7 }
 0xabf   :  { %v3965_v8 = vpop.eup %3964  ;;  %v2697_v10 = vsel %vm2669_vm15, %v2638_v4, %v2690_v29  ;;  %v2694_v52 = vmul.f32 0.6931472, %v3963_v18  ;;  %v2704_v53 = vmul.f32 %v3955_v35, %v2700_v57  ;;  %v2912_v29 = vld [vmem:[%s5026_s15 + $0x20] sm:$0xff]  ;;  %v2913_v18 = vld [vmem:[%s5026_s15 + $0x28] sm:$0xff]  ;;  %v2914_v57 = vld [vmem:[%s5026_s15 + $0x30] sm:$0xff] }
 0xac0   :  { %v3967_v54 = vpop.eup %3966  ;;  %v2698_v59 = vsel %vm2670_vm2, %v4906_v20, %v2692_v56  ;;  %v2701_v12 = vmul.f32 %v3965_v8, %v2697_v10  ;;  %v3710_v56 = vpack.c.bf16 %v2913_v18, %v2912_v29  ;;  %v2915_v8 = vld [vmem:[%s5026_s15 + $0x38] sm:$0xff] }
 0xac1   :  { %v3969_v11 = vpop.eup %3968  ;;  %v2702_v14 = vmul.f32 %v3967_v54, %v2698_v59  ;;  %v2699_v3 = vsel %vm2671_vm3, %v4908_v62, %v2694_v52  ;;  %v2708_v44 = vmul.f32 %v4757_v17, %v2704_v53  ;;  %v3713_v10 = vpack.c.bf16 %v2915_v8, %v2914_v57  ;;  %v2916_v52 = vld [vmem:[%s5026_s15 + $0x40] sm:$0xff]  ;;  %v2917_v53 = vld [vmem:[%s5026_s15 + $0x48] sm:$0xff]  ;;  %v2918_v59 = vld [vmem:[%s5026_s15 + $0x50] sm:$0xff] }
 0xac2   :  { %v2705_v31 = vmul.f32 %v4757_v17, %v2701_v12  ;;  %v2703_v34 = vmul.f32 %v3969_v11, %v2699_v3  ;;  %v3716_v54 = vpack.c.bf16 %v2917_v53, %v2916_v52  ;;  %v2919_v12 = vld [vmem:[%s5026_s15 + $0x58] sm:$0xff]  ;;  %v2921_v3 = vld [vmem:[%s5026_s15 + $0x68] sm:$0xff] }
 0xac3   :  { %v2706_v50 = vmul.f32 %v4757_v17, %v2702_v14  ;;  %v3719_v11 = vpack.c.bf16 %v2919_v12, %v2918_v59  ;;  %v2920_v14 = vld [vmem:[%s5026_s15 + $0x60] sm:$0xff] }
 0xac4   :  { %v2707_v61 = vmul.f32 %v4757_v17, %v2703_v34  ;;  %v2922_v34 = vld [vmem:[%s5026_s15 + $0x70] sm:$0xff] }
 0xac5   :  { %v3698_v9 = vpack.c.bf16 %v2706_v50, %v2705_v31  ;;  %v3722_v31 = vpack.c.bf16 %v2921_v3, %v2920_v14 }
 0xac6   :  { %v3701_v60 = vpack.c.bf16 %v2708_v44, %v2707_v61  ;;  %v2923_v44 = vld [vmem:[%s5026_s15 + $0x78] sm:$0xff] }
 0xac7   :  { %3699 = vmatpush3.bf16.msra.mxu0 %v3698_v9  ;;  %v3725_v50 = vpack.c.bf16 %v2923_v44, %v2922_v34 }
 0xac8   :  { %3700 = vmatprep.subr.bf16.mxu0 %v4342_v0 }
 0xacb   :  { %3702 = vmatpush3.bf16.msra.mxu0 %v3701_v60 }
 0xacc   :  { %3298 = vmatprep.subr.mxu0 %v4344_v1 }
 0xace   :  { %3296 = vmatmul.mubr.msk.f32.vlgmr.msra.gmra.mrb[24].mxu0 %vm1068_vm7, %v3996_v16 }
 0xacf   :  { %3300 = vmatprep.mubr.msk.f32.mxu0 %vm4343_vm0, %v4344_v1 }
 0xba1   :  { %v2775_v15 = vpop.f32.mrb[24].mxu0 }
 0xba2   :  { %v2783_v19 = vrot.slane %v2775_v15, 4  ;;  %v3297_v4 = vpop.f32.mrb[25].mxu0 }
 0xba4   :  { %v2784_v20 = vadd.f32 %v2783_v19, %v2775_v15 }
 0xba6   :  { %v2785_v62 = vrot.slane %v2784_v20, 2 }
 0xba8   :  { %v2786_v63 = vadd.f32 %v2785_v62, %v2784_v20 }
 0xbaa   :  { %v2787_v2 = vrot.slane %v2786_v63, 1 }
 0xbac   :  { %v2788_v58 = vadd.f32 %v2787_v2, %v2786_v63  ;;  %v3009_v63 = vld [vmem:[#allocation22] sm:$0xff]  ;;  %v3010_v2 = vld [vmem:[#allocation22 + $0x8] sm:$0xff] }
 0xbae   :  { %v2789_v51 = vmul.f32 0.125, %v2788_v58  ;;  %v3728_v58 = vpack.c.bf16 %v3010_v2, %v3009_v63 }
 0xbb0   :  { %v2790_v21 = vsub.f32 %v2775_v15, %v2789_v51  ;;  %3729 = vmatpush3.bf16.msra.mxu1 %v3728_v58  ;;  %v3011_v51 = vld [vmem:[#allocation22 + $0x10] sm:$0xff] }
 0xbb1   :  { %3730 = vmatprep.subr.bf16.mxu1 %v4342_v0 }
 0xbb2   :  { %v2791_v22 = vmul.f32 %v2790_v21, %v2790_v21  ;;  %v2805_v41 = vmul.f32 %v3157_v39, %v2790_v21  ;;  %v3012_v21 = vld [vmem:[#allocation22 + $0x18] sm:$0xff] }
 0xbb4   :  { %v2792_v23 = vrot.slane %v2791_v22, 4 }
 0xbb6   :  { %v2793_v24 = vadd.f32 %v2792_v23, %v2791_v22  ;;  %v3731_v22 = vpack.c.bf16 %v3012_v21, %v3011_v51  ;;  %v3013_v23 = vld [vmem:[#allocation22 + $0x20] sm:$0xff] }
 0xbb8   :  { %v2794_v26 = vrot.slane %v2793_v24, 2  ;;  %3732 = vmatpush3.bf16.msra.mxu1 %v3731_v22 }
 0xbb9   :  { %3733 = vmatprep.subr.bf16.mxu1 %v4342_v0 }
 0xbba   :  { %v2795_v13 = vadd.f32 %v2794_v26, %v2793_v24  ;;  %v3014_v24 = vld [vmem:[#allocation22 + $0x28] sm:$0xff] }
 0xbbb   :  { %v3734_v26 = vpack.c.bf16 %v3014_v24, %v3013_v23 }
 0xbbc   :  { %v2796_v27 = vrot.slane %v2795_v13, 1 }
 0xbbd   :  { %3735 = vmatpush3.bf16.msra.mxu1 %v3734_v26 }
 0xbbe   :  { %v2797_v36 = vadd.f32 %v2796_v27, %v2795_v13  ;;  %3736 = vmatprep.subr.bf16.mxu1 %v4342_v0  ;;  %v3015_v13 = vld [vmem:[#allocation22 + $0x30] sm:$0xff]  ;;  %v3016_v27 = vld [vmem:[#allocation22 + $0x38] sm:$0xff] }
 0xbc0   :  { %v2798_v37 = vmul.f32 0.125, %v2797_v36  ;;  %v3737_v36 = vpack.c.bf16 %v3016_v27, %v3015_v13 }
 0xbc2   :  { %v2806_v38 = vadd.f32 1e-05, %v2798_v37  ;;  %3738 = vmatpush3.bf16.msra.mxu1 %v3737_v36  ;;  %v3017_v37 = vld [vmem:[#allocation22 + $0x40] sm:$0xff] }
 0xbc3   :  { %3739 = vmatprep.subr.bf16.mxu1 %v4342_v0 }
 0xbc4   :  { %3970 = vrsqrt.f32 %v2806_v38  ;;  %v3018_v38 = vld [vmem:[#allocation22 + $0x48] sm:$0xff] }
 0xbc5   :  { %v3740_v39 = vpack.c.bf16 %v3018_v38, %v3017_v37 }
 0xbc7   :  { %3741 = vmatpush3.bf16.msra.mxu1 %v3740_v39 }
 0xbc8   :  { %3742 = vmatprep.subr.bf16.mxu1 %v4342_v0 }
 0xbce   :  { %v3971_v42 = vpop.eup %3970 }
 0xbcf   :  { %v2808_v45 = vmul.f32 %v3971_v42, %v2805_v41  ;;  %v3019_v41 = vld [vmem:[#allocation22 + $0x50] sm:$0xff]  ;;  %v3020_v42 = vld [vmem:[#allocation22 + $0x58] sm:$0xff] }
 0xbd1   :  { %v2815_v46 = vadd.f32 %v3158_v43, %v2808_v45  ;;  %v3743_v43 = vpack.c.bf16 %v3020_v42, %v3019_v41  ;;  %v3021_v45 = vld [vmem:[#allocation22 + $0x60] sm:$0xff] }
 0xbd3   :  { %v2816_v47 = vadd.f32 %v2815_v46, %v4849_v25  ;;  %v2908_v25 = vld [vmem:[%s5026_s15] sm:$0xff]  ;;  %3744 = vmatpush3.bf16.msra.mxu1 %v3743_v43  ;;  %v3022_v46 = vld [vmem:[#allocation22 + $0x68] sm:$0xff] }
 0xbd4   :  { %v3704_v7 = vpack.c.bf16 %v2909_v6, %v2908_v25  ;;  %3745 = vmatprep.subr.bf16.mxu1 %v4342_v0 }
 0xbd5   :  { %v2818_v49 = vmin.f32 %v2816_v47, 20.0  ;;  %vm2817_vm4 = vcmp.gt.f32.partialorder %v2816_v47, 20.0 }
 0xbd7   :  { %v2819_v55 = vmul.f32 1.442695, %v2818_v49  ;;  %v3023_v49 = vld [vmem:[#allocation22 + $0x70] sm:$0xff] }
 0xbd9   :  { %3972 = vpow2.f32 %v2819_v55  ;;  %v3024_v55 = vld [vmem:[#allocation22 + $0x78] sm:$0xff] }
 0xbe3   :  { %v3973_v30 = vpop.eup %3972 }
 0xbe4   :  { %v2821_v40 = vadd.f32 1.0, %v3973_v30  ;;  %v3749_v30 = vpack.c.bf16 %v3024_v55, %v3023_v49 }
 0xbe6   :  { %3974 = vlog2.f32 %v2821_v40  ;;  %v3160_v40 = vld [vmem:[%s5027_s16] ss:$0 sm:$0xff]  ;;  %s3109_s16 = sshll.u32 %s4345_s4, 4  ;;  %s3110_s16 = int_to_ptr.vmem [resolvable:$true] %s3109_s16 }
 0xbe7   :  { %s4283_s23 = scalar_lea.vmem %s3110_s16, 128  ;;  %p4288_p7 = scmp.lt.s32.totalorder %s3110_s16, %s3110_s16 }
 0xbe8   :  { %p4284_p6 = scmp.ne.s32.totalorder %s3110_s16, %s4283_s23  ;;  %p4289_p8 = scmp.lt.s32.totalorder %s4283_s23, %s4283_s23 }
 0xbea   :  { %p4290_p9 = por %p4289_p8, %p4288_p7 }
 0xbec   :  { %p4291_p10 = pnand %p4290_p9, %p4284_p6 }
 0xbf0   :  { %v3975_v48 = vpop.eup %3974 }
 0xbf1   :  { %v2823_v32 = vmul.f32 0.6931472, %v3975_v48 }
 0xbf3   :  { %v2824_v33 = vsel %vm2817_vm4, %v2816_v47, %v2823_v32  ;;  %v3746_v47 = vpack.c.bf16 %v3022_v46, %v3021_v45 }
 0xbf4   :  { %v2825_v35 = vmul.f32 %v4757_v17, %v2824_v33  ;;  %v2910_v17 = vld [vmem:[%s5026_s15 + $0x10] sm:$0xff] }
 0xbf5   :  { %3747 = vmatpush3.bf16.msra.mxu1 %v3746_v47 }
 0xbf6   :  { %3299 = vmatpush3.msra.mxu0 %v2825_v35  ;;  %3748 = vmatprep.subr.bf16.mxu1 %v4342_v0 }
 0xbf7   :  { %3301 = vmatmul.mubr.msk.f32.vlgmr.msra.gmra.mrb[26].mxu0 %vm684_vm1, %v2826_v5  ;;  %3703 = vmatprep.subr.bf16.mxu0 %v4342_v0 }
 0xbf8   :  { %3335 = vmatprep.mubr.msk.f32.mxu0 %vm4343_vm0, %v4344_v1  ;;  %3705 = vmatpush3.bf16.msra.mxu0 %v3704_v7  ;;  %v2911_v1 = vld [vmem:[%s5026_s15 + $0x18] sm:$0xff] }
 0xbf9   :  { %3706 = vmatprep.subr.bf16.mxu0 %v4342_v0  ;;  %v3707_v28 = vpack.c.bf16 %v2911_v1, %v2910_v17  ;;  %3750 = vmatpush3.bf16.msra.mxu1 %v3749_v30  ;;  %v3161_v1 = vld [vmem:[%s5029_s18] ss:$0 sm:$0xff] }
 0xbfc   :  { %3708 = vmatpush3.bf16.msra.mxu0 %v3707_v28 }
 0xbfd   :  { %3709 = vmatprep.subr.bf16.mxu0 %v4342_v0 }
 0xc00   :  { %3711 = vmatpush3.bf16.msra.mxu0 %v3710_v56 }
 0xc01   :  { %3712 = vmatprep.subr.bf16.mxu0 %v4342_v0 }
 0xc04   :  { %3714 = vmatpush3.bf16.msra.mxu0 %v3713_v10 }
 0xc05   :  { %3715 = vmatprep.subr.bf16.mxu0 %v4342_v0 }
 0xc08   :  { %3717 = vmatpush3.bf16.msra.mxu0 %v3716_v54 }
 0xc09   :  { %3718 = vmatprep.subr.bf16.mxu0 %v4342_v0 }
 0xc0c   :  { %3720 = vmatpush3.bf16.msra.mxu0 %v3719_v11 }
 0xc0d   :  { %3721 = vmatprep.subr.bf16.mxu0 %v4342_v0 }
 0xc10   :  { %3723 = vmatpush3.bf16.msra.mxu0 %v3722_v31 }
 0xc11   :  { %3724 = vmatprep.subr.bf16.mxu0 %v4342_v0 }
 0xc14   :  { %3726 = vmatpush3.bf16.msra.mxu0 %v3725_v50 }
 0xcca   :  { %v2896_v61 = vpop.f32.mrb[26].mxu0 }
 0xccb   :  { %v2901_v9 = vmin.f32 %v2896_v61, 20.0  ;;  %v3302_v60 = vpop.f32.mrb[27].mxu0  ;;  %vm2900_vm0 = vcmp.gt.f32.partialorder %v2896_v61, 20.0 }
 0xccd   :  { %v2902_v16 = vmul.f32 1.442695, %v2901_v9 }
 0xccf   :  { %3976 = vpow2.f32 %v2902_v16 }
 0xcd9   :  { %v3977_v15 = vpop.eup %3976 }
 0xcda   :  { %v2904_v19 = vadd.f32 1.0, %v3977_v15 }
 0xcdc   :  { %3978 = vlog2.f32 %v2904_v19 }
 0xce6   :  { %v3979_v4 = vpop.eup %3978 }
 0xce7   :  { %v2906_v20 = vmul.f32 0.6931472, %v3979_v4 }
 0xce9   :  { %v2907_v62 = vsel %vm2900_vm0, %v2896_v61, %v2906_v20 }
 0xcea   :  { %3336 = vmatmul.mubr.f32.vlgmr.msra.gmra.mrb[28].mxu0 %v2907_v62 }
 0xdbd   :  { %v2997_v48 = vpop.f32.mrb[28].mxu0 }
 0xdbe   :  { %v2998_v32 = vadd.f32 %v3160_v40, %v2997_v48  ;;  %v3337_v33 = vpop.f32.mrb[29].mxu0 }
 0xdc0   :  { %v3002_v35 = vmin.f32 %v2998_v32, 20.0  ;;  %vm3001_vm1 = vcmp.gt.f32.partialorder %v2998_v32, 20.0 }
 0xdc2   :  { %v3003_v5 = vmul.f32 1.442695, %v3002_v35 }
 0xdc4   :  { %3980 = vpow2.f32 %v3003_v5 }
 0xdce   :  { %v3981_v25 = vpop.eup %3980 }
 0xdcf   :  { %v3005_v6 = vadd.f32 1.0, %v3981_v25 }
 0xdd1   :  { %3982 = vlog2.f32 %v3005_v6 }
 0xddb   :  { %v3983_v7 = vpop.eup %3982 }
 0xddc   :  { %v3007_v17 = vmul.f32 0.6931472, %v3983_v7 }
 0xdde   :  { %v3008_v0 = vsel %vm3001_vm1, %v2998_v32, %v3007_v17 }
 0xddf   :  { %3371 = vmatmul.mubr.f32.vlgmr.msra.gmra.mrb[30].mxu1 %v3008_v0 }
 0xeb2   :  { %v3098_v28 = vpop.f32.mrb[30].mxu1 }
 0xeb3   :  { %v3099_v29 = vadd.f32 %v3161_v1, %v3098_v28  ;;  %v3372_v18 = vpop.f32.mrb[31].mxu1 }
 0xeb5   :  { %3102 = vst [vmem:[#allocation23] sm:$0xff] %v3099_v29 }
 0xeb6   :  { %4294 = shalt.err (!%p4291_p10)
}
 0xeb7   :  { %s4295_s24 = scalar_lea.hbm %s5030_s19, 128 }
 0xeb8   :  { %p4296_p11 = scmp.ne.s32.totalorder %s5030_s19, %s4295_s24  ;;  %p4299_p12 = scmp.lt.u32.totalorder %s4295_s24, %s5030_s19 }
 0xeba   :  { %p4301_p13 = pnand %p4299_p12, %p4296_p11 }
 0xebc   :  { %4304 = shalt.err (!%p4301_p13)
}
 0xebd   :  { %3112 = dma.vmem_to_hbm [thread:$0]  %s3110_s16, 128, %s5030_s19, [#allocation4]  }
 0xebe   :  { %4319 = dma.done.wait [#allocation4], 128  }
 0xebf   :  { %4320 = vsyncadd [#allocation4], 4294967168 }
 0xec0   :  { %3116 = vsyncpa [#allocation3], 1 }
 0xec1   :  { %3117 = vsyncpa [#allocation6], 1 }
 0xec2   :  { %3118 = vsyncpa [#allocation9], 1 }
 0xec3   :  { %3119 = vsyncpa [#allocation12], 1 }
 0xec4   :  { %3120 = vsyncpa [#allocation15], 1 }
 0xec5   :  { %3121 = vsyncpa [#allocation18], 1 }
 0xec6   :  { %3122 = vsyncpa [#allocation21], 1 }
 0xec7   :  { %3123 = vsyncpa [#allocation4], 1 }

</bundles_post_ra>
